<compile_context>
chip_gen: v7x
topology: tpu7x:2x2x1
jax: 0.10.0
libtpu: 0.0.40
codegen_flags: <defaults>
</compile_context>

<pallas_src>
import functools

import jax
import jax.numpy as jnp
from jax import lax
from jax.experimental import pallas as pl
from jax.experimental.pallas import tpu as pltpu


# ----------------------------------------------------------------------------
# Fused Pallas kernel: full forward pass
# ----------------------------------------------------------------------------
def _svs_fused_kernel(x_ref,            # (T*Bp, Din)  padded batch, flattened
                      p_ref,            # (rows, 128)  packed parameter slab
                      mutheta_ref,      # (Bp, S*O)    lane-dense output slab
                      mu_ref,           # (Bp, L)
                      *, T, S, Bp, M, L, Mo, O, layout):
    f32 = jnp.float32

    def get(name):
        r0, nr, nc = layout[name]                 # static offsets
        return p_ref[r0:r0 + nr, 0:nc]

    def cell(gates, c, H):
        # gate order is [i, f, o, g]: sigmoid over contiguous 3H, tanh on last H
        sg = jax.nn.sigmoid(gates[:, 0:3 * H])
        i = sg[:, 0:H]
        f = sg[:, H:2 * H]
        o = sg[:, 2 * H:3 * H]
        g = jnp.tanh(gates[:, 3 * H:4 * H])
        c_new = f * c + i * g
        h_new = o * jnp.tanh(c_new)
        return h_new, c_new

    # ---------------- encoder: fc1 + fc21, interleaved ----------------------
    wih1 = get("wih1"); whh1 = get("whh1"); b1 = get("b1")
    w21 = get("w21");   b21 = get("b21")

    # Hoisted input projection for fc1: one lane-dense matmul for all T steps.
    xg1 = jnp.dot(x_ref[...], wih1, preferred_element_type=f32) + b1   # (T*Bp, 4M)

    h1 = jnp.zeros((Bp, M), f32); c1 = jnp.zeros((Bp, M), f32)
    h21 = jnp.zeros((Bp, L), f32); c21 = jnp.zeros((Bp, L), f32)
    for t in range(T):                                   # statically unrolled
        # fc1 step t : only the recurrent dot is serial
        g1 = jnp.dot(h1, whh1, preferred_element_type=f32) + xg1[t * Bp:(t + 1) * Bp, :]
        h1, c1 = cell(g1, c1, M)
        # fc21 step t : fused [relu(h1_t), h21] @ [Wih21; Whh21] single dot
        x21 = jnp.concatenate([jnp.maximum(h1, 0.0), h21], axis=-1)
        g2 = jnp.dot(x21, w21, preferred_element_type=f32) + b21
        h21, c21 = cell(g2, c21, L)

    z = h21                                              # squeeze(hidden_mean)
    mu_ref[...] = z

    # ---------------- decoder: lstm3 -> lstm4 -> lstm5 ----------------------
    # idlinear / lineardown2 are pre-folded into lstm3's input projection.
    w0_3 = get("w0_3"); b0_3 = get("b0_3")
    wdn3 = get("wdn3"); bdn3 = get("bdn3")
    w4 = get("w4");     b4 = get("b4")
    w5 = get("w5");     b5 = get("b5")

    h_t = z
    c_t = c21                                            # squeeze(cell_mean)
    h2 = jnp.zeros((Bp, Mo), f32); c2 = jnp.zeros((Bp, Mo), f32)
    h3 = jnp.zeros((Bp, O), f32);  c3 = jnp.zeros((Bp, O), f32)
    for s in range(S):                                   # statically unrolled
        if s == 0:
            # g3 = (idlinear(z)) @ Wih3^T + z @ Whh3^T + b3, folded into one dot
            g3 = jnp.dot(z, w0_3, preferred_element_type=f32) + b0_3
        else:
            # g3 = (lineardown2(h3)) @ Wih3^T + h_t @ Whh3^T + b3, one dot
            x3 = jnp.concatenate([h3, h_t], axis=-1)
            g3 = jnp.dot(x3, wdn3, preferred_element_type=f32) + bdn3
        h_t, c_t = cell(g3, c_t, L)

        x4 = jnp.concatenate([h_t, h2], axis=-1)
        g4 = jnp.dot(x4, w4, preferred_element_type=f32) + b4
        h2, c2 = cell(g4, c2, Mo)

        x5 = jnp.concatenate([h2, h3], axis=-1)
        g5 = jnp.dot(x5, w5, preferred_element_type=f32) + b5
        h3, c3 = cell(g5, c3, O)

        # lane-dense accumulation: one (Bp, S*O) slab, stored to HBM once
        mutheta_ref[:, s * O:(s + 1) * O] = h3


# ----------------------------------------------------------------------------
# Wrapper
# ----------------------------------------------------------------------------
def svs_forward(params, x, *, seq_length):
    """params: output of prepare_params(); x: (T, B, input_dim) float32."""
    packed, layout, dims = params["packed"], params["layout"], params["dims"]
    T, B, Din = x.shape
    M, L, Mo, O = dims["M"], dims["L"], dims["Mo"], dims["O"]

    # Pad batch to one full sublane tile (8 rows): aligned, unmasked slices.
    Bp = ((max(B, 1) + 7) // 8) * 8
    x_p = jnp.zeros((T, Bp, Din), jnp.float32).at[:, :B, :].set(x.astype(jnp.float32))
    x_flat = x_p.reshape(T * Bp, Din)

    kernel = functools.partial(_svs_fused_kernel, T=T, S=seq_length,
                               Bp=Bp, M=M, L=L, Mo=Mo, O=O, layout=layout)

    vmem = pl.BlockSpec(memory_space=pltpu.MemorySpace.VMEM)
    mutheta_slab, mu_p = pl.pallas_call(
        kernel,
        out_shape=(jax.ShapeDtypeStruct((Bp, seq_length * O), jnp.float32),
                   jax.ShapeDtypeStruct((Bp, L), jnp.float32)),
        in_specs=[vmem, vmem],
        out_specs=(vmem, vmem),
    )(x_flat, packed)

    mutheta = mutheta_slab.reshape(Bp, seq_length, O).transpose(1, 0, 2)[:, :B, :]
    mu = mu_p[:B, :]
    return mutheta, mu


# ----------------------------------------------------------------------------
# Parameter prep (done ONCE): transpose, reorder gates to [i,f,o,g], fold
# idlinear/lineardown2 into lstm3, K-concat each cell's weight pair, then
# pack everything into a single (rows, 128) f32 slab (one DMA per call).
# ----------------------------------------------------------------------------
def prepare_params(raw):
    def perm(a):
        # reorder gate blocks along axis 0 from PyTorch [i,f,g,o] to [i,f,o,g]
        i, f, g, o = jnp.split(a, 4, axis=0)
        return jnp.concatenate([i, f, o, g], axis=0)

    def lstm(p):
        w_ih, w_hh, b_ih, b_hh = p
        return (perm(w_ih).T, perm(w_hh).T, perm(b_ih + b_hh).reshape(1, -1))

    wih1, whh1, b1 = lstm(raw["fc1"])          # (Din,4M), (M,4M), (1,4M)
    wih21, whh21, b21 = lstm(raw["fc21"])      # (M,4L), (L,4L), (1,4L)
    wih3, whh3, b3 = lstm(raw["lstm3"])        # (L,4L), (L,4L), (1,4L)
    wih4, whh4, b4 = lstm(raw["lstm4"])        # (L,4Mo), (Mo,4Mo), (1,4Mo)
    wih5, whh5, b5 = lstm(raw["lstm5"])        # (Mo,4O), (O,4O), (1,4O)

    w_id, b_id = raw["idlinear"]               # (L,L), (L,)
    w_dn, b_dn = raw["lineardown2"]            # (L,O), (L,)
    wid_t = w_id.T                             # (L,L)
    wdn_t = w_dn.T                             # (O,L)

    # Fold idlinear into lstm3 step 0:  g3_0 = z @ (Wid^T Wih3 + Whh3) + (b_id Wih3 + b3)
    w0_3 = wid_t @ wih3 + whh3                               # (L, 4L)
    b0_3 = b_id.reshape(1, -1) @ wih3 + b3                   # (1, 4L)
    # Fold lineardown2 into lstm3 steps >= 1 with a K-concat of [h3, h_t]
    wdn3 = jnp.concatenate([wdn_t @ wih3, whh3], axis=0)     # (O+L, 4L)
    bdn3 = b_dn.reshape(1, -1) @ wih3 + b3                   # (1, 4L)

    # K-concat weight stacks for the remaining cells
    w21 = jnp.concatenate([wih21, whh21], axis=0)            # (M+L, 4L)
    w4 = jnp.concatenate([wih4, whh4], axis=0)               # (L+Mo, 4Mo)
    w5 = jnp.concatenate([wih5, whh5], axis=0)               # (Mo+O, 4O)

    named = {
        "wih1": wih1, "whh1": whh1, "b1": b1,
        "w21": w21, "b21": b21,
        "w0_3": w0_3, "b0_3": b0_3,
        "wdn3": wdn3, "bdn3": bdn3,
        "w4": w4, "b4": b4,
        "w5": w5, "b5": b5,
    }

    # Pack into one (rows, 128) slab: each block sublane-aligned (8-row padded),
    # lane-padded to 128.  Kernel slices by static offsets.
    layout = {}
    blocks = []
    off = 0
    for name, a in named.items():
        a = jnp.asarray(a, jnp.float32)
        r, c = a.shape
        rpad = ((r + 7) // 8) * 8
        block = jnp.zeros((rpad, 128), jnp.float32).at[:r, :c].set(a)
        blocks.append(block)
        layout[name] = (off, r, c)
        off += rpad
    packed = jnp.concatenate(blocks, axis=0)

    dims = {
        "M": raw["fc1"][1].shape[1],
        "L": raw["fc21"][1].shape[1],
        "Mo": raw["lstm4"][1].shape[1],
        "O": raw["lstm5"][1].shape[1],
    }
    return {"packed": packed, "layout": layout, "dims": dims}


# ----------------------------------------------------------------------------
# Deterministic PyTorch-style synthetic init (PyTorch parameter layouts).
# fc22 / reparameterize() are unused by forward() and omitted.
# ----------------------------------------------------------------------------
def _lstm_params(key, in_dim, hidden):
    k = 1.0 / jnp.sqrt(jnp.float32(hidden))
    ks = jax.random.split(key, 4)
    w_ih = jax.random.uniform(ks[0], (4 * hidden, in_dim), jnp.float32, -k, k)
    w_hh = jax.random.uniform(ks[1], (4 * hidden, hidden), jnp.float32, -k, k)
    b_ih = jax.random.uniform(ks[2], (4 * hidden,), jnp.float32, -k, k)
    b_hh = jax.random.uniform(ks[3], (4 * hidden,), jnp.float32, -k, k)
    return (w_ih, w_hh, b_ih, b_hh)


def _linear_params(key, in_dim, out_dim):
    k = 1.0 / jnp.sqrt(jnp.float32(in_dim))
    ks = jax.random.split(key, 2)
    w = jax.random.uniform(ks[0], (out_dim, in_dim), jnp.float32, -k, k)
    b = jax.random.uniform(ks[1], (out_dim,), jnp.float32, -k, k)
    return (w, b)


def init_raw_params(key, input_dim, output_dim, mid_dim_i, mid_dim_o, latent_dim):
    ks = jax.random.split(key, 7)
    return {
        "fc1": _lstm_params(ks[0], input_dim, mid_dim_i),
        "fc21": _lstm_params(ks[1], mid_dim_i, latent_dim),
        "lstm3": _lstm_params(ks[2], latent_dim, latent_dim),
        "lstm4": _lstm_params(ks[3], latent_dim, mid_dim_o),
        "lstm5": _lstm_params(ks[4], mid_dim_o, output_dim),
        "idlinear": _linear_params(ks[5], latent_dim, latent_dim),
        "lineardown2": _linear_params(ks[6], output_dim, latent_dim),
    }


# ----------------------------------------------------------------------------
# Pure-JAX reference (mirrors the PyTorch forward) for a sanity check
# ----------------------------------------------------------------------------
def _lstm_seq_ref(x, w_ih, w_hh, b_ih, b_hh):
    B = x.shape[1]
    H = w_hh.shape[1]

    def step(carry, x_t):
        h, c = carry
        gates = x_t @ w_ih.T + b_ih + h @ w_hh.T + b_hh
        i, f, g, o = jnp.split(gates, 4, axis=-1)
        c = jax.nn.sigmoid(f) * c + jax.nn.sigmoid(i) * jnp.tanh(g)
        h = jax.nn.sigmoid(o) * jnp.tanh(c)
        return (h, c), h

    (h_T, c_T), out = lax.scan(step, (jnp.zeros((B, H)), jnp.zeros((B, H))), x)
    return out, h_T, c_T


def _lstm_cell_ref(x, hc, w_ih, w_hh, b_ih, b_hh):
    h, c = hc
    gates = x @ w_ih.T + b_ih + h @ w_hh.T + b_hh
    i, f, g, o = jnp.split(gates, 4, axis=-1)
    c = jax.nn.sigmoid(f) * c + jax.nn.sigmoid(i) * jnp.tanh(g)
    h = jax.nn.sigmoid(o) * jnp.tanh(c)
    return h, c


def svs_forward_ref(raw, x, *, seq_length):
    B = x.shape[1]
    out1, _, _ = _lstm_seq_ref(x, *raw["fc1"])
    h1 = jnp.maximum(out1, 0.0)
    _, h_mean, c_mean = _lstm_seq_ref(h1, *raw["fc21"])
    z, c_t = h_mean, c_mean

    w_id, b_id = raw["idlinear"]
    w_dn, b_dn = raw["lineardown2"]
    Mo = raw["lstm4"][1].shape[1]
    O = raw["lstm5"][1].shape[1]

    output = z @ w_id.T + b_id
    h_t = z
    h2 = jnp.zeros((B, Mo)); c2 = jnp.zeros((B, Mo))
    h3 = jnp.zeros((B, O));  c3 = jnp.zeros((B, O))
    outs = []
    for _ in range(seq_length):
        h_t, c_t = _lstm_cell_ref(output, (h_t, c_t), *raw["lstm3"])
        h2, c2 = _lstm_cell_ref(h_t, (h2, c2), *raw["lstm4"])
        h3, c3 = _lstm_cell_ref(h2, (h3, c3), *raw["lstm5"])
        output = h3 @ w_dn.T + b_dn
        outs.append(h3)
    return jnp.stack(outs, 0), z


# ----------------------------------------------------------------------------
if __name__ == "__main__":
    # Small shapes consistent with the module's forward.
    input_dim, output_dim, seq_length = 8, 16, 8
    mid_dim_i, mid_dim_o, latent_dim = 16, 32, 8
    batch = 2

    key = jax.random.PRNGKey(0)
    k_param, k_x = jax.random.split(key)
    raw = init_raw_params(k_param, input_dim, output_dim, mid_dim_i, mid_dim_o, latent_dim)
    params = prepare_params(raw)
    x = jax.random.normal(k_x, (seq_length, batch, input_dim), jnp.float32)

    mutheta, mu = svs_forward(params, x, seq_length=seq_length)
    mutheta, mu = jax.block_until_ready((mutheta, mu))

    mt_ref, mu_ref = svs_forward_ref(raw, x, seq_length=seq_length)
    assert mutheta.shape == (seq_length, batch, output_dim)
    assert mu.shape == (batch, latent_dim)
    assert jnp.allclose(mutheta, mt_ref, rtol=1e-2, atol=1e-2)
    assert jnp.allclose(mu, mu_ref, rtol=1e-2, atol=1e-2)

    print("KERNEL_OK")
</pallas_src>

<mosaic_0001>
module attributes {stable_mosaic.version = 11 : i64} {
  func.func @_svs_fused_kernel(%arg0: memref<64x8xf32, #tpu.memory_space<vmem>>, %arg1: memref<216x128xf32, #tpu.memory_space<vmem>>, %arg2: memref<8x128xf32, #tpu.memory_space<vmem>>, %arg3: memref<8x8xf32, #tpu.memory_space<vmem>>) attributes {dimension_semantics = [], scalar_prefetch = 0 : i64, scratch_operands = 0 : i64, tpu.core_type = #tpu.core_type<tc>} {
    %c0 = arith.constant 0 : index
    %c0_0 = arith.constant 0 : index
    %0 = vector.load %arg1[%c0, %c0_0] : memref<216x128xf32, #tpu.memory_space<vmem>>, vector<8x64xf32>
    %c8 = arith.constant 8 : index
    %c0_1 = arith.constant 0 : index
    %1 = vector.load %arg1[%c8, %c0_1] : memref<216x128xf32, #tpu.memory_space<vmem>>, vector<16x64xf32>
    %c24 = arith.constant 24 : index
    %c0_2 = arith.constant 0 : index
    %2 = vector.load %arg1[%c24, %c0_2] : memref<216x128xf32, #tpu.memory_space<vmem>>, vector<1x64xf32>
    %c32 = arith.constant 32 : index
    %c0_3 = arith.constant 0 : index
    %3 = vector.load %arg1[%c32, %c0_3] : memref<216x128xf32, #tpu.memory_space<vmem>>, vector<24x32xf32>
    %c56 = arith.constant 56 : index
    %c0_4 = arith.constant 0 : index
    %4 = vector.load %arg1[%c56, %c0_4] : memref<216x128xf32, #tpu.memory_space<vmem>>, vector<1x32xf32>
    %c0_5 = arith.constant 0 : index
    %c0_6 = arith.constant 0 : index
    %5 = vector.load %arg0[%c0_5, %c0_6] : memref<64x8xf32, #tpu.memory_space<vmem>>, vector<64x8xf32>
    %cst = arith.constant dense<0.000000e+00> : vector<64x64xf32>
    %6 = tpu.matmul %5, %0, %cst {dimension_numbers = #tpu.dot_dimension_numbers<[1], [0], [0], [1], [0, 0, 1, 1], [], []>} : vector<64x8xf32>, vector<8x64xf32>, vector<64x64xf32> -> vector<64x64xf32>
    %7 = vector.broadcast %2 : vector<1x64xf32> to vector<64x64xf32>
    %8 = arith.addf %6, %7 : vector<64x64xf32>
    %cst_7 = arith.constant 0.000000e+00 : f32
    %9 = vector.broadcast %cst_7 : f32 to vector<8x16xf32>
    %cst_8 = arith.constant 0.000000e+00 : f32
    %10 = vector.broadcast %cst_8 : f32 to vector<8x16xf32>
    %cst_9 = arith.constant 0.000000e+00 : f32
    %11 = vector.broadcast %cst_9 : f32 to vector<8x8xf32>
    %cst_10 = arith.constant 0.000000e+00 : f32
    %12 = vector.broadcast %cst_10 : f32 to vector<8x8xf32>
    %cst_11 = arith.constant dense<0.000000e+00> : vector<8x64xf32>
    %13 = tpu.matmul %9, %1, %cst_11 {dimension_numbers = #tpu.dot_dimension_numbers<[1], [0], [0], [1], [0, 0, 1, 1], [], []>} : vector<8x16xf32>, vector<16x64xf32>, vector<8x64xf32> -> vector<8x64xf32>
    %14 = vector.extract_strided_slice %8 {offsets = [0, 0], sizes = [8, 64], strides = [1, 1]} : vector<64x64xf32> to vector<8x64xf32>
    %15 = arith.addf %13, %14 : vector<8x64xf32>
    %16 = vector.extract_strided_slice %15 {offsets = [0, 0], sizes = [8, 48], strides = [1, 1]} : vector<8x64xf32> to vector<8x48xf32>
    %17 = arith.negf %16 : vector<8x48xf32>
    %18 = math.exp %17 : vector<8x48xf32>
    %cst_12 = arith.constant 1.000000e+00 : f32
    %19 = vector.broadcast %cst_12 : f32 to vector<8x48xf32>
    %20 = arith.addf %19, %18 : vector<8x48xf32>
    %21 = arith.divf %19, %20 : vector<8x48xf32>
    %22 = vector.extract_strided_slice %21 {offsets = [0, 0], sizes = [8, 16], strides = [1, 1]} : vector<8x48xf32> to vector<8x16xf32>
    %23 = vector.extract_strided_slice %21 {offsets = [0, 16], sizes = [8, 16], strides = [1, 1]} : vector<8x48xf32> to vector<8x16xf32>
    %24 = vector.extract_strided_slice %21 {offsets = [0, 32], sizes = [8, 16], strides = [1, 1]} : vector<8x48xf32> to vector<8x16xf32>
    %25 = vector.extract_strided_slice %15 {offsets = [0, 48], sizes = [8, 16], strides = [1, 1]} : vector<8x64xf32> to vector<8x16xf32>
    %26 = math.tanh %25 : vector<8x16xf32>
    %27 = arith.mulf %23, %10 : vector<8x16xf32>
    %28 = arith.mulf %22, %26 : vector<8x16xf32>
    %29 = arith.addf %27, %28 : vector<8x16xf32>
    %30 = math.tanh %29 : vector<8x16xf32>
    %31 = arith.mulf %24, %30 : vector<8x16xf32>
    %cst_13 = arith.constant 0.000000e+00 : f32
    %32 = vector.broadcast %cst_13 : f32 to vector<8x16xf32>
    %33 = arith.maximumf %31, %32 : vector<8x16xf32>
    %34 = tpu.concatenate %33, %11 in 1 : vector<8x16xf32>, vector<8x8xf32> -> vector<8x24xf32>
    %cst_14 = arith.constant dense<0.000000e+00> : vector<8x32xf32>
    %35 = tpu.matmul %34, %3, %cst_14 {dimension_numbers = #tpu.dot_dimension_numbers<[1], [0], [0], [1], [0, 0, 1, 1], [], []>} : vector<8x24xf32>, vector<24x32xf32>, vector<8x32xf32> -> vector<8x32xf32>
    %36 = vector.broadcast %4 : vector<1x32xf32> to vector<8x32xf32>
    %37 = arith.addf %35, %36 : vector<8x32xf32>
    %38 = vector.extract_strided_slice %37 {offsets = [0, 0], sizes = [8, 24], strides = [1, 1]} : vector<8x32xf32> to vector<8x24xf32>
    %39 = arith.negf %38 : vector<8x24xf32>
    %40 = math.exp %39 : vector<8x24xf32>
    %cst_15 = arith.constant 1.000000e+00 : f32
    %41 = vector.broadcast %cst_15 : f32 to vector<8x24xf32>
    %42 = arith.addf %41, %40 : vector<8x24xf32>
    %43 = arith.divf %41, %42 : vector<8x24xf32>
    %44 = vector.extract_strided_slice %43 {offsets = [0, 0], sizes = [8, 8], strides = [1, 1]} : vector<8x24xf32> to vector<8x8xf32>
    %45 = vector.extract_strided_slice %43 {offsets = [0, 8], sizes = [8, 8], strides = [1, 1]} : vector<8x24xf32> to vector<8x8xf32>
    %46 = vector.extract_strided_slice %43 {offsets = [0, 16], sizes = [8, 8], strides = [1, 1]} : vector<8x24xf32> to vector<8x8xf32>
    %47 = vector.extract_strided_slice %37 {offsets = [0, 24], sizes = [8, 8], strides = [1, 1]} : vector<8x32xf32> to vector<8x8xf32>
    %48 = math.tanh %47 : vector<8x8xf32>
    %49 = arith.mulf %45, %12 : vector<8x8xf32>
    %50 = arith.mulf %44, %48 : vector<8x8xf32>
    %51 = arith.addf %49, %50 : vector<8x8xf32>
    %52 = math.tanh %51 : vector<8x8xf32>
    %53 = arith.mulf %46, %52 : vector<8x8xf32>
    %cst_16 = arith.constant dense<0.000000e+00> : vector<8x64xf32>
    %54 = tpu.matmul %31, %1, %cst_16 {dimension_numbers = #tpu.dot_dimension_numbers<[1], [0], [0], [1], [0, 0, 1, 1], [], []>} : vector<8x16xf32>, vector<16x64xf32>, vector<8x64xf32> -> vector<8x64xf32>
    %55 = vector.extract_strided_slice %8 {offsets = [8, 0], sizes = [8, 64], strides = [1, 1]} : vector<64x64xf32> to vector<8x64xf32>
    %56 = arith.addf %54, %55 : vector<8x64xf32>
    %57 = vector.extract_strided_slice %56 {offsets = [0, 0], sizes = [8, 48], strides = [1, 1]} : vector<8x64xf32> to vector<8x48xf32>
    %58 = arith.negf %57 : vector<8x48xf32>
    %59 = math.exp %58 : vector<8x48xf32>
    %cst_17 = arith.constant 1.000000e+00 : f32
    %60 = vector.broadcast %cst_17 : f32 to vector<8x48xf32>
    %61 = arith.addf %60, %59 : vector<8x48xf32>
    %62 = arith.divf %60, %61 : vector<8x48xf32>
    %63 = vector.extract_strided_slice %62 {offsets = [0, 0], sizes = [8, 16], strides = [1, 1]} : vector<8x48xf32> to vector<8x16xf32>
    %64 = vector.extract_strided_slice %62 {offsets = [0, 16], sizes = [8, 16], strides = [1, 1]} : vector<8x48xf32> to vector<8x16xf32>
    %65 = vector.extract_strided_slice %62 {offsets = [0, 32], sizes = [8, 16], strides = [1, 1]} : vector<8x48xf32> to vector<8x16xf32>
    %66 = vector.extract_strided_slice %56 {offsets = [0, 48], sizes = [8, 16], strides = [1, 1]} : vector<8x64xf32> to vector<8x16xf32>
    %67 = math.tanh %66 : vector<8x16xf32>
    %68 = arith.mulf %64, %29 : vector<8x16xf32>
    %69 = arith.mulf %63, %67 : vector<8x16xf32>
    %70 = arith.addf %68, %69 : vector<8x16xf32>
    %71 = math.tanh %70 : vector<8x16xf32>
    %72 = arith.mulf %65, %71 : vector<8x16xf32>
    %cst_18 = arith.constant 0.000000e+00 : f32
    %73 = vector.broadcast %cst_18 : f32 to vector<8x16xf32>
    %74 = arith.maximumf %72, %73 : vector<8x16xf32>
    %75 = tpu.concatenate %74, %53 in 1 : vector<8x16xf32>, vector<8x8xf32> -> vector<8x24xf32>
    %cst_19 = arith.constant dense<0.000000e+00> : vector<8x32xf32>
    %76 = tpu.matmul %75, %3, %cst_19 {dimension_numbers = #tpu.dot_dimension_numbers<[1], [0], [0], [1], [0, 0, 1, 1], [], []>} : vector<8x24xf32>, vector<24x32xf32>, vector<8x32xf32> -> vector<8x32xf32>
    %77 = vector.broadcast %4 : vector<1x32xf32> to vector<8x32xf32>
    %78 = arith.addf %76, %77 : vector<8x32xf32>
    %79 = vector.extract_strided_slice %78 {offsets = [0, 0], sizes = [8, 24], strides = [1, 1]} : vector<8x32xf32> to vector<8x24xf32>
    %80 = arith.negf %79 : vector<8x24xf32>
    %81 = math.exp %80 : vector<8x24xf32>
    %cst_20 = arith.constant 1.000000e+00 : f32
    %82 = vector.broadcast %cst_20 : f32 to vector<8x24xf32>
    %83 = arith.addf %82, %81 : vector<8x24xf32>
    %84 = arith.divf %82, %83 : vector<8x24xf32>
    %85 = vector.extract_strided_slice %84 {offsets = [0, 0], sizes = [8, 8], strides = [1, 1]} : vector<8x24xf32> to vector<8x8xf32>
    %86 = vector.extract_strided_slice %84 {offsets = [0, 8], sizes = [8, 8], strides = [1, 1]} : vector<8x24xf32> to vector<8x8xf32>
    %87 = vector.extract_strided_slice %84 {offsets = [0, 16], sizes = [8, 8], strides = [1, 1]} : vector<8x24xf32> to vector<8x8xf32>
    %88 = vector.extract_strided_slice %78 {offsets = [0, 24], sizes = [8, 8], strides = [1, 1]} : vector<8x32xf32> to vector<8x8xf32>
    %89 = math.tanh %88 : vector<8x8xf32>
    %90 = arith.mulf %86, %51 : vector<8x8xf32>
    %91 = arith.mulf %85, %89 : vector<8x8xf32>
    %92 = arith.addf %90, %91 : vector<8x8xf32>
    %93 = math.tanh %92 : vector<8x8xf32>
    %94 = arith.mulf %87, %93 : vector<8x8xf32>
    %cst_21 = arith.constant dense<0.000000e+00> : vector<8x64xf32>
    %95 = tpu.matmul %72, %1, %cst_21 {dimension_numbers = #tpu.dot_dimension_numbers<[1], [0], [0], [1], [0, 0, 1, 1], [], []>} : vector<8x16xf32>, vector<16x64xf32>, vector<8x64xf32> -> vector<8x64xf32>
    %96 = vector.extract_strided_slice %8 {offsets = [16, 0], sizes = [8, 64], strides = [1, 1]} : vector<64x64xf32> to vector<8x64xf32>
    %97 = arith.addf %95, %96 : vector<8x64xf32>
    %98 = vector.extract_strided_slice %97 {offsets = [0, 0], sizes = [8, 48], strides = [1, 1]} : vector<8x64xf32> to vector<8x48xf32>
    %99 = arith.negf %98 : vector<8x48xf32>
    %100 = math.exp %99 : vector<8x48xf32>
    %cst_22 = arith.constant 1.000000e+00 : f32
    %101 = vector.broadcast %cst_22 : f32 to vector<8x48xf32>
    %102 = arith.addf %101, %100 : vector<8x48xf32>
    %103 = arith.divf %101, %102 : vector<8x48xf32>
    %104 = vector.extract_strided_slice %103 {offsets = [0, 0], sizes = [8, 16], strides = [1, 1]} : vector<8x48xf32> to vector<8x16xf32>
    %105 = vector.extract_strided_slice %103 {offsets = [0, 16], sizes = [8, 16], strides = [1, 1]} : vector<8x48xf32> to vector<8x16xf32>
    %106 = vector.extract_strided_slice %103 {offsets = [0, 32], sizes = [8, 16], strides = [1, 1]} : vector<8x48xf32> to vector<8x16xf32>
    %107 = vector.extract_strided_slice %97 {offsets = [0, 48], sizes = [8, 16], strides = [1, 1]} : vector<8x64xf32> to vector<8x16xf32>
    %108 = math.tanh %107 : vector<8x16xf32>
    %109 = arith.mulf %105, %70 : vector<8x16xf32>
    %110 = arith.mulf %104, %108 : vector<8x16xf32>
    %111 = arith.addf %109, %110 : vector<8x16xf32>
    %112 = math.tanh %111 : vector<8x16xf32>
    %113 = arith.mulf %106, %112 : vector<8x16xf32>
    %cst_23 = arith.constant 0.000000e+00 : f32
    %114 = vector.broadcast %cst_23 : f32 to vector<8x16xf32>
    %115 = arith.maximumf %113, %114 : vector<8x16xf32>
    %116 = tpu.concatenate %115, %94 in 1 : vector<8x16xf32>, vector<8x8xf32> -> vector<8x24xf32>
    %cst_24 = arith.constant dense<0.000000e+00> : vector<8x32xf32>
    %117 = tpu.matmul %116, %3, %cst_24 {dimension_numbers = #tpu.dot_dimension_numbers<[1], [0], [0], [1], [0, 0, 1, 1], [], []>} : vector<8x24xf32>, vector<24x32xf32>, vector<8x32xf32> -> vector<8x32xf32>
    %118 = vector.broadcast %4 : vector<1x32xf32> to vector<8x32xf32>
    %119 = arith.addf %117, %118 : vector<8x32xf32>
    %120 = vector.extract_strided_slice %119 {offsets = [0, 0], sizes = [8, 24], strides = [1, 1]} : vector<8x32xf32> to vector<8x24xf32>
    %121 = arith.negf %120 : vector<8x24xf32>
    %122 = math.exp %121 : vector<8x24xf32>
    %cst_25 = arith.constant 1.000000e+00 : f32
    %123 = vector.broadcast %cst_25 : f32 to vector<8x24xf32>
    %124 = arith.addf %123, %122 : vector<8x24xf32>
    %125 = arith.divf %123, %124 : vector<8x24xf32>
    %126 = vector.extract_strided_slice %125 {offsets = [0, 0], sizes = [8, 8], strides = [1, 1]} : vector<8x24xf32> to vector<8x8xf32>
    %127 = vector.extract_strided_slice %125 {offsets = [0, 8], sizes = [8, 8], strides = [1, 1]} : vector<8x24xf32> to vector<8x8xf32>
    %128 = vector.extract_strided_slice %125 {offsets = [0, 16], sizes = [8, 8], strides = [1, 1]} : vector<8x24xf32> to vector<8x8xf32>
    %129 = vector.extract_strided_slice %119 {offsets = [0, 24], sizes = [8, 8], strides = [1, 1]} : vector<8x32xf32> to vector<8x8xf32>
    %130 = math.tanh %129 : vector<8x8xf32>
    %131 = arith.mulf %127, %92 : vector<8x8xf32>
    %132 = arith.mulf %126, %130 : vector<8x8xf32>
    %133 = arith.addf %131, %132 : vector<8x8xf32>
    %134 = math.tanh %133 : vector<8x8xf32>
    %135 = arith.mulf %128, %134 : vector<8x8xf32>
    %cst_26 = arith.constant dense<0.000000e+00> : vector<8x64xf32>
    %136 = tpu.matmul %113, %1, %cst_26 {dimension_numbers = #tpu.dot_dimension_numbers<[1], [0], [0], [1], [0, 0, 1, 1], [], []>} : vector<8x16xf32>, vector<16x64xf32>, vector<8x64xf32> -> vector<8x64xf32>
    %137 = vector.extract_strided_slice %8 {offsets = [24, 0], sizes = [8, 64], strides = [1, 1]} : vector<64x64xf32> to vector<8x64xf32>
    %138 = arith.addf %136, %137 : vector<8x64xf32>
    %139 = vector.extract_strided_slice %138 {offsets = [0, 0], sizes = [8, 48], strides = [1, 1]} : vector<8x64xf32> to vector<8x48xf32>
    %140 = arith.negf %139 : vector<8x48xf32>
    %141 = math.exp %140 : vector<8x48xf32>
    %cst_27 = arith.constant 1.000000e+00 : f32
    %142 = vector.broadcast %cst_27 : f32 to vector<8x48xf32>
    %143 = arith.addf %142, %141 : vector<8x48xf32>
    %144 = arith.divf %142, %143 : vector<8x48xf32>
    %145 = vector.extract_strided_slice %144 {offsets = [0, 0], sizes = [8, 16], strides = [1, 1]} : vector<8x48xf32> to vector<8x16xf32>
    %146 = vector.extract_strided_slice %144 {offsets = [0, 16], sizes = [8, 16], strides = [1, 1]} : vector<8x48xf32> to vector<8x16xf32>
    %147 = vector.extract_strided_slice %144 {offsets = [0, 32], sizes = [8, 16], strides = [1, 1]} : vector<8x48xf32> to vector<8x16xf32>
    %148 = vector.extract_strided_slice %138 {offsets = [0, 48], sizes = [8, 16], strides = [1, 1]} : vector<8x64xf32> to vector<8x16xf32>
    %149 = math.tanh %148 : vector<8x16xf32>
    %150 = arith.mulf %146, %111 : vector<8x16xf32>
    %151 = arith.mulf %145, %149 : vector<8x16xf32>
    %152 = arith.addf %150, %151 : vector<8x16xf32>
    %153 = math.tanh %152 : vector<8x16xf32>
    %154 = arith.mulf %147, %153 : vector<8x16xf32>
    %cst_28 = arith.constant 0.000000e+00 : f32
    %155 = vector.broadcast %cst_28 : f32 to vector<8x16xf32>
    %156 = arith.maximumf %154, %155 : vector<8x16xf32>
    %157 = tpu.concatenate %156, %135 in 1 : vector<8x16xf32>, vector<8x8xf32> -> vector<8x24xf32>
    %cst_29 = arith.constant dense<0.000000e+00> : vector<8x32xf32>
    %158 = tpu.matmul %157, %3, %cst_29 {dimension_numbers = #tpu.dot_dimension_numbers<[1], [0], [0], [1], [0, 0, 1, 1], [], []>} : vector<8x24xf32>, vector<24x32xf32>, vector<8x32xf32> -> vector<8x32xf32>
    %159 = vector.broadcast %4 : vector<1x32xf32> to vector<8x32xf32>
    %160 = arith.addf %158, %159 : vector<8x32xf32>
    %161 = vector.extract_strided_slice %160 {offsets = [0, 0], sizes = [8, 24], strides = [1, 1]} : vector<8x32xf32> to vector<8x24xf32>
    %162 = arith.negf %161 : vector<8x24xf32>
    %163 = math.exp %162 : vector<8x24xf32>
    %cst_30 = arith.constant 1.000000e+00 : f32
    %164 = vector.broadcast %cst_30 : f32 to vector<8x24xf32>
    %165 = arith.addf %164, %163 : vector<8x24xf32>
    %166 = arith.divf %164, %165 : vector<8x24xf32>
    %167 = vector.extract_strided_slice %166 {offsets = [0, 0], sizes = [8, 8], strides = [1, 1]} : vector<8x24xf32> to vector<8x8xf32>
    %168 = vector.extract_strided_slice %166 {offsets = [0, 8], sizes = [8, 8], strides = [1, 1]} : vector<8x24xf32> to vector<8x8xf32>
    %169 = vector.extract_strided_slice %166 {offsets = [0, 16], sizes = [8, 8], strides = [1, 1]} : vector<8x24xf32> to vector<8x8xf32>
    %170 = vector.extract_strided_slice %160 {offsets = [0, 24], sizes = [8, 8], strides = [1, 1]} : vector<8x32xf32> to vector<8x8xf32>
    %171 = math.tanh %170 : vector<8x8xf32>
    %172 = arith.mulf %168, %133 : vector<8x8xf32>
    %173 = arith.mulf %167, %171 : vector<8x8xf32>
    %174 = arith.addf %172, %173 : vector<8x8xf32>
    %175 = math.tanh %174 : vector<8x8xf32>
    %176 = arith.mulf %169, %175 : vector<8x8xf32>
    %cst_31 = arith.constant dense<0.000000e+00> : vector<8x64xf32>
    %177 = tpu.matmul %154, %1, %cst_31 {dimension_numbers = #tpu.dot_dimension_numbers<[1], [0], [0], [1], [0, 0, 1, 1], [], []>} : vector<8x16xf32>, vector<16x64xf32>, vector<8x64xf32> -> vector<8x64xf32>
    %178 = vector.extract_strided_slice %8 {offsets = [32, 0], sizes = [8, 64], strides = [1, 1]} : vector<64x64xf32> to vector<8x64xf32>
    %179 = arith.addf %177, %178 : vector<8x64xf32>
    %180 = vector.extract_strided_slice %179 {offsets = [0, 0], sizes = [8, 48], strides = [1, 1]} : vector<8x64xf32> to vector<8x48xf32>
    %181 = arith.negf %180 : vector<8x48xf32>
    %182 = math.exp %181 : vector<8x48xf32>
    %cst_32 = arith.constant 1.000000e+00 : f32
    %183 = vector.broadcast %cst_32 : f32 to vector<8x48xf32>
    %184 = arith.addf %183, %182 : vector<8x48xf32>
    %185 = arith.divf %183, %184 : vector<8x48xf32>
    %186 = vector.extract_strided_slice %185 {offsets = [0, 0], sizes = [8, 16], strides = [1, 1]} : vector<8x48xf32> to vector<8x16xf32>
    %187 = vector.extract_strided_slice %185 {offsets = [0, 16], sizes = [8, 16], strides = [1, 1]} : vector<8x48xf32> to vector<8x16xf32>
    %188 = vector.extract_strided_slice %185 {offsets = [0, 32], sizes = [8, 16], strides = [1, 1]} : vector<8x48xf32> to vector<8x16xf32>
    %189 = vector.extract_strided_slice %179 {offsets = [0, 48], sizes = [8, 16], strides = [1, 1]} : vector<8x64xf32> to vector<8x16xf32>
    %190 = math.tanh %189 : vector<8x16xf32>
    %191 = arith.mulf %187, %152 : vector<8x16xf32>
    %192 = arith.mulf %186, %190 : vector<8x16xf32>
    %193 = arith.addf %191, %192 : vector<8x16xf32>
    %194 = math.tanh %193 : vector<8x16xf32>
    %195 = arith.mulf %188, %194 : vector<8x16xf32>
    %cst_33 = arith.constant 0.000000e+00 : f32
    %196 = vector.broadcast %cst_33 : f32 to vector<8x16xf32>
    %197 = arith.maximumf %195, %196 : vector<8x16xf32>
    %198 = tpu.concatenate %197, %176 in 1 : vector<8x16xf32>, vector<8x8xf32> -> vector<8x24xf32>
    %cst_34 = arith.constant dense<0.000000e+00> : vector<8x32xf32>
    %199 = tpu.matmul %198, %3, %cst_34 {dimension_numbers = #tpu.dot_dimension_numbers<[1], [0], [0], [1], [0, 0, 1, 1], [], []>} : vector<8x24xf32>, vector<24x32xf32>, vector<8x32xf32> -> vector<8x32xf32>
    %200 = vector.broadcast %4 : vector<1x32xf32> to vector<8x32xf32>
    %201 = arith.addf %199, %200 : vector<8x32xf32>
    %202 = vector.extract_strided_slice %201 {offsets = [0, 0], sizes = [8, 24], strides = [1, 1]} : vector<8x32xf32> to vector<8x24xf32>
    %203 = arith.negf %202 : vector<8x24xf32>
    %204 = math.exp %203 : vector<8x24xf32>
    %cst_35 = arith.constant 1.000000e+00 : f32
    %205 = vector.broadcast %cst_35 : f32 to vector<8x24xf32>
    %206 = arith.addf %205, %204 : vector<8x24xf32>
    %207 = arith.divf %205, %206 : vector<8x24xf32>
    %208 = vector.extract_strided_slice %207 {offsets = [0, 0], sizes = [8, 8], strides = [1, 1]} : vector<8x24xf32> to vector<8x8xf32>
    %209 = vector.extract_strided_slice %207 {offsets = [0, 8], sizes = [8, 8], strides = [1, 1]} : vector<8x24xf32> to vector<8x8xf32>
    %210 = vector.extract_strided_slice %207 {offsets = [0, 16], sizes = [8, 8], strides = [1, 1]} : vector<8x24xf32> to vector<8x8xf32>
    %211 = vector.extract_strided_slice %201 {offsets = [0, 24], sizes = [8, 8], strides = [1, 1]} : vector<8x32xf32> to vector<8x8xf32>
    %212 = math.tanh %211 : vector<8x8xf32>
    %213 = arith.mulf %209, %174 : vector<8x8xf32>
    %214 = arith.mulf %208, %212 : vector<8x8xf32>
    %215 = arith.addf %213, %214 : vector<8x8xf32>
    %216 = math.tanh %215 : vector<8x8xf32>
    %217 = arith.mulf %210, %216 : vector<8x8xf32>
    %cst_36 = arith.constant dense<0.000000e+00> : vector<8x64xf32>
    %218 = tpu.matmul %195, %1, %cst_36 {dimension_numbers = #tpu.dot_dimension_numbers<[1], [0], [0], [1], [0, 0, 1, 1], [], []>} : vector<8x16xf32>, vector<16x64xf32>, vector<8x64xf32> -> vector<8x64xf32>
    %219 = vector.extract_strided_slice %8 {offsets = [40, 0], sizes = [8, 64], strides = [1, 1]} : vector<64x64xf32> to vector<8x64xf32>
    %220 = arith.addf %218, %219 : vector<8x64xf32>
    %221 = vector.extract_strided_slice %220 {offsets = [0, 0], sizes = [8, 48], strides = [1, 1]} : vector<8x64xf32> to vector<8x48xf32>
    %222 = arith.negf %221 : vector<8x48xf32>
    %223 = math.exp %222 : vector<8x48xf32>
    %cst_37 = arith.constant 1.000000e+00 : f32
    %224 = vector.broadcast %cst_37 : f32 to vector<8x48xf32>
    %225 = arith.addf %224, %223 : vector<8x48xf32>
    %226 = arith.divf %224, %225 : vector<8x48xf32>
    %227 = vector.extract_strided_slice %226 {offsets = [0, 0], sizes = [8, 16], strides = [1, 1]} : vector<8x48xf32> to vector<8x16xf32>
    %228 = vector.extract_strided_slice %226 {offsets = [0, 16], sizes = [8, 16], strides = [1, 1]} : vector<8x48xf32> to vector<8x16xf32>
    %229 = vector.extract_strided_slice %226 {offsets = [0, 32], sizes = [8, 16], strides = [1, 1]} : vector<8x48xf32> to vector<8x16xf32>
    %230 = vector.extract_strided_slice %220 {offsets = [0, 48], sizes = [8, 16], strides = [1, 1]} : vector<8x64xf32> to vector<8x16xf32>
    %231 = math.tanh %230 : vector<8x16xf32>
    %232 = arith.mulf %228, %193 : vector<8x16xf32>
    %233 = arith.mulf %227, %231 : vector<8x16xf32>
    %234 = arith.addf %232, %233 : vector<8x16xf32>
    %235 = math.tanh %234 : vector<8x16xf32>
    %236 = arith.mulf %229, %235 : vector<8x16xf32>
    %cst_38 = arith.constant 0.000000e+00 : f32
    %237 = vector.broadcast %cst_38 : f32 to vector<8x16xf32>
    %238 = arith.maximumf %236, %237 : vector<8x16xf32>
    %239 = tpu.concatenate %238, %217 in 1 : vector<8x16xf32>, vector<8x8xf32> -> vector<8x24xf32>
    %cst_39 = arith.constant dense<0.000000e+00> : vector<8x32xf32>
    %240 = tpu.matmul %239, %3, %cst_39 {dimension_numbers = #tpu.dot_dimension_numbers<[1], [0], [0], [1], [0, 0, 1, 1], [], []>} : vector<8x24xf32>, vector<24x32xf32>, vector<8x32xf32> -> vector<8x32xf32>
    %241 = vector.broadcast %4 : vector<1x32xf32> to vector<8x32xf32>
    %242 = arith.addf %240, %241 : vector<8x32xf32>
    %243 = vector.extract_strided_slice %242 {offsets = [0, 0], sizes = [8, 24], strides = [1, 1]} : vector<8x32xf32> to vector<8x24xf32>
    %244 = arith.negf %243 : vector<8x24xf32>
    %245 = math.exp %244 : vector<8x24xf32>
    %cst_40 = arith.constant 1.000000e+00 : f32
    %246 = vector.broadcast %cst_40 : f32 to vector<8x24xf32>
    %247 = arith.addf %246, %245 : vector<8x24xf32>
    %248 = arith.divf %246, %247 : vector<8x24xf32>
    %249 = vector.extract_strided_slice %248 {offsets = [0, 0], sizes = [8, 8], strides = [1, 1]} : vector<8x24xf32> to vector<8x8xf32>
    %250 = vector.extract_strided_slice %248 {offsets = [0, 8], sizes = [8, 8], strides = [1, 1]} : vector<8x24xf32> to vector<8x8xf32>
    %251 = vector.extract_strided_slice %248 {offsets = [0, 16], sizes = [8, 8], strides = [1, 1]} : vector<8x24xf32> to vector<8x8xf32>
    %252 = vector.extract_strided_slice %242 {offsets = [0, 24], sizes = [8, 8], strides = [1, 1]} : vector<8x32xf32> to vector<8x8xf32>
    %253 = math.tanh %252 : vector<8x8xf32>
    %254 = arith.mulf %250, %215 : vector<8x8xf32>
    %255 = arith.mulf %249, %253 : vector<8x8xf32>
    %256 = arith.addf %254, %255 : vector<8x8xf32>
    %257 = math.tanh %256 : vector<8x8xf32>
    %258 = arith.mulf %251, %257 : vector<8x8xf32>
    %cst_41 = arith.constant dense<0.000000e+00> : vector<8x64xf32>
    %259 = tpu.matmul %236, %1, %cst_41 {dimension_numbers = #tpu.dot_dimension_numbers<[1], [0], [0], [1], [0, 0, 1, 1], [], []>} : vector<8x16xf32>, vector<16x64xf32>, vector<8x64xf32> -> vector<8x64xf32>
    %260 = vector.extract_strided_slice %8 {offsets = [48, 0], sizes = [8, 64], strides = [1, 1]} : vector<64x64xf32> to vector<8x64xf32>
    %261 = arith.addf %259, %260 : vector<8x64xf32>
    %262 = vector.extract_strided_slice %261 {offsets = [0, 0], sizes = [8, 48], strides = [1, 1]} : vector<8x64xf32> to vector<8x48xf32>
    %263 = arith.negf %262 : vector<8x48xf32>
    %264 = math.exp %263 : vector<8x48xf32>
    %cst_42 = arith.constant 1.000000e+00 : f32
    %265 = vector.broadcast %cst_42 : f32 to vector<8x48xf32>
    %266 = arith.addf %265, %264 : vector<8x48xf32>
    %267 = arith.divf %265, %266 : vector<8x48xf32>
    %268 = vector.extract_strided_slice %267 {offsets = [0, 0], sizes = [8, 16], strides = [1, 1]} : vector<8x48xf32> to vector<8x16xf32>
    %269 = vector.extract_strided_slice %267 {offsets = [0, 16], sizes = [8, 16], strides = [1, 1]} : vector<8x48xf32> to vector<8x16xf32>
    %270 = vector.extract_strided_slice %267 {offsets = [0, 32], sizes = [8, 16], strides = [1, 1]} : vector<8x48xf32> to vector<8x16xf32>
    %271 = vector.extract_strided_slice %261 {offsets = [0, 48], sizes = [8, 16], strides = [1, 1]} : vector<8x64xf32> to vector<8x16xf32>
    %272 = math.tanh %271 : vector<8x16xf32>
    %273 = arith.mulf %269, %234 : vector<8x16xf32>
    %274 = arith.mulf %268, %272 : vector<8x16xf32>
    %275 = arith.addf %273, %274 : vector<8x16xf32>
    %276 = math.tanh %275 : vector<8x16xf32>
    %277 = arith.mulf %270, %276 : vector<8x16xf32>
    %cst_43 = arith.constant 0.000000e+00 : f32
    %278 = vector.broadcast %cst_43 : f32 to vector<8x16xf32>
    %279 = arith.maximumf %277, %278 : vector<8x16xf32>
    %280 = tpu.concatenate %279, %258 in 1 : vector<8x16xf32>, vector<8x8xf32> -> vector<8x24xf32>
    %cst_44 = arith.constant dense<0.000000e+00> : vector<8x32xf32>
    %281 = tpu.matmul %280, %3, %cst_44 {dimension_numbers = #tpu.dot_dimension_numbers<[1], [0], [0], [1], [0, 0, 1, 1], [], []>} : vector<8x24xf32>, vector<24x32xf32>, vector<8x32xf32> -> vector<8x32xf32>
    %282 = vector.broadcast %4 : vector<1x32xf32> to vector<8x32xf32>
    %283 = arith.addf %281, %282 : vector<8x32xf32>
    %284 = vector.extract_strided_slice %283 {offsets = [0, 0], sizes = [8, 24], strides = [1, 1]} : vector<8x32xf32> to vector<8x24xf32>
    %285 = arith.negf %284 : vector<8x24xf32>
    %286 = math.exp %285 : vector<8x24xf32>
    %cst_45 = arith.constant 1.000000e+00 : f32
    %287 = vector.broadcast %cst_45 : f32 to vector<8x24xf32>
    %288 = arith.addf %287, %286 : vector<8x24xf32>
    %289 = arith.divf %287, %288 : vector<8x24xf32>
    %290 = vector.extract_strided_slice %289 {offsets = [0, 0], sizes = [8, 8], strides = [1, 1]} : vector<8x24xf32> to vector<8x8xf32>
    %291 = vector.extract_strided_slice %289 {offsets = [0, 8], sizes = [8, 8], strides = [1, 1]} : vector<8x24xf32> to vector<8x8xf32>
    %292 = vector.extract_strided_slice %289 {offsets = [0, 16], sizes = [8, 8], strides = [1, 1]} : vector<8x24xf32> to vector<8x8xf32>
    %293 = vector.extract_strided_slice %283 {offsets = [0, 24], sizes = [8, 8], strides = [1, 1]} : vector<8x32xf32> to vector<8x8xf32>
    %294 = math.tanh %293 : vector<8x8xf32>
    %295 = arith.mulf %291, %256 : vector<8x8xf32>
    %296 = arith.mulf %290, %294 : vector<8x8xf32>
    %297 = arith.addf %295, %296 : vector<8x8xf32>
    %298 = math.tanh %297 : vector<8x8xf32>
    %299 = arith.mulf %292, %298 : vector<8x8xf32>
    %cst_46 = arith.constant dense<0.000000e+00> : vector<8x64xf32>
    %300 = tpu.matmul %277, %1, %cst_46 {dimension_numbers = #tpu.dot_dimension_numbers<[1], [0], [0], [1], [0, 0, 1, 1], [], []>} : vector<8x16xf32>, vector<16x64xf32>, vector<8x64xf32> -> vector<8x64xf32>
    %301 = vector.extract_strided_slice %8 {offsets = [56, 0], sizes = [8, 64], strides = [1, 1]} : vector<64x64xf32> to vector<8x64xf32>
    %302 = arith.addf %300, %301 : vector<8x64xf32>
    %303 = vector.extract_strided_slice %302 {offsets = [0, 0], sizes = [8, 48], strides = [1, 1]} : vector<8x64xf32> to vector<8x48xf32>
    %304 = arith.negf %303 : vector<8x48xf32>
    %305 = math.exp %304 : vector<8x48xf32>
    %cst_47 = arith.constant 1.000000e+00 : f32
    %306 = vector.broadcast %cst_47 : f32 to vector<8x48xf32>
    %307 = arith.addf %306, %305 : vector<8x48xf32>
    %308 = arith.divf %306, %307 : vector<8x48xf32>
    %309 = vector.extract_strided_slice %308 {offsets = [0, 0], sizes = [8, 16], strides = [1, 1]} : vector<8x48xf32> to vector<8x16xf32>
    %310 = vector.extract_strided_slice %308 {offsets = [0, 16], sizes = [8, 16], strides = [1, 1]} : vector<8x48xf32> to vector<8x16xf32>
    %311 = vector.extract_strided_slice %308 {offsets = [0, 32], sizes = [8, 16], strides = [1, 1]} : vector<8x48xf32> to vector<8x16xf32>
    %312 = vector.extract_strided_slice %302 {offsets = [0, 48], sizes = [8, 16], strides = [1, 1]} : vector<8x64xf32> to vector<8x16xf32>
    %313 = math.tanh %312 : vector<8x16xf32>
    %314 = arith.mulf %310, %275 : vector<8x16xf32>
    %315 = arith.mulf %309, %313 : vector<8x16xf32>
    %316 = arith.addf %314, %315 : vector<8x16xf32>
    %317 = math.tanh %316 : vector<8x16xf32>
    %318 = arith.mulf %311, %317 : vector<8x16xf32>
    %cst_48 = arith.constant 0.000000e+00 : f32
    %319 = vector.broadcast %cst_48 : f32 to vector<8x16xf32>
    %320 = arith.maximumf %318, %319 : vector<8x16xf32>
    %321 = tpu.concatenate %320, %299 in 1 : vector<8x16xf32>, vector<8x8xf32> -> vector<8x24xf32>
    %cst_49 = arith.constant dense<0.000000e+00> : vector<8x32xf32>
    %322 = tpu.matmul %321, %3, %cst_49 {dimension_numbers = #tpu.dot_dimension_numbers<[1], [0], [0], [1], [0, 0, 1, 1], [], []>} : vector<8x24xf32>, vector<24x32xf32>, vector<8x32xf32> -> vector<8x32xf32>
    %323 = vector.broadcast %4 : vector<1x32xf32> to vector<8x32xf32>
    %324 = arith.addf %322, %323 : vector<8x32xf32>
    %325 = vector.extract_strided_slice %324 {offsets = [0, 0], sizes = [8, 24], strides = [1, 1]} : vector<8x32xf32> to vector<8x24xf32>
    %326 = arith.negf %325 : vector<8x24xf32>
    %327 = math.exp %326 : vector<8x24xf32>
    %cst_50 = arith.constant 1.000000e+00 : f32
    %328 = vector.broadcast %cst_50 : f32 to vector<8x24xf32>
    %329 = arith.addf %328, %327 : vector<8x24xf32>
    %330 = arith.divf %328, %329 : vector<8x24xf32>
    %331 = vector.extract_strided_slice %330 {offsets = [0, 0], sizes = [8, 8], strides = [1, 1]} : vector<8x24xf32> to vector<8x8xf32>
    %332 = vector.extract_strided_slice %330 {offsets = [0, 8], sizes = [8, 8], strides = [1, 1]} : vector<8x24xf32> to vector<8x8xf32>
    %333 = vector.extract_strided_slice %330 {offsets = [0, 16], sizes = [8, 8], strides = [1, 1]} : vector<8x24xf32> to vector<8x8xf32>
    %334 = vector.extract_strided_slice %324 {offsets = [0, 24], sizes = [8, 8], strides = [1, 1]} : vector<8x32xf32> to vector<8x8xf32>
    %335 = math.tanh %334 : vector<8x8xf32>
    %336 = arith.mulf %332, %297 : vector<8x8xf32>
    %337 = arith.mulf %331, %335 : vector<8x8xf32>
    %338 = arith.addf %336, %337 : vector<8x8xf32>
    %339 = math.tanh %338 : vector<8x8xf32>
    %340 = arith.mulf %333, %339 : vector<8x8xf32>
    %c0_51 = arith.constant 0 : index
    %c0_52 = arith.constant 0 : index
    %341 = vector.load %arg3[%c0_51, %c0_52] : memref<8x8xf32, #tpu.memory_space<vmem>>, vector<8x8xf32>
    tpu.vector_store %arg3[%c0_51, %c0_52], %340 {strides = array<i32>} : memref<8x8xf32, #tpu.memory_space<vmem>>, vector<8x8xf32>,
    %c64 = arith.constant 64 : index
    %c0_53 = arith.constant 0 : index
    %342 = vector.load %arg1[%c64, %c0_53] : memref<216x128xf32, #tpu.memory_space<vmem>>, vector<8x32xf32>
    %c72 = arith.constant 72 : index
    %c0_54 = arith.constant 0 : index
    %343 = vector.load %arg1[%c72, %c0_54] : memref<216x128xf32, #tpu.memory_space<vmem>>, vector<1x32xf32>
    %c80 = arith.constant 80 : index
    %c0_55 = arith.constant 0 : index
    %344 = vector.load %arg1[%c80, %c0_55] : memref<216x128xf32, #tpu.memory_space<vmem>>, vector<24x32xf32>
    %c104 = arith.constant 104 : index
    %c0_56 = arith.constant 0 : index
    %345 = vector.load %arg1[%c104, %c0_56] : memref<216x128xf32, #tpu.memory_space<vmem>>, vector<1x32xf32>
    %c112 = arith.constant 112 : index
    %c0_57 = arith.constant 0 : index
    %346 = vector.load %arg1[%c112, %c0_57] : memref<216x128xf32, #tpu.memory_space<vmem>>, vector<40x128xf32>
    %c152 = arith.constant 152 : index
    %c0_58 = arith.constant 0 : index
    %347 = vector.load %arg1[%c152, %c0_58] : memref<216x128xf32, #tpu.memory_space<vmem>>, vector<1x128xf32>
    %c160 = arith.constant 160 : index
    %c0_59 = arith.constant 0 : index
    %348 = vector.load %arg1[%c160, %c0_59] : memref<216x128xf32, #tpu.memory_space<vmem>>, vector<48x64xf32>
    %c208 = arith.constant 208 : index
    %c0_60 = arith.constant 0 : index
    %349 = vector.load %arg1[%c208, %c0_60] : memref<216x128xf32, #tpu.memory_space<vmem>>, vector<1x64xf32>
    %cst_61 = arith.constant 0.000000e+00 : f32
    %350 = vector.broadcast %cst_61 : f32 to vector<8x32xf32>
    %cst_62 = arith.constant 0.000000e+00 : f32
    %351 = vector.broadcast %cst_62 : f32 to vector<8x32xf32>
    %cst_63 = arith.constant 0.000000e+00 : f32
    %352 = vector.broadcast %cst_63 : f32 to vector<8x16xf32>
    %cst_64 = arith.constant 0.000000e+00 : f32
    %353 = vector.broadcast %cst_64 : f32 to vector<8x16xf32>
    %cst_65 = arith.constant dense<0.000000e+00> : vector<8x32xf32>
    %354 = tpu.matmul %340, %342, %cst_65 {dimension_numbers = #tpu.dot_dimension_numbers<[1], [0], [0], [1], [0, 0, 1, 1], [], []>} : vector<8x8xf32>, vector<8x32xf32>, vector<8x32xf32> -> vector<8x32xf32>
    %355 = vector.broadcast %343 : vector<1x32xf32> to vector<8x32xf32>
    %356 = arith.addf %354, %355 : vector<8x32xf32>
    %357 = vector.extract_strided_slice %356 {offsets = [0, 0], sizes = [8, 24], strides = [1, 1]} : vector<8x32xf32> to vector<8x24xf32>
    %358 = arith.negf %357 : vector<8x24xf32>
    %359 = math.exp %358 : vector<8x24xf32>
    %cst_66 = arith.constant 1.000000e+00 : f32
    %360 = vector.broadcast %cst_66 : f32 to vector<8x24xf32>
    %361 = arith.addf %360, %359 : vector<8x24xf32>
    %362 = arith.divf %360, %361 : vector<8x24xf32>
    %363 = vector.extract_strided_slice %362 {offsets = [0, 0], sizes = [8, 8], strides = [1, 1]} : vector<8x24xf32> to vector<8x8xf32>
    %364 = vector.extract_strided_slice %362 {offsets = [0, 8], sizes = [8, 8], strides = [1, 1]} : vector<8x24xf32> to vector<8x8xf32>
    %365 = vector.extract_strided_slice %362 {offsets = [0, 16], sizes = [8, 8], strides = [1, 1]} : vector<8x24xf32> to vector<8x8xf32>
    %366 = vector.extract_strided_slice %356 {offsets = [0, 24], sizes = [8, 8], strides = [1, 1]} : vector<8x32xf32> to vector<8x8xf32>
    %367 = math.tanh %366 : vector<8x8xf32>
    %368 = arith.mulf %364, %338 : vector<8x8xf32>
    %369 = arith.mulf %363, %367 : vector<8x8xf32>
    %370 = arith.addf %368, %369 : vector<8x8xf32>
    %371 = math.tanh %370 : vector<8x8xf32>
    %372 = arith.mulf %365, %371 : vector<8x8xf32>
    %373 = tpu.concatenate %372, %350 in 1 : vector<8x8xf32>, vector<8x32xf32> -> vector<8x40xf32>
    %cst_67 = arith.constant dense<0.000000e+00> : vector<8x128xf32>
    %374 = tpu.matmul %373, %346, %cst_67 {dimension_numbers = #tpu.dot_dimension_numbers<[1], [0], [0], [1], [0, 0, 1, 1], [], []>} : vector<8x40xf32>, vector<40x128xf32>, vector<8x128xf32> -> vector<8x128xf32>
    %375 = vector.broadcast %347 : vector<1x128xf32> to vector<8x128xf32>
    %376 = arith.addf %374, %375 : vector<8x128xf32>
    %377 = vector.extract_strided_slice %376 {offsets = [0, 0], sizes = [8, 96], strides = [1, 1]} : vector<8x128xf32> to vector<8x96xf32>
    %378 = arith.negf %377 : vector<8x96xf32>
    %379 = math.exp %378 : vector<8x96xf32>
    %cst_68 = arith.constant 1.000000e+00 : f32
    %380 = vector.broadcast %cst_68 : f32 to vector<8x96xf32>
    %381 = arith.addf %380, %379 : vector<8x96xf32>
    %382 = arith.divf %380, %381 : vector<8x96xf32>
    %383 = vector.extract_strided_slice %382 {offsets = [0, 0], sizes = [8, 32], strides = [1, 1]} : vector<8x96xf32> to vector<8x32xf32>
    %384 = vector.extract_strided_slice %382 {offsets = [0, 32], sizes = [8, 32], strides = [1, 1]} : vector<8x96xf32> to vector<8x32xf32>
    %385 = vector.extract_strided_slice %382 {offsets = [0, 64], sizes = [8, 32], strides = [1, 1]} : vector<8x96xf32> to vector<8x32xf32>
    %386 = vector.extract_strided_slice %376 {offsets = [0, 96], sizes = [8, 32], strides = [1, 1]} : vector<8x128xf32> to vector<8x32xf32>
    %387 = math.tanh %386 : vector<8x32xf32>
    %388 = arith.mulf %384, %351 : vector<8x32xf32>
    %389 = arith.mulf %383, %387 : vector<8x32xf32>
    %390 = arith.addf %388, %389 : vector<8x32xf32>
    %391 = math.tanh %390 : vector<8x32xf32>
    %392 = arith.mulf %385, %391 : vector<8x32xf32>
    %393 = tpu.concatenate %392, %352 in 1 : vector<8x32xf32>, vector<8x16xf32> -> vector<8x48xf32>
    %cst_69 = arith.constant dense<0.000000e+00> : vector<8x64xf32>
    %394 = tpu.matmul %393, %348, %cst_69 {dimension_numbers = #tpu.dot_dimension_numbers<[1], [0], [0], [1], [0, 0, 1, 1], [], []>} : vector<8x48xf32>, vector<48x64xf32>, vector<8x64xf32> -> vector<8x64xf32>
    %395 = vector.broadcast %349 : vector<1x64xf32> to vector<8x64xf32>
    %396 = arith.addf %394, %395 : vector<8x64xf32>
    %397 = vector.extract_strided_slice %396 {offsets = [0, 0], sizes = [8, 48], strides = [1, 1]} : vector<8x64xf32> to vector<8x48xf32>
    %398 = arith.negf %397 : vector<8x48xf32>
    %399 = math.exp %398 : vector<8x48xf32>
    %cst_70 = arith.constant 1.000000e+00 : f32
    %400 = vector.broadcast %cst_70 : f32 to vector<8x48xf32>
    %401 = arith.addf %400, %399 : vector<8x48xf32>
    %402 = arith.divf %400, %401 : vector<8x48xf32>
    %403 = vector.extract_strided_slice %402 {offsets = [0, 0], sizes = [8, 16], strides = [1, 1]} : vector<8x48xf32> to vector<8x16xf32>
    %404 = vector.extract_strided_slice %402 {offsets = [0, 16], sizes = [8, 16], strides = [1, 1]} : vector<8x48xf32> to vector<8x16xf32>
    %405 = vector.extract_strided_slice %402 {offsets = [0, 32], sizes = [8, 16], strides = [1, 1]} : vector<8x48xf32> to vector<8x16xf32>
    %406 = vector.extract_strided_slice %396 {offsets = [0, 48], sizes = [8, 16], strides = [1, 1]} : vector<8x64xf32> to vector<8x16xf32>
    %407 = math.tanh %406 : vector<8x16xf32>
    %408 = arith.mulf %404, %353 : vector<8x16xf32>
    %409 = arith.mulf %403, %407 : vector<8x16xf32>
    %410 = arith.addf %408, %409 : vector<8x16xf32>
    %411 = math.tanh %410 : vector<8x16xf32>
    %412 = arith.mulf %405, %411 : vector<8x16xf32>
    %c0_71 = arith.constant 0 : index
    %c0_72 = arith.constant 0 : index
    %413 = vector.load %arg2[%c0_71, %c0_72] : memref<8x128xf32, #tpu.memory_space<vmem>>, vector<8x16xf32>
    tpu.vector_store %arg2[%c0_71, %c0_72], %412 {strides = array<i32>} : memref<8x128xf32, #tpu.memory_space<vmem>>, vector<8x16xf32>,
    %414 = tpu.concatenate %412, %372 in 1 : vector<8x16xf32>, vector<8x8xf32> -> vector<8x24xf32>
    %cst_73 = arith.constant dense<0.000000e+00> : vector<8x32xf32>
    %415 = tpu.matmul %414, %344, %cst_73 {dimension_numbers = #tpu.dot_dimension_numbers<[1], [0], [0], [1], [0, 0, 1, 1], [], []>} : vector<8x24xf32>, vector<24x32xf32>, vector<8x32xf32> -> vector<8x32xf32>
    %416 = vector.broadcast %345 : vector<1x32xf32> to vector<8x32xf32>
    %417 = arith.addf %415, %416 : vector<8x32xf32>
    %418 = vector.extract_strided_slice %417 {offsets = [0, 0], sizes = [8, 24], strides = [1, 1]} : vector<8x32xf32> to vector<8x24xf32>
    %419 = arith.negf %418 : vector<8x24xf32>
    %420 = math.exp %419 : vector<8x24xf32>
    %cst_74 = arith.constant 1.000000e+00 : f32
    %421 = vector.broadcast %cst_74 : f32 to vector<8x24xf32>
    %422 = arith.addf %421, %420 : vector<8x24xf32>
    %423 = arith.divf %421, %422 : vector<8x24xf32>
    %424 = vector.extract_strided_slice %423 {offsets = [0, 0], sizes = [8, 8], strides = [1, 1]} : vector<8x24xf32> to vector<8x8xf32>
    %425 = vector.extract_strided_slice %423 {offsets = [0, 8], sizes = [8, 8], strides = [1, 1]} : vector<8x24xf32> to vector<8x8xf32>
    %426 = vector.extract_strided_slice %423 {offsets = [0, 16], sizes = [8, 8], strides = [1, 1]} : vector<8x24xf32> to vector<8x8xf32>
    %427 = vector.extract_strided_slice %417 {offsets = [0, 24], sizes = [8, 8], strides = [1, 1]} : vector<8x32xf32> to vector<8x8xf32>
    %428 = math.tanh %427 : vector<8x8xf32>
    %429 = arith.mulf %425, %370 : vector<8x8xf32>
    %430 = arith.mulf %424, %428 : vector<8x8xf32>
    %431 = arith.addf %429, %430 : vector<8x8xf32>
    %432 = math.tanh %431 : vector<8x8xf32>
    %433 = arith.mulf %426, %432 : vector<8x8xf32>
    %434 = tpu.concatenate %433, %392 in 1 : vector<8x8xf32>, vector<8x32xf32> -> vector<8x40xf32>
    %cst_75 = arith.constant dense<0.000000e+00> : vector<8x128xf32>
    %435 = tpu.matmul %434, %346, %cst_75 {dimension_numbers = #tpu.dot_dimension_numbers<[1], [0], [0], [1], [0, 0, 1, 1], [], []>} : vector<8x40xf32>, vector<40x128xf32>, vector<8x128xf32> -> vector<8x128xf32>
    %436 = vector.broadcast %347 : vector<1x128xf32> to vector<8x128xf32>
    %437 = arith.addf %435, %436 : vector<8x128xf32>
    %438 = vector.extract_strided_slice %437 {offsets = [0, 0], sizes = [8, 96], strides = [1, 1]} : vector<8x128xf32> to vector<8x96xf32>
    %439 = arith.negf %438 : vector<8x96xf32>
    %440 = math.exp %439 : vector<8x96xf32>
    %cst_76 = arith.constant 1.000000e+00 : f32
    %441 = vector.broadcast %cst_76 : f32 to vector<8x96xf32>
    %442 = arith.addf %441, %440 : vector<8x96xf32>
    %443 = arith.divf %441, %442 : vector<8x96xf32>
    %444 = vector.extract_strided_slice %443 {offsets = [0, 0], sizes = [8, 32], strides = [1, 1]} : vector<8x96xf32> to vector<8x32xf32>
    %445 = vector.extract_strided_slice %443 {offsets = [0, 32], sizes = [8, 32], strides = [1, 1]} : vector<8x96xf32> to vector<8x32xf32>
    %446 = vector.extract_strided_slice %443 {offsets = [0, 64], sizes = [8, 32], strides = [1, 1]} : vector<8x96xf32> to vector<8x32xf32>
    %447 = vector.extract_strided_slice %437 {offsets = [0, 96], sizes = [8, 32], strides = [1, 1]} : vector<8x128xf32> to vector<8x32xf32>
    %448 = math.tanh %447 : vector<8x32xf32>
    %449 = arith.mulf %445, %390 : vector<8x32xf32>
    %450 = arith.mulf %444, %448 : vector<8x32xf32>
    %451 = arith.addf %449, %450 : vector<8x32xf32>
    %452 = math.tanh %451 : vector<8x32xf32>
    %453 = arith.mulf %446, %452 : vector<8x32xf32>
    %454 = tpu.concatenate %453, %412 in 1 : vector<8x32xf32>, vector<8x16xf32> -> vector<8x48xf32>
    %cst_77 = arith.constant dense<0.000000e+00> : vector<8x64xf32>
    %455 = tpu.matmul %454, %348, %cst_77 {dimension_numbers = #tpu.dot_dimension_numbers<[1], [0], [0], [1], [0, 0, 1, 1], [], []>} : vector<8x48xf32>, vector<48x64xf32>, vector<8x64xf32> -> vector<8x64xf32>
    %456 = vector.broadcast %349 : vector<1x64xf32> to vector<8x64xf32>
    %457 = arith.addf %455, %456 : vector<8x64xf32>
    %458 = vector.extract_strided_slice %457 {offsets = [0, 0], sizes = [8, 48], strides = [1, 1]} : vector<8x64xf32> to vector<8x48xf32>
    %459 = arith.negf %458 : vector<8x48xf32>
    %460 = math.exp %459 : vector<8x48xf32>
    %cst_78 = arith.constant 1.000000e+00 : f32
    %461 = vector.broadcast %cst_78 : f32 to vector<8x48xf32>
    %462 = arith.addf %461, %460 : vector<8x48xf32>
    %463 = arith.divf %461, %462 : vector<8x48xf32>
    %464 = vector.extract_strided_slice %463 {offsets = [0, 0], sizes = [8, 16], strides = [1, 1]} : vector<8x48xf32> to vector<8x16xf32>
    %465 = vector.extract_strided_slice %463 {offsets = [0, 16], sizes = [8, 16], strides = [1, 1]} : vector<8x48xf32> to vector<8x16xf32>
    %466 = vector.extract_strided_slice %463 {offsets = [0, 32], sizes = [8, 16], strides = [1, 1]} : vector<8x48xf32> to vector<8x16xf32>
    %467 = vector.extract_strided_slice %457 {offsets = [0, 48], sizes = [8, 16], strides = [1, 1]} : vector<8x64xf32> to vector<8x16xf32>
    %468 = math.tanh %467 : vector<8x16xf32>
    %469 = arith.mulf %465, %410 : vector<8x16xf32>
    %470 = arith.mulf %464, %468 : vector<8x16xf32>
    %471 = arith.addf %469, %470 : vector<8x16xf32>
    %472 = math.tanh %471 : vector<8x16xf32>
    %473 = arith.mulf %466, %472 : vector<8x16xf32>
    %c0_79 = arith.constant 0 : index
    %c16 = arith.constant 16 : index
    %474 = vector.load %arg2[%c0_79, %c16] : memref<8x128xf32, #tpu.memory_space<vmem>>, vector<8x16xf32>
    tpu.vector_store %arg2[%c0_79, %c16], %473 {strides = array<i32>} : memref<8x128xf32, #tpu.memory_space<vmem>>, vector<8x16xf32>,
    %475 = tpu.concatenate %473, %433 in 1 : vector<8x16xf32>, vector<8x8xf32> -> vector<8x24xf32>
    %cst_80 = arith.constant dense<0.000000e+00> : vector<8x32xf32>
    %476 = tpu.matmul %475, %344, %cst_80 {dimension_numbers = #tpu.dot_dimension_numbers<[1], [0], [0], [1], [0, 0, 1, 1], [], []>} : vector<8x24xf32>, vector<24x32xf32>, vector<8x32xf32> -> vector<8x32xf32>
    %477 = vector.broadcast %345 : vector<1x32xf32> to vector<8x32xf32>
    %478 = arith.addf %476, %477 : vector<8x32xf32>
    %479 = vector.extract_strided_slice %478 {offsets = [0, 0], sizes = [8, 24], strides = [1, 1]} : vector<8x32xf32> to vector<8x24xf32>
    %480 = arith.negf %479 : vector<8x24xf32>
    %481 = math.exp %480 : vector<8x24xf32>
    %cst_81 = arith.constant 1.000000e+00 : f32
    %482 = vector.broadcast %cst_81 : f32 to vector<8x24xf32>
    %483 = arith.addf %482, %481 : vector<8x24xf32>
    %484 = arith.divf %482, %483 : vector<8x24xf32>
    %485 = vector.extract_strided_slice %484 {offsets = [0, 0], sizes = [8, 8], strides = [1, 1]} : vector<8x24xf32> to vector<8x8xf32>
    %486 = vector.extract_strided_slice %484 {offsets = [0, 8], sizes = [8, 8], strides = [1, 1]} : vector<8x24xf32> to vector<8x8xf32>
    %487 = vector.extract_strided_slice %484 {offsets = [0, 16], sizes = [8, 8], strides = [1, 1]} : vector<8x24xf32> to vector<8x8xf32>
    %488 = vector.extract_strided_slice %478 {offsets = [0, 24], sizes = [8, 8], strides = [1, 1]} : vector<8x32xf32> to vector<8x8xf32>
    %489 = math.tanh %488 : vector<8x8xf32>
    %490 = arith.mulf %486, %431 : vector<8x8xf32>
    %491 = arith.mulf %485, %489 : vector<8x8xf32>
    %492 = arith.addf %490, %491 : vector<8x8xf32>
    %493 = math.tanh %492 : vector<8x8xf32>
    %494 = arith.mulf %487, %493 : vector<8x8xf32>
    %495 = tpu.concatenate %494, %453 in 1 : vector<8x8xf32>, vector<8x32xf32> -> vector<8x40xf32>
    %cst_82 = arith.constant dense<0.000000e+00> : vector<8x128xf32>
    %496 = tpu.matmul %495, %346, %cst_82 {dimension_numbers = #tpu.dot_dimension_numbers<[1], [0], [0], [1], [0, 0, 1, 1], [], []>} : vector<8x40xf32>, vector<40x128xf32>, vector<8x128xf32> -> vector<8x128xf32>
    %497 = vector.broadcast %347 : vector<1x128xf32> to vector<8x128xf32>
    %498 = arith.addf %496, %497 : vector<8x128xf32>
    %499 = vector.extract_strided_slice %498 {offsets = [0, 0], sizes = [8, 96], strides = [1, 1]} : vector<8x128xf32> to vector<8x96xf32>
    %500 = arith.negf %499 : vector<8x96xf32>
    %501 = math.exp %500 : vector<8x96xf32>
    %cst_83 = arith.constant 1.000000e+00 : f32
    %502 = vector.broadcast %cst_83 : f32 to vector<8x96xf32>
    %503 = arith.addf %502, %501 : vector<8x96xf32>
    %504 = arith.divf %502, %503 : vector<8x96xf32>
    %505 = vector.extract_strided_slice %504 {offsets = [0, 0], sizes = [8, 32], strides = [1, 1]} : vector<8x96xf32> to vector<8x32xf32>
    %506 = vector.extract_strided_slice %504 {offsets = [0, 32], sizes = [8, 32], strides = [1, 1]} : vector<8x96xf32> to vector<8x32xf32>
    %507 = vector.extract_strided_slice %504 {offsets = [0, 64], sizes = [8, 32], strides = [1, 1]} : vector<8x96xf32> to vector<8x32xf32>
    %508 = vector.extract_strided_slice %498 {offsets = [0, 96], sizes = [8, 32], strides = [1, 1]} : vector<8x128xf32> to vector<8x32xf32>
    %509 = math.tanh %508 : vector<8x32xf32>
    %510 = arith.mulf %506, %451 : vector<8x32xf32>
    %511 = arith.mulf %505, %509 : vector<8x32xf32>
    %512 = arith.addf %510, %511 : vector<8x32xf32>
    %513 = math.tanh %512 : vector<8x32xf32>
    %514 = arith.mulf %507, %513 : vector<8x32xf32>
    %515 = tpu.concatenate %514, %473 in 1 : vector<8x32xf32>, vector<8x16xf32> -> vector<8x48xf32>
    %cst_84 = arith.constant dense<0.000000e+00> : vector<8x64xf32>
    %516 = tpu.matmul %515, %348, %cst_84 {dimension_numbers = #tpu.dot_dimension_numbers<[1], [0], [0], [1], [0, 0, 1, 1], [], []>} : vector<8x48xf32>, vector<48x64xf32>, vector<8x64xf32> -> vector<8x64xf32>
    %517 = vector.broadcast %349 : vector<1x64xf32> to vector<8x64xf32>
    %518 = arith.addf %516, %517 : vector<8x64xf32>
    %519 = vector.extract_strided_slice %518 {offsets = [0, 0], sizes = [8, 48], strides = [1, 1]} : vector<8x64xf32> to vector<8x48xf32>
    %520 = arith.negf %519 : vector<8x48xf32>
    %521 = math.exp %520 : vector<8x48xf32>
    %cst_85 = arith.constant 1.000000e+00 : f32
    %522 = vector.broadcast %cst_85 : f32 to vector<8x48xf32>
    %523 = arith.addf %522, %521 : vector<8x48xf32>
    %524 = arith.divf %522, %523 : vector<8x48xf32>
    %525 = vector.extract_strided_slice %524 {offsets = [0, 0], sizes = [8, 16], strides = [1, 1]} : vector<8x48xf32> to vector<8x16xf32>
    %526 = vector.extract_strided_slice %524 {offsets = [0, 16], sizes = [8, 16], strides = [1, 1]} : vector<8x48xf32> to vector<8x16xf32>
    %527 = vector.extract_strided_slice %524 {offsets = [0, 32], sizes = [8, 16], strides = [1, 1]} : vector<8x48xf32> to vector<8x16xf32>
    %528 = vector.extract_strided_slice %518 {offsets = [0, 48], sizes = [8, 16], strides = [1, 1]} : vector<8x64xf32> to vector<8x16xf32>
    %529 = math.tanh %528 : vector<8x16xf32>
    %530 = arith.mulf %526, %471 : vector<8x16xf32>
    %531 = arith.mulf %525, %529 : vector<8x16xf32>
    %532 = arith.addf %530, %531 : vector<8x16xf32>
    %533 = math.tanh %532 : vector<8x16xf32>
    %534 = arith.mulf %527, %533 : vector<8x16xf32>
    %c0_86 = arith.constant 0 : index
    %c32_87 = arith.constant 32 : index
    %535 = vector.load %arg2[%c0_86, %c32_87] : memref<8x128xf32, #tpu.memory_space<vmem>>, vector<8x16xf32>
    tpu.vector_store %arg2[%c0_86, %c32_87], %534 {strides = array<i32>} : memref<8x128xf32, #tpu.memory_space<vmem>>, vector<8x16xf32>,
    %536 = tpu.concatenate %534, %494 in 1 : vector<8x16xf32>, vector<8x8xf32> -> vector<8x24xf32>
    %cst_88 = arith.constant dense<0.000000e+00> : vector<8x32xf32>
    %537 = tpu.matmul %536, %344, %cst_88 {dimension_numbers = #tpu.dot_dimension_numbers<[1], [0], [0], [1], [0, 0, 1, 1], [], []>} : vector<8x24xf32>, vector<24x32xf32>, vector<8x32xf32> -> vector<8x32xf32>
    %538 = vector.broadcast %345 : vector<1x32xf32> to vector<8x32xf32>
    %539 = arith.addf %537, %538 : vector<8x32xf32>
    %540 = vector.extract_strided_slice %539 {offsets = [0, 0], sizes = [8, 24], strides = [1, 1]} : vector<8x32xf32> to vector<8x24xf32>
    %541 = arith.negf %540 : vector<8x24xf32>
    %542 = math.exp %541 : vector<8x24xf32>
    %cst_89 = arith.constant 1.000000e+00 : f32
    %543 = vector.broadcast %cst_89 : f32 to vector<8x24xf32>
    %544 = arith.addf %543, %542 : vector<8x24xf32>
    %545 = arith.divf %543, %544 : vector<8x24xf32>
    %546 = vector.extract_strided_slice %545 {offsets = [0, 0], sizes = [8, 8], strides = [1, 1]} : vector<8x24xf32> to vector<8x8xf32>
    %547 = vector.extract_strided_slice %545 {offsets = [0, 8], sizes = [8, 8], strides = [1, 1]} : vector<8x24xf32> to vector<8x8xf32>
    %548 = vector.extract_strided_slice %545 {offsets = [0, 16], sizes = [8, 8], strides = [1, 1]} : vector<8x24xf32> to vector<8x8xf32>
    %549 = vector.extract_strided_slice %539 {offsets = [0, 24], sizes = [8, 8], strides = [1, 1]} : vector<8x32xf32> to vector<8x8xf32>
    %550 = math.tanh %549 : vector<8x8xf32>
    %551 = arith.mulf %547, %492 : vector<8x8xf32>
    %552 = arith.mulf %546, %550 : vector<8x8xf32>
    %553 = arith.addf %551, %552 : vector<8x8xf32>
    %554 = math.tanh %553 : vector<8x8xf32>
    %555 = arith.mulf %548, %554 : vector<8x8xf32>
    %556 = tpu.concatenate %555, %514 in 1 : vector<8x8xf32>, vector<8x32xf32> -> vector<8x40xf32>
    %cst_90 = arith.constant dense<0.000000e+00> : vector<8x128xf32>
    %557 = tpu.matmul %556, %346, %cst_90 {dimension_numbers = #tpu.dot_dimension_numbers<[1], [0], [0], [1], [0, 0, 1, 1], [], []>} : vector<8x40xf32>, vector<40x128xf32>, vector<8x128xf32> -> vector<8x128xf32>
    %558 = vector.broadcast %347 : vector<1x128xf32> to vector<8x128xf32>
    %559 = arith.addf %557, %558 : vector<8x128xf32>
    %560 = vector.extract_strided_slice %559 {offsets = [0, 0], sizes = [8, 96], strides = [1, 1]} : vector<8x128xf32> to vector<8x96xf32>
    %561 = arith.negf %560 : vector<8x96xf32>
    %562 = math.exp %561 : vector<8x96xf32>
    %cst_91 = arith.constant 1.000000e+00 : f32
    %563 = vector.broadcast %cst_91 : f32 to vector<8x96xf32>
    %564 = arith.addf %563, %562 : vector<8x96xf32>
    %565 = arith.divf %563, %564 : vector<8x96xf32>
    %566 = vector.extract_strided_slice %565 {offsets = [0, 0], sizes = [8, 32], strides = [1, 1]} : vector<8x96xf32> to vector<8x32xf32>
    %567 = vector.extract_strided_slice %565 {offsets = [0, 32], sizes = [8, 32], strides = [1, 1]} : vector<8x96xf32> to vector<8x32xf32>
    %568 = vector.extract_strided_slice %565 {offsets = [0, 64], sizes = [8, 32], strides = [1, 1]} : vector<8x96xf32> to vector<8x32xf32>
    %569 = vector.extract_strided_slice %559 {offsets = [0, 96], sizes = [8, 32], strides = [1, 1]} : vector<8x128xf32> to vector<8x32xf32>
    %570 = math.tanh %569 : vector<8x32xf32>
    %571 = arith.mulf %567, %512 : vector<8x32xf32>
    %572 = arith.mulf %566, %570 : vector<8x32xf32>
    %573 = arith.addf %571, %572 : vector<8x32xf32>
    %574 = math.tanh %573 : vector<8x32xf32>
    %575 = arith.mulf %568, %574 : vector<8x32xf32>
    %576 = tpu.concatenate %575, %534 in 1 : vector<8x32xf32>, vector<8x16xf32> -> vector<8x48xf32>
    %cst_92 = arith.constant dense<0.000000e+00> : vector<8x64xf32>
    %577 = tpu.matmul %576, %348, %cst_92 {dimension_numbers = #tpu.dot_dimension_numbers<[1], [0], [0], [1], [0, 0, 1, 1], [], []>} : vector<8x48xf32>, vector<48x64xf32>, vector<8x64xf32> -> vector<8x64xf32>
    %578 = vector.broadcast %349 : vector<1x64xf32> to vector<8x64xf32>
    %579 = arith.addf %577, %578 : vector<8x64xf32>
    %580 = vector.extract_strided_slice %579 {offsets = [0, 0], sizes = [8, 48], strides = [1, 1]} : vector<8x64xf32> to vector<8x48xf32>
    %581 = arith.negf %580 : vector<8x48xf32>
    %582 = math.exp %581 : vector<8x48xf32>
    %cst_93 = arith.constant 1.000000e+00 : f32
    %583 = vector.broadcast %cst_93 : f32 to vector<8x48xf32>
    %584 = arith.addf %583, %582 : vector<8x48xf32>
    %585 = arith.divf %583, %584 : vector<8x48xf32>
    %586 = vector.extract_strided_slice %585 {offsets = [0, 0], sizes = [8, 16], strides = [1, 1]} : vector<8x48xf32> to vector<8x16xf32>
    %587 = vector.extract_strided_slice %585 {offsets = [0, 16], sizes = [8, 16], strides = [1, 1]} : vector<8x48xf32> to vector<8x16xf32>
    %588 = vector.extract_strided_slice %585 {offsets = [0, 32], sizes = [8, 16], strides = [1, 1]} : vector<8x48xf32> to vector<8x16xf32>
    %589 = vector.extract_strided_slice %579 {offsets = [0, 48], sizes = [8, 16], strides = [1, 1]} : vector<8x64xf32> to vector<8x16xf32>
    %590 = math.tanh %589 : vector<8x16xf32>
    %591 = arith.mulf %587, %532 : vector<8x16xf32>
    %592 = arith.mulf %586, %590 : vector<8x16xf32>
    %593 = arith.addf %591, %592 : vector<8x16xf32>
    %594 = math.tanh %593 : vector<8x16xf32>
    %595 = arith.mulf %588, %594 : vector<8x16xf32>
    %c0_94 = arith.constant 0 : index
    %c48 = arith.constant 48 : index
    %596 = vector.load %arg2[%c0_94, %c48] : memref<8x128xf32, #tpu.memory_space<vmem>>, vector<8x16xf32>
    tpu.vector_store %arg2[%c0_94, %c48], %595 {strides = array<i32>} : memref<8x128xf32, #tpu.memory_space<vmem>>, vector<8x16xf32>,
    %597 = tpu.concatenate %595, %555 in 1 : vector<8x16xf32>, vector<8x8xf32> -> vector<8x24xf32>
    %cst_95 = arith.constant dense<0.000000e+00> : vector<8x32xf32>
    %598 = tpu.matmul %597, %344, %cst_95 {dimension_numbers = #tpu.dot_dimension_numbers<[1], [0], [0], [1], [0, 0, 1, 1], [], []>} : vector<8x24xf32>, vector<24x32xf32>, vector<8x32xf32> -> vector<8x32xf32>
    %599 = vector.broadcast %345 : vector<1x32xf32> to vector<8x32xf32>
    %600 = arith.addf %598, %599 : vector<8x32xf32>
    %601 = vector.extract_strided_slice %600 {offsets = [0, 0], sizes = [8, 24], strides = [1, 1]} : vector<8x32xf32> to vector<8x24xf32>
    %602 = arith.negf %601 : vector<8x24xf32>
    %603 = math.exp %602 : vector<8x24xf32>
    %cst_96 = arith.constant 1.000000e+00 : f32
    %604 = vector.broadcast %cst_96 : f32 to vector<8x24xf32>
    %605 = arith.addf %604, %603 : vector<8x24xf32>
    %606 = arith.divf %604, %605 : vector<8x24xf32>
    %607 = vector.extract_strided_slice %606 {offsets = [0, 0], sizes = [8, 8], strides = [1, 1]} : vector<8x24xf32> to vector<8x8xf32>
    %608 = vector.extract_strided_slice %606 {offsets = [0, 8], sizes = [8, 8], strides = [1, 1]} : vector<8x24xf32> to vector<8x8xf32>
    %609 = vector.extract_strided_slice %606 {offsets = [0, 16], sizes = [8, 8], strides = [1, 1]} : vector<8x24xf32> to vector<8x8xf32>
    %610 = vector.extract_strided_slice %600 {offsets = [0, 24], sizes = [8, 8], strides = [1, 1]} : vector<8x32xf32> to vector<8x8xf32>
    %611 = math.tanh %610 : vector<8x8xf32>
    %612 = arith.mulf %608, %553 : vector<8x8xf32>
    %613 = arith.mulf %607, %611 : vector<8x8xf32>
    %614 = arith.addf %612, %613 : vector<8x8xf32>
    %615 = math.tanh %614 : vector<8x8xf32>
    %616 = arith.mulf %609, %615 : vector<8x8xf32>
    %617 = tpu.concatenate %616, %575 in 1 : vector<8x8xf32>, vector<8x32xf32> -> vector<8x40xf32>
    %cst_97 = arith.constant dense<0.000000e+00> : vector<8x128xf32>
    %618 = tpu.matmul %617, %346, %cst_97 {dimension_numbers = #tpu.dot_dimension_numbers<[1], [0], [0], [1], [0, 0, 1, 1], [], []>} : vector<8x40xf32>, vector<40x128xf32>, vector<8x128xf32> -> vector<8x128xf32>
    %619 = vector.broadcast %347 : vector<1x128xf32> to vector<8x128xf32>
    %620 = arith.addf %618, %619 : vector<8x128xf32>
    %621 = vector.extract_strided_slice %620 {offsets = [0, 0], sizes = [8, 96], strides = [1, 1]} : vector<8x128xf32> to vector<8x96xf32>
    %622 = arith.negf %621 : vector<8x96xf32>
    %623 = math.exp %622 : vector<8x96xf32>
    %cst_98 = arith.constant 1.000000e+00 : f32
    %624 = vector.broadcast %cst_98 : f32 to vector<8x96xf32>
    %625 = arith.addf %624, %623 : vector<8x96xf32>
    %626 = arith.divf %624, %625 : vector<8x96xf32>
    %627 = vector.extract_strided_slice %626 {offsets = [0, 0], sizes = [8, 32], strides = [1, 1]} : vector<8x96xf32> to vector<8x32xf32>
    %628 = vector.extract_strided_slice %626 {offsets = [0, 32], sizes = [8, 32], strides = [1, 1]} : vector<8x96xf32> to vector<8x32xf32>
    %629 = vector.extract_strided_slice %626 {offsets = [0, 64], sizes = [8, 32], strides = [1, 1]} : vector<8x96xf32> to vector<8x32xf32>
    %630 = vector.extract_strided_slice %620 {offsets = [0, 96], sizes = [8, 32], strides = [1, 1]} : vector<8x128xf32> to vector<8x32xf32>
    %631 = math.tanh %630 : vector<8x32xf32>
    %632 = arith.mulf %628, %573 : vector<8x32xf32>
    %633 = arith.mulf %627, %631 : vector<8x32xf32>
    %634 = arith.addf %632, %633 : vector<8x32xf32>
    %635 = math.tanh %634 : vector<8x32xf32>
    %636 = arith.mulf %629, %635 : vector<8x32xf32>
    %637 = tpu.concatenate %636, %595 in 1 : vector<8x32xf32>, vector<8x16xf32> -> vector<8x48xf32>
    %cst_99 = arith.constant dense<0.000000e+00> : vector<8x64xf32>
    %638 = tpu.matmul %637, %348, %cst_99 {dimension_numbers = #tpu.dot_dimension_numbers<[1], [0], [0], [1], [0, 0, 1, 1], [], []>} : vector<8x48xf32>, vector<48x64xf32>, vector<8x64xf32> -> vector<8x64xf32>
    %639 = vector.broadcast %349 : vector<1x64xf32> to vector<8x64xf32>
    %640 = arith.addf %638, %639 : vector<8x64xf32>
    %641 = vector.extract_strided_slice %640 {offsets = [0, 0], sizes = [8, 48], strides = [1, 1]} : vector<8x64xf32> to vector<8x48xf32>
    %642 = arith.negf %641 : vector<8x48xf32>
    %643 = math.exp %642 : vector<8x48xf32>
    %cst_100 = arith.constant 1.000000e+00 : f32
    %644 = vector.broadcast %cst_100 : f32 to vector<8x48xf32>
    %645 = arith.addf %644, %643 : vector<8x48xf32>
    %646 = arith.divf %644, %645 : vector<8x48xf32>
    %647 = vector.extract_strided_slice %646 {offsets = [0, 0], sizes = [8, 16], strides = [1, 1]} : vector<8x48xf32> to vector<8x16xf32>
    %648 = vector.extract_strided_slice %646 {offsets = [0, 16], sizes = [8, 16], strides = [1, 1]} : vector<8x48xf32> to vector<8x16xf32>
    %649 = vector.extract_strided_slice %646 {offsets = [0, 32], sizes = [8, 16], strides = [1, 1]} : vector<8x48xf32> to vector<8x16xf32>
    %650 = vector.extract_strided_slice %640 {offsets = [0, 48], sizes = [8, 16], strides = [1, 1]} : vector<8x64xf32> to vector<8x16xf32>
    %651 = math.tanh %650 : vector<8x16xf32>
    %652 = arith.mulf %648, %593 : vector<8x16xf32>
    %653 = arith.mulf %647, %651 : vector<8x16xf32>
    %654 = arith.addf %652, %653 : vector<8x16xf32>
    %655 = math.tanh %654 : vector<8x16xf32>
    %656 = arith.mulf %649, %655 : vector<8x16xf32>
    %c0_101 = arith.constant 0 : index
    %c64_102 = arith.constant 64 : index
    %657 = vector.load %arg2[%c0_101, %c64_102] : memref<8x128xf32, #tpu.memory_space<vmem>>, vector<8x16xf32>
    tpu.vector_store %arg2[%c0_101, %c64_102], %656 {strides = array<i32>} : memref<8x128xf32, #tpu.memory_space<vmem>>, vector<8x16xf32>,
    %658 = tpu.concatenate %656, %616 in 1 : vector<8x16xf32>, vector<8x8xf32> -> vector<8x24xf32>
    %cst_103 = arith.constant dense<0.000000e+00> : vector<8x32xf32>
    %659 = tpu.matmul %658, %344, %cst_103 {dimension_numbers = #tpu.dot_dimension_numbers<[1], [0], [0], [1], [0, 0, 1, 1], [], []>} : vector<8x24xf32>, vector<24x32xf32>, vector<8x32xf32> -> vector<8x32xf32>
    %660 = vector.broadcast %345 : vector<1x32xf32> to vector<8x32xf32>
    %661 = arith.addf %659, %660 : vector<8x32xf32>
    %662 = vector.extract_strided_slice %661 {offsets = [0, 0], sizes = [8, 24], strides = [1, 1]} : vector<8x32xf32> to vector<8x24xf32>
    %663 = arith.negf %662 : vector<8x24xf32>
    %664 = math.exp %663 : vector<8x24xf32>
    %cst_104 = arith.constant 1.000000e+00 : f32
    %665 = vector.broadcast %cst_104 : f32 to vector<8x24xf32>
    %666 = arith.addf %665, %664 : vector<8x24xf32>
    %667 = arith.divf %665, %666 : vector<8x24xf32>
    %668 = vector.extract_strided_slice %667 {offsets = [0, 0], sizes = [8, 8], strides = [1, 1]} : vector<8x24xf32> to vector<8x8xf32>
    %669 = vector.extract_strided_slice %667 {offsets = [0, 8], sizes = [8, 8], strides = [1, 1]} : vector<8x24xf32> to vector<8x8xf32>
    %670 = vector.extract_strided_slice %667 {offsets = [0, 16], sizes = [8, 8], strides = [1, 1]} : vector<8x24xf32> to vector<8x8xf32>
    %671 = vector.extract_strided_slice %661 {offsets = [0, 24], sizes = [8, 8], strides = [1, 1]} : vector<8x32xf32> to vector<8x8xf32>
    %672 = math.tanh %671 : vector<8x8xf32>
    %673 = arith.mulf %669, %614 : vector<8x8xf32>
    %674 = arith.mulf %668, %672 : vector<8x8xf32>
    %675 = arith.addf %673, %674 : vector<8x8xf32>
    %676 = math.tanh %675 : vector<8x8xf32>
    %677 = arith.mulf %670, %676 : vector<8x8xf32>
    %678 = tpu.concatenate %677, %636 in 1 : vector<8x8xf32>, vector<8x32xf32> -> vector<8x40xf32>
    %cst_105 = arith.constant dense<0.000000e+00> : vector<8x128xf32>
    %679 = tpu.matmul %678, %346, %cst_105 {dimension_numbers = #tpu.dot_dimension_numbers<[1], [0], [0], [1], [0, 0, 1, 1], [], []>} : vector<8x40xf32>, vector<40x128xf32>, vector<8x128xf32> -> vector<8x128xf32>
    %680 = vector.broadcast %347 : vector<1x128xf32> to vector<8x128xf32>
    %681 = arith.addf %679, %680 : vector<8x128xf32>
    %682 = vector.extract_strided_slice %681 {offsets = [0, 0], sizes = [8, 96], strides = [1, 1]} : vector<8x128xf32> to vector<8x96xf32>
    %683 = arith.negf %682 : vector<8x96xf32>
    %684 = math.exp %683 : vector<8x96xf32>
    %cst_106 = arith.constant 1.000000e+00 : f32
    %685 = vector.broadcast %cst_106 : f32 to vector<8x96xf32>
    %686 = arith.addf %685, %684 : vector<8x96xf32>
    %687 = arith.divf %685, %686 : vector<8x96xf32>
    %688 = vector.extract_strided_slice %687 {offsets = [0, 0], sizes = [8, 32], strides = [1, 1]} : vector<8x96xf32> to vector<8x32xf32>
    %689 = vector.extract_strided_slice %687 {offsets = [0, 32], sizes = [8, 32], strides = [1, 1]} : vector<8x96xf32> to vector<8x32xf32>
    %690 = vector.extract_strided_slice %687 {offsets = [0, 64], sizes = [8, 32], strides = [1, 1]} : vector<8x96xf32> to vector<8x32xf32>
    %691 = vector.extract_strided_slice %681 {offsets = [0, 96], sizes = [8, 32], strides = [1, 1]} : vector<8x128xf32> to vector<8x32xf32>
    %692 = math.tanh %691 : vector<8x32xf32>
    %693 = arith.mulf %689, %634 : vector<8x32xf32>
    %694 = arith.mulf %688, %692 : vector<8x32xf32>
    %695 = arith.addf %693, %694 : vector<8x32xf32>
    %696 = math.tanh %695 : vector<8x32xf32>
    %697 = arith.mulf %690, %696 : vector<8x32xf32>
    %698 = tpu.concatenate %697, %656 in 1 : vector<8x32xf32>, vector<8x16xf32> -> vector<8x48xf32>
    %cst_107 = arith.constant dense<0.000000e+00> : vector<8x64xf32>
    %699 = tpu.matmul %698, %348, %cst_107 {dimension_numbers = #tpu.dot_dimension_numbers<[1], [0], [0], [1], [0, 0, 1, 1], [], []>} : vector<8x48xf32>, vector<48x64xf32>, vector<8x64xf32> -> vector<8x64xf32>
    %700 = vector.broadcast %349 : vector<1x64xf32> to vector<8x64xf32>
    %701 = arith.addf %699, %700 : vector<8x64xf32>
    %702 = vector.extract_strided_slice %701 {offsets = [0, 0], sizes = [8, 48], strides = [1, 1]} : vector<8x64xf32> to vector<8x48xf32>
    %703 = arith.negf %702 : vector<8x48xf32>
    %704 = math.exp %703 : vector<8x48xf32>
    %cst_108 = arith.constant 1.000000e+00 : f32
    %705 = vector.broadcast %cst_108 : f32 to vector<8x48xf32>
    %706 = arith.addf %705, %704 : vector<8x48xf32>
    %707 = arith.divf %705, %706 : vector<8x48xf32>
    %708 = vector.extract_strided_slice %707 {offsets = [0, 0], sizes = [8, 16], strides = [1, 1]} : vector<8x48xf32> to vector<8x16xf32>
    %709 = vector.extract_strided_slice %707 {offsets = [0, 16], sizes = [8, 16], strides = [1, 1]} : vector<8x48xf32> to vector<8x16xf32>
    %710 = vector.extract_strided_slice %707 {offsets = [0, 32], sizes = [8, 16], strides = [1, 1]} : vector<8x48xf32> to vector<8x16xf32>
    %711 = vector.extract_strided_slice %701 {offsets = [0, 48], sizes = [8, 16], strides = [1, 1]} : vector<8x64xf32> to vector<8x16xf32>
    %712 = math.tanh %711 : vector<8x16xf32>
    %713 = arith.mulf %709, %654 : vector<8x16xf32>
    %714 = arith.mulf %708, %712 : vector<8x16xf32>
    %715 = arith.addf %713, %714 : vector<8x16xf32>
    %716 = math.tanh %715 : vector<8x16xf32>
    %717 = arith.mulf %710, %716 : vector<8x16xf32>
    %c0_109 = arith.constant 0 : index
    %c80_110 = arith.constant 80 : index
    %718 = vector.load %arg2[%c0_109, %c80_110] : memref<8x128xf32, #tpu.memory_space<vmem>>, vector<8x16xf32>
    tpu.vector_store %arg2[%c0_109, %c80_110], %717 {strides = array<i32>} : memref<8x128xf32, #tpu.memory_space<vmem>>, vector<8x16xf32>,
    %719 = tpu.concatenate %717, %677 in 1 : vector<8x16xf32>, vector<8x8xf32> -> vector<8x24xf32>
    %cst_111 = arith.constant dense<0.000000e+00> : vector<8x32xf32>
    %720 = tpu.matmul %719, %344, %cst_111 {dimension_numbers = #tpu.dot_dimension_numbers<[1], [0], [0], [1], [0, 0, 1, 1], [], []>} : vector<8x24xf32>, vector<24x32xf32>, vector<8x32xf32> -> vector<8x32xf32>
    %721 = vector.broadcast %345 : vector<1x32xf32> to vector<8x32xf32>
    %722 = arith.addf %720, %721 : vector<8x32xf32>
    %723 = vector.extract_strided_slice %722 {offsets = [0, 0], sizes = [8, 24], strides = [1, 1]} : vector<8x32xf32> to vector<8x24xf32>
    %724 = arith.negf %723 : vector<8x24xf32>
    %725 = math.exp %724 : vector<8x24xf32>
    %cst_112 = arith.constant 1.000000e+00 : f32
    %726 = vector.broadcast %cst_112 : f32 to vector<8x24xf32>
    %727 = arith.addf %726, %725 : vector<8x24xf32>
    %728 = arith.divf %726, %727 : vector<8x24xf32>
    %729 = vector.extract_strided_slice %728 {offsets = [0, 0], sizes = [8, 8], strides = [1, 1]} : vector<8x24xf32> to vector<8x8xf32>
    %730 = vector.extract_strided_slice %728 {offsets = [0, 8], sizes = [8, 8], strides = [1, 1]} : vector<8x24xf32> to vector<8x8xf32>
    %731 = vector.extract_strided_slice %728 {offsets = [0, 16], sizes = [8, 8], strides = [1, 1]} : vector<8x24xf32> to vector<8x8xf32>
    %732 = vector.extract_strided_slice %722 {offsets = [0, 24], sizes = [8, 8], strides = [1, 1]} : vector<8x32xf32> to vector<8x8xf32>
    %733 = math.tanh %732 : vector<8x8xf32>
    %734 = arith.mulf %730, %675 : vector<8x8xf32>
    %735 = arith.mulf %729, %733 : vector<8x8xf32>
    %736 = arith.addf %734, %735 : vector<8x8xf32>
    %737 = math.tanh %736 : vector<8x8xf32>
    %738 = arith.mulf %731, %737 : vector<8x8xf32>
    %739 = tpu.concatenate %738, %697 in 1 : vector<8x8xf32>, vector<8x32xf32> -> vector<8x40xf32>
    %cst_113 = arith.constant dense<0.000000e+00> : vector<8x128xf32>
    %740 = tpu.matmul %739, %346, %cst_113 {dimension_numbers = #tpu.dot_dimension_numbers<[1], [0], [0], [1], [0, 0, 1, 1], [], []>} : vector<8x40xf32>, vector<40x128xf32>, vector<8x128xf32> -> vector<8x128xf32>
    %741 = vector.broadcast %347 : vector<1x128xf32> to vector<8x128xf32>
    %742 = arith.addf %740, %741 : vector<8x128xf32>
    %743 = vector.extract_strided_slice %742 {offsets = [0, 0], sizes = [8, 96], strides = [1, 1]} : vector<8x128xf32> to vector<8x96xf32>
    %744 = arith.negf %743 : vector<8x96xf32>
    %745 = math.exp %744 : vector<8x96xf32>
    %cst_114 = arith.constant 1.000000e+00 : f32
    %746 = vector.broadcast %cst_114 : f32 to vector<8x96xf32>
    %747 = arith.addf %746, %745 : vector<8x96xf32>
    %748 = arith.divf %746, %747 : vector<8x96xf32>
    %749 = vector.extract_strided_slice %748 {offsets = [0, 0], sizes = [8, 32], strides = [1, 1]} : vector<8x96xf32> to vector<8x32xf32>
    %750 = vector.extract_strided_slice %748 {offsets = [0, 32], sizes = [8, 32], strides = [1, 1]} : vector<8x96xf32> to vector<8x32xf32>
    %751 = vector.extract_strided_slice %748 {offsets = [0, 64], sizes = [8, 32], strides = [1, 1]} : vector<8x96xf32> to vector<8x32xf32>
    %752 = vector.extract_strided_slice %742 {offsets = [0, 96], sizes = [8, 32], strides = [1, 1]} : vector<8x128xf32> to vector<8x32xf32>
    %753 = math.tanh %752 : vector<8x32xf32>
    %754 = arith.mulf %750, %695 : vector<8x32xf32>
    %755 = arith.mulf %749, %753 : vector<8x32xf32>
    %756 = arith.addf %754, %755 : vector<8x32xf32>
    %757 = math.tanh %756 : vector<8x32xf32>
    %758 = arith.mulf %751, %757 : vector<8x32xf32>
    %759 = tpu.concatenate %758, %717 in 1 : vector<8x32xf32>, vector<8x16xf32> -> vector<8x48xf32>
    %cst_115 = arith.constant dense<0.000000e+00> : vector<8x64xf32>
    %760 = tpu.matmul %759, %348, %cst_115 {dimension_numbers = #tpu.dot_dimension_numbers<[1], [0], [0], [1], [0, 0, 1, 1], [], []>} : vector<8x48xf32>, vector<48x64xf32>, vector<8x64xf32> -> vector<8x64xf32>
    %761 = vector.broadcast %349 : vector<1x64xf32> to vector<8x64xf32>
    %762 = arith.addf %760, %761 : vector<8x64xf32>
    %763 = vector.extract_strided_slice %762 {offsets = [0, 0], sizes = [8, 48], strides = [1, 1]} : vector<8x64xf32> to vector<8x48xf32>
    %764 = arith.negf %763 : vector<8x48xf32>
    %765 = math.exp %764 : vector<8x48xf32>
    %cst_116 = arith.constant 1.000000e+00 : f32
    %766 = vector.broadcast %cst_116 : f32 to vector<8x48xf32>
    %767 = arith.addf %766, %765 : vector<8x48xf32>
    %768 = arith.divf %766, %767 : vector<8x48xf32>
    %769 = vector.extract_strided_slice %768 {offsets = [0, 0], sizes = [8, 16], strides = [1, 1]} : vector<8x48xf32> to vector<8x16xf32>
    %770 = vector.extract_strided_slice %768 {offsets = [0, 16], sizes = [8, 16], strides = [1, 1]} : vector<8x48xf32> to vector<8x16xf32>
    %771 = vector.extract_strided_slice %768 {offsets = [0, 32], sizes = [8, 16], strides = [1, 1]} : vector<8x48xf32> to vector<8x16xf32>
    %772 = vector.extract_strided_slice %762 {offsets = [0, 48], sizes = [8, 16], strides = [1, 1]} : vector<8x64xf32> to vector<8x16xf32>
    %773 = math.tanh %772 : vector<8x16xf32>
    %774 = arith.mulf %770, %715 : vector<8x16xf32>
    %775 = arith.mulf %769, %773 : vector<8x16xf32>
    %776 = arith.addf %774, %775 : vector<8x16xf32>
    %777 = math.tanh %776 : vector<8x16xf32>
    %778 = arith.mulf %771, %777 : vector<8x16xf32>
    %c0_117 = arith.constant 0 : index
    %c96 = arith.constant 96 : index
    %779 = vector.load %arg2[%c0_117, %c96] : memref<8x128xf32, #tpu.memory_space<vmem>>, vector<8x16xf32>
    tpu.vector_store %arg2[%c0_117, %c96], %778 {strides = array<i32>} : memref<8x128xf32, #tpu.memory_space<vmem>>, vector<8x16xf32>,
    %780 = tpu.concatenate %778, %738 in 1 : vector<8x16xf32>, vector<8x8xf32> -> vector<8x24xf32>
    %cst_118 = arith.constant dense<0.000000e+00> : vector<8x32xf32>
    %781 = tpu.matmul %780, %344, %cst_118 {dimension_numbers = #tpu.dot_dimension_numbers<[1], [0], [0], [1], [0, 0, 1, 1], [], []>} : vector<8x24xf32>, vector<24x32xf32>, vector<8x32xf32> -> vector<8x32xf32>
    %782 = vector.broadcast %345 : vector<1x32xf32> to vector<8x32xf32>
    %783 = arith.addf %781, %782 : vector<8x32xf32>
    %784 = vector.extract_strided_slice %783 {offsets = [0, 0], sizes = [8, 24], strides = [1, 1]} : vector<8x32xf32> to vector<8x24xf32>
    %785 = arith.negf %784 : vector<8x24xf32>
    %786 = math.exp %785 : vector<8x24xf32>
    %cst_119 = arith.constant 1.000000e+00 : f32
    %787 = vector.broadcast %cst_119 : f32 to vector<8x24xf32>
    %788 = arith.addf %787, %786 : vector<8x24xf32>
    %789 = arith.divf %787, %788 : vector<8x24xf32>
    %790 = vector.extract_strided_slice %789 {offsets = [0, 0], sizes = [8, 8], strides = [1, 1]} : vector<8x24xf32> to vector<8x8xf32>
    %791 = vector.extract_strided_slice %789 {offsets = [0, 8], sizes = [8, 8], strides = [1, 1]} : vector<8x24xf32> to vector<8x8xf32>
    %792 = vector.extract_strided_slice %789 {offsets = [0, 16], sizes = [8, 8], strides = [1, 1]} : vector<8x24xf32> to vector<8x8xf32>
    %793 = vector.extract_strided_slice %783 {offsets = [0, 24], sizes = [8, 8], strides = [1, 1]} : vector<8x32xf32> to vector<8x8xf32>
    %794 = math.tanh %793 : vector<8x8xf32>
    %795 = arith.mulf %791, %736 : vector<8x8xf32>
    %796 = arith.mulf %790, %794 : vector<8x8xf32>
    %797 = arith.addf %795, %796 : vector<8x8xf32>
    %798 = math.tanh %797 : vector<8x8xf32>
    %799 = arith.mulf %792, %798 : vector<8x8xf32>
    %800 = tpu.concatenate %799, %758 in 1 : vector<8x8xf32>, vector<8x32xf32> -> vector<8x40xf32>
    %cst_120 = arith.constant dense<0.000000e+00> : vector<8x128xf32>
    %801 = tpu.matmul %800, %346, %cst_120 {dimension_numbers = #tpu.dot_dimension_numbers<[1], [0], [0], [1], [0, 0, 1, 1], [], []>} : vector<8x40xf32>, vector<40x128xf32>, vector<8x128xf32> -> vector<8x128xf32>
    %802 = vector.broadcast %347 : vector<1x128xf32> to vector<8x128xf32>
    %803 = arith.addf %801, %802 : vector<8x128xf32>
    %804 = vector.extract_strided_slice %803 {offsets = [0, 0], sizes = [8, 96], strides = [1, 1]} : vector<8x128xf32> to vector<8x96xf32>
    %805 = arith.negf %804 : vector<8x96xf32>
    %806 = math.exp %805 : vector<8x96xf32>
    %cst_121 = arith.constant 1.000000e+00 : f32
    %807 = vector.broadcast %cst_121 : f32 to vector<8x96xf32>
    %808 = arith.addf %807, %806 : vector<8x96xf32>
    %809 = arith.divf %807, %808 : vector<8x96xf32>
    %810 = vector.extract_strided_slice %809 {offsets = [0, 0], sizes = [8, 32], strides = [1, 1]} : vector<8x96xf32> to vector<8x32xf32>
    %811 = vector.extract_strided_slice %809 {offsets = [0, 32], sizes = [8, 32], strides = [1, 1]} : vector<8x96xf32> to vector<8x32xf32>
    %812 = vector.extract_strided_slice %809 {offsets = [0, 64], sizes = [8, 32], strides = [1, 1]} : vector<8x96xf32> to vector<8x32xf32>
    %813 = vector.extract_strided_slice %803 {offsets = [0, 96], sizes = [8, 32], strides = [1, 1]} : vector<8x128xf32> to vector<8x32xf32>
    %814 = math.tanh %813 : vector<8x32xf32>
    %815 = arith.mulf %811, %756 : vector<8x32xf32>
    %816 = arith.mulf %810, %814 : vector<8x32xf32>
    %817 = arith.addf %815, %816 : vector<8x32xf32>
    %818 = math.tanh %817 : vector<8x32xf32>
    %819 = arith.mulf %812, %818 : vector<8x32xf32>
    %820 = tpu.concatenate %819, %778 in 1 : vector<8x32xf32>, vector<8x16xf32> -> vector<8x48xf32>
    %cst_122 = arith.constant dense<0.000000e+00> : vector<8x64xf32>
    %821 = tpu.matmul %820, %348, %cst_122 {dimension_numbers = #tpu.dot_dimension_numbers<[1], [0], [0], [1], [0, 0, 1, 1], [], []>} : vector<8x48xf32>, vector<48x64xf32>, vector<8x64xf32> -> vector<8x64xf32>
    %822 = vector.broadcast %349 : vector<1x64xf32> to vector<8x64xf32>
    %823 = arith.addf %821, %822 : vector<8x64xf32>
    %824 = vector.extract_strided_slice %823 {offsets = [0, 0], sizes = [8, 48], strides = [1, 1]} : vector<8x64xf32> to vector<8x48xf32>
    %825 = arith.negf %824 : vector<8x48xf32>
    %826 = math.exp %825 : vector<8x48xf32>
    %cst_123 = arith.constant 1.000000e+00 : f32
    %827 = vector.broadcast %cst_123 : f32 to vector<8x48xf32>
    %828 = arith.addf %827, %826 : vector<8x48xf32>
    %829 = arith.divf %827, %828 : vector<8x48xf32>
    %830 = vector.extract_strided_slice %829 {offsets = [0, 0], sizes = [8, 16], strides = [1, 1]} : vector<8x48xf32> to vector<8x16xf32>
    %831 = vector.extract_strided_slice %829 {offsets = [0, 16], sizes = [8, 16], strides = [1, 1]} : vector<8x48xf32> to vector<8x16xf32>
    %832 = vector.extract_strided_slice %829 {offsets = [0, 32], sizes = [8, 16], strides = [1, 1]} : vector<8x48xf32> to vector<8x16xf32>
    %833 = vector.extract_strided_slice %823 {offsets = [0, 48], sizes = [8, 16], strides = [1, 1]} : vector<8x64xf32> to vector<8x16xf32>
    %834 = math.tanh %833 : vector<8x16xf32>
    %835 = arith.mulf %831, %776 : vector<8x16xf32>
    %836 = arith.mulf %830, %834 : vector<8x16xf32>
    %837 = arith.addf %835, %836 : vector<8x16xf32>
    %838 = math.tanh %837 : vector<8x16xf32>
    %839 = arith.mulf %832, %838 : vector<8x16xf32>
    %c0_124 = arith.constant 0 : index
    %c112_125 = arith.constant 112 : index
    %840 = vector.load %arg2[%c0_124, %c112_125] : memref<8x128xf32, #tpu.memory_space<vmem>>, vector<8x16xf32>
    tpu.vector_store %arg2[%c0_124, %c112_125], %839 {strides = array<i32>} : memref<8x128xf32, #tpu.memory_space<vmem>>, vector<8x16xf32>,
    return
  }
}

</mosaic_0001>

<bundles_post_ra>
// kernel: tpu_custom_call.1
= control target key start
LH: loop header
LB: loop body
LE: loop exit
PB: predicated region body
PF: predicated region fallthrough
CT: control target
= control target key end

     0   :  { %9 = vsyncpa [#allocation3], 0  ;;  %s6593_s0 = inlined_call_operand.vmem [shape: f32[64,8], index: 0, kind: input, shape index: {}]   ;;  %s6594_s1 = inlined_call_operand.hbm [shape: f32[216,128], index: 1, kind: input, shape index: {}]   ;;  %s6595_s2 = inlined_call_operand.hbm [shape: f32[8,128], index: 2, kind: output, shape index: {0}]   ;;  %s6596_s3 = inlined_call_operand.hbm [shape: f32[8,8], index: 3, kind: output, shape index: {1}]  }
   0x1   :  { %10 = vsyncpa [#allocation4], 0 }
   0x2   :  { %11 = vsyncpa [#allocation7], 0  ;;  %s5699_s12 = smov [#allocation2]   ;;  %s5627_s16 = scalar_lea.hbm %s6594_s1, 3456 }
   0x3   :  { %s19_s13 = sshll.u32 %s5699_s12, 4  ;;  %p5628_p0 = scmp.ne.s32.totalorder %s6594_s1, %s5627_s16  ;;  %s20_s13 = int_to_ptr.vmem [resolvable:$true] %s19_s13 }
   0x4   :  { %p5631_p1 = scmp.lt.u32.totalorder %s5627_s16, %s6594_s1 }
   0x6   :  { %p5633_p2 = pnand %p5631_p1, %p5628_p0 }
   0x8   :  { %5636 = shalt.err (!%p5633_p2)
}
   0x9   :  { %s5637_s21 = scalar_lea.vmem %s20_s13, 3456  ;;  %p5642_p4 = scmp.lt.s32.totalorder %s20_s13, %s20_s13 }
   0xa   :  { %p5638_p3 = scmp.ne.s32.totalorder %s20_s13, %s5637_s21  ;;  %p5643_p5 = scmp.lt.s32.totalorder %s5637_s21, %s5637_s21 }
   0xc   :  { %p5644_p6 = por %p5643_p5, %p5642_p4 }
   0xe   :  { %p5645_p7 = pnand %p5644_p6, %p5638_p3 }
  0x10   :  { %5648 = shalt.err (!%p5645_p7)
}
  0x11   :  { %s5700_s22 = smov 128   ;;  %s5701_s23 = smov 8  }
  0x12   :  { %25 = dma.hbm_to_vmem [thread:$0]  %s6594_s1, 3456, %s20_s13, [#allocation3], %s5700_s22, %s5700_s22, %s5701_s23  }
  0x13   :  { %5693 = dma.done.wait [#allocation3], 3456  }
  0x14   :  { %5694 = vsyncadd [#allocation3], 4294963840  ;;  %vm49_vm0 = vcmask 64512   ;;  %v29_v0 = vld [vmem:[#allocation2] sm:$0xff]  ;;  %v43_v1 = vld [vmem:[%s6593_s0 + $0x30] sm:$0xff]  ;;  %v5702_v8 = vmov 0.0|0.0  }
  0x15   :  { %v37_v2 = vld [vmem:[%s6593_s0] sm:$0xff]  ;;  %5283 = vmatprep.subr.mxu1 %v29_v0  ;;  %4660 = vmatprep.subr.mxu0 %v29_v0  ;;  %v44_v3 = vld [vmem:[%s6593_s0 + $0x38] sm:$0xff]  ;;  %v30_v4 = vld [vmem:[#allocation2 + $0x8] sm:$0xff]  ;;  %vm5703_vm1 = vmmov 0   ;;  %v5704_v9 = vmov 0.0   ;;  %s5705_s6 = smov 80  }
  0x16   :  { %5284 = vmatpush3.msra.mxu1 %v29_v0  ;;  %4671 = vmatprep.mubr.msk.f32.mxu1 %vm49_vm0, %v43_v1  ;;  %v38_v5 = vld [vmem:[%s6593_s0 + $0x8] sm:$0xff]  ;;  %v31_v6 = vld [vmem:[#allocation2 + $0x10] sm:$0xff]  ;;  %v5776_v10 = vld [vmem:[#allocation2 + $0x18] ss:$0 sm:$0xff]  ;;  %s5706_s7 = smov 16   ;;  %s5707_s8 = smov 96  }
  0x17   :  { %4661 = vmatpush3.msra.mxu0 %v29_v0  ;;  %4662 = vmatprep.mubr.msk.f32.mxu0 %vm49_vm0, %v37_v2  ;;  %v5763_v7 = vpack.c.bf16 %v31_v6, %v30_v4  ;;  %v33_v29 = vld [vmem:[#allocation2 + $0x20] sm:$0xff]  ;;  %v34_v30 = vld [vmem:[#allocation2 + $0x28] sm:$0xff]  ;;  %v5792_v33 = vld [vmem:[#allocation2 + $0x30] sm:$0xff]  ;;  %vm179_vm2 = vcmask 130048   ;;  %vm287_vm3 = vcmask 195584   ;;  %s5708_s13 = smov 104  }
  0x18   :  { %4672 = vmatmul.mubr.msk.f32.vlgmr.msra.gmra.mrb[0].mxu1 %vm49_vm0, %v44_v3  ;;  %5094 = vmatprep.subr.bf16.mxu1 %v5702_v8  ;;  %v5785_v31 = vpack.c.bf16 %v34_v30, %v33_v29  ;;  %v5814_v54 = vld [vmem:[#allocation2 + $0x38] ss:$0 sm:$0xff]  ;;  %v39_v58 = vld [vmem:[%s6593_s0 + $0x10] sm:$0xff]  ;;  %vm1932_vm4 = vcmask 326656   ;;  %s5710_s18 = smov 32   ;;  %s5711_s19 = smov 64  }
  0x19   :  { %4663 = vmatmul.mubr.msk.f32.vlgmr.msra.gmra.mrb[0].mxu0 %vm49_vm0, %v38_v5  ;;  %5096 = vmatpush3.bf16.msra.mxu1 %v5763_v7  ;;  %v40_v59 = vld [vmem:[%s6593_s0 + $0x18] sm:$0xff]  ;;  %vm2034_vm5 = vcmask 261120   ;;  %vm2040_vm6 = vcmask 392192   ;;  %s5712_s20 = smov 72   ;;  %vm2456_vm7 = vcmask 261248   ;;  %vm2766_vm8 = vcmask 392448  }
  0x1a   :  { %4678 = vmatprep.mubr.msk.f32.mxu1 %vm5703_vm1, %v5704_v9  ;;  %5097 = vmatprep.subr.bf16.mxu1 %v5702_v8  ;;  %s5713_s21 = smov 48   ;;  %s5714_s22 = smov [#allocation6]  }
  0x1b   :  { %5103 = vmatprep.subr.bf16.mxu0 %v5702_v8  ;;  %4665 = vmatprep.mubr.msk.f32.mxu0 %vm49_vm0, %v39_v58 }
  0x1c   :  { %4679 = vmatmul.mubr.f32.vlgmr.msra.gmra.mrb[2].mxu1 %v5704_v9  ;;  %5105 = vmatpush3.bf16.msra.mxu0 %v5785_v31 }
  0x1d   :  { %4687 = vmatprep.mubr.msk.f32.mxu1 %vm5703_vm1, %v5704_v9  ;;  %5099 = vmatpush3.bf16.msra.mxu1 %v5785_v31 }
  0x1e   :  { %4685 = vmatprep.subr.mxu1 %v5704_v9  ;;  %4701 = vmatprep.subr.mxu0 %v5704_v9 }
  0x1f   :  { %4666 = vmatmul.mubr.msk.f32.gmra.mrb[2].mxu0 %vm49_vm0, %v40_v59 }
  0x20   :  { %4702 = vmatpush3.msra.mxu0 %v5792_v33 }
  0x21   :  { %4686 = vmatpush3.msra.mxu1 %v5792_v33  ;;  %5109 = vmatprep.subr.bf16.mxu0 %v5702_v8 }
  0x22   :  { %5100 = vmatprep.subr.bf16.mxu1 %v5702_v8 }
  0xeb   :  { %v5778_v11 = vpop.f32.mrb[0].mxu1 }
  0xec   :  { %v4664_v12 = vpop.f32.mrb[0].mxu0  ;;  %v5780_v13 = vpop.f32.mrb[1].mxu1 }
  0xed   :  { %v140_v14 = vpop.f32.mrb[1].mxu0  ;;  %v146_v42 = vadd.f32 %v4664_v12, %v5776_v10 }
  0xee   :  { %v141_v15 = vadd.f32 %v5776_v10, %v140_v14 }
  0xef   :  { %v249_v16 = vpop.f32.mrb[2].mxu1 }
  0xf0   :  { %v250_v17 = vadd.f32 %v249_v16, %v141_v15  ;;  %v4680_v18 = vpop.f32.mrb[3].mxu1  ;;  %v41_v16 = vld [vmem:[%s6593_s0 + $0x20] sm:$0xff] }
  0xf1   :  { %4668 = vmatprep.mubr.msk.f32.mxu0 %vm49_vm0, %v41_v16 }
  0xf2   :  { %5302 = vtanh.f32 %v250_v17  ;;  %v4377_v20 = vmul.f32 -1.442695, %v250_v17  ;;  %v42_v17 = vld [vmem:[%s6593_s0 + $0x28] sm:$0xff]  ;;  %v5850_v18 = vpop.f32.mrb[2].mxu0  ;;  %s5709_s0 = smov 112  }
  0xf3   :  { %4669 = vmatmul.mubr.msk.f32.gmra.mrb[4].mxu0 %vm49_vm0, %v42_v17 }
  0xf4   :  { %5304 = vpow2.f32 %v4377_v20  ;;  %4703 = vmatprep.mubr.msk.f32.mxu0 %vm5703_vm1, %v5704_v9 }
  0xfc   :  { %v5303_v19 = vpop.eup %5302 }
  0xfd   :  { %262 = vrot.lane.b32.xlu0 %v5303_v19, %s5705_s6  ;;  %v150_v19 = vpop.f32.mrb[3].mxu0 }
  0xfe   :  { %v5305_v21 = vpop.eup %5304 }
  0xff   :  { %v256_v22 = vadd.f32 1.0, %v5305_v21 }
 0x101   :  { %5306 = vrcp.f32 %v256_v22 }
 0x10b   :  { %v5307_v23 = vpop.eup %5306 }
 0x10c   :  { %v260_v26 = vmul.f32 0.0, %v5307_v23 }
 0x16f   :  { %v263_v24 = vpop.permute.xlu0 %262 }
 0x170   :  { %v265_v25 = vmul.f32 %v5307_v23, %v263_v24 }
 0x172   :  { %267 = vrot.lane.b32.xlu0 %v265_v25, %s5706_s7 }
 0x1c6   :  { %v5863_v30 = vpop.f32.mrb[4].mxu0 }
 0x1e4   :  { %v268_v27 = vpop.permute.xlu0 %267 }
 0x1e5   :  { %v270_v28 = vadd.f32 %v268_v27, %v260_v26  ;;  %v151_v26 = vadd.f32 %v5776_v10, %v150_v19 }
 0x1e7   :  { %5308 = vtanh.f32 %v270_v28 }
 0x1f1   :  { %v5309_v32 = vpop.eup %5308 }
 0x1f2   :  { %273 = vrot.lane.b32.xlu1 %v5309_v32, %s5706_s7  ;;  %v5865_v32 = vpop.f32.mrb[5].mxu0 }
 0x264   :  { %v274_v34 = vpop.permute.xlu1 %273 }
 0x265   :  { %v276_v35 = vmul.f32 %v5307_v23, %v274_v34 }
 0x267   :  { %v277_v36 = vmax.f32 %v276_v35, 0.0  ;;  %386 = vrot.lane.b32.xlu0 %v276_v35, %s5707_s8 }
 0x269   :  { %279 = vrot.lane.b32.xlu1 %v277_v36, %s5707_s8 }
 0x2d9   :  { %v387_v39 = vpop.permute.xlu0 %386 }
 0x2db   :  { %v280_v37 = vpop.permute.xlu1 %279 }
 0x2dc   :  { %v282_v38 = vsel %vm179_vm2, %v280_v37, 0.0 }
 0x2dd   :  { %4688 = vmatmul.mubr.msk.f32.vlgmr.msra.gmra.mrb[4].mxu1 %vm287_vm3, %v282_v38 }
 0x2de   :  { %5102 = vmatpush3.bf16.msra.mxu1 %v5763_v7  ;;  %4694 = vmatprep.mubr.msk.f32.mxu1 %vm5703_vm1, %v5704_v9 }
 0x2df   :  { %5106 = vmatprep.subr.bf16.mxu1 %v5702_v8 }
 0x2e1   :  { %4695 = vmatmul.mubr.msk.f32.vlgmr.msra.gmra.mrb[6].mxu1 %vm179_vm2, %v387_v39 }
 0x2e2   :  { %5108 = vmatpush3.bf16.msra.mxu1 %v5763_v7  ;;  %4710 = vmatprep.mubr.msk.f32.mxu1 %vm5703_vm1, %v5704_v9 }
 0x2e3   :  { %5112 = vmatprep.subr.bf16.mxu1 %v5702_v8 }
 0x3b0   :  { %v357_v40 = vpop.f32.mrb[4].mxu1 }
 0x3b1   :  { %v4689_v41 = vpop.f32.mrb[5].mxu1  ;;  %v358_v57 = vadd.f32 %v5814_v54, %v357_v40 }
 0x3b3   :  { %v4380_v62 = vmul.f32 -1.442695, %v358_v57 }
 0x3b4   :  { %v456_v43 = vpop.f32.mrb[6].mxu1 }
 0x3b5   :  { %v457_v44 = vadd.f32 %v456_v43, %v146_v42  ;;  %v4696_v45 = vpop.f32.mrb[7].mxu1 }
 0x3b7   :  { %5310 = vtanh.f32 %v457_v44  ;;  %v4382_v47 = vmul.f32 -1.442695, %v457_v44 }
 0x3b9   :  { %5312 = vpow2.f32 %v4382_v47 }
 0x3c1   :  { %v5311_v46 = vpop.eup %5310 }
 0x3c2   :  { %469 = vrot.lane.b32.xlu1 %v5311_v46, %s5705_s6 }
 0x3c3   :  { %v5313_v48 = vpop.eup %5312 }
 0x3c4   :  { %v463_v49 = vadd.f32 1.0, %v5313_v48 }
 0x3c6   :  { %5314 = vrcp.f32 %v463_v49 }
 0x3d0   :  { %v5315_v50 = vpop.eup %5314 }
 0x3d1   :  { %v467_v53 = vmul.f32 %v5315_v50, %v270_v28 }
 0x434   :  { %v470_v51 = vpop.permute.xlu1 %469 }
 0x435   :  { %v472_v52 = vmul.f32 %v5315_v50, %v470_v51 }
 0x437   :  { %474 = vrot.lane.b32.xlu0 %v472_v52, %s5706_s7 }
 0x4a9   :  { %v475_v55 = vpop.permute.xlu0 %474 }
 0x4aa   :  { %v5816_v56 = vadd.f32 %v475_v55, %v467_v53 }
 0x4ac   :  { %5316 = vtanh.f32 %v5816_v56 }
 0x4ad   :  { %5318 = vtanh.f32 %v358_v57 }
 0x4ae   :  { %5320 = vpow2.f32 %v4380_v62 }
 0x4b6   :  { %v5317_v60 = vpop.eup %5316 }
 0x4b7   :  { %480 = vrot.lane.b32.xlu1 %v5317_v60, %s5706_s7  ;;  %v5319_v61 = vpop.eup %5318 }
 0x4b8   :  { %v5321_v63 = vpop.eup %5320 }
 0x4b9   :  { %v364_v0 = vadd.f32 1.0, %v5321_v63  ;;  %v156_v63 = vadd.f32 %v5850_v18, %v5776_v10 }
 0x4bb   :  { %370 = vrot.lane.b32.xlu1 %v5319_v61, %s5708_s13  ;;  %5322 = vrcp.f32 %v364_v0 }
 0x4c5   :  { %v5323_v3 = vpop.eup %5322 }
 0x4c6   :  { %v368_v12 = vmul.f32 0.0, %v5323_v3 }
 0x529   :  { %v481_v1 = vpop.permute.xlu1 %480 }
 0x52a   :  { %v483_v2 = vmul.f32 %v5315_v50, %v481_v1 }
 0x52c   :  { %588 = vrot.lane.b32.xlu0 %v483_v2, %s5707_s8  ;;  %v484_v21 = vmax.f32 %v483_v2, 0.0 }
 0x52d   :  { %v371_v4 = vpop.permute.xlu1 %370 }
 0x52e   :  { %v373_v5 = vmul.f32 %v5323_v3, %v371_v4 }
 0x530   :  { %375 = vrot.lane.b32.xlu0 %v373_v5, %s5701_s23 }
 0x59e   :  { %v589_v6 = vpop.permute.xlu0 %588 }
 0x59f   :  { %4711 = vmatmul.mubr.msk.f32.vlgmr.msra.gmra.mrb[8].mxu1 %vm179_vm2, %v589_v6 }
 0x5a0   :  { %5114 = vmatpush3.bf16.msra.mxu1 %v5763_v7  ;;  %4726 = vmatprep.mubr.msk.f32.mxu1 %vm5703_vm1, %v5704_v9 }
 0x5a1   :  { %5115 = vmatprep.subr.bf16.mxu1 %v5702_v8 }
 0x5a2   :  { %v376_v14 = vpop.permute.xlu0 %375 }
 0x5a3   :  { %v5837_v15 = vadd.f32 %v376_v14, %v368_v12 }
 0x5a5   :  { %5324 = vtanh.f32 %v5837_v15 }
 0x5af   :  { %v5325_v20 = vpop.eup %5324 }
 0x5b0   :  { %381 = vrot.lane.b32.xlu0 %v5325_v20, %s5701_s23 }
 0x5b4   :  { %486 = vrot.lane.b32.xlu0 %v484_v21, %s5707_s8 }
 0x622   :  { %v382_v22 = vpop.permute.xlu0 %381 }
 0x623   :  { %v384_v23 = vmul.f32 %v5323_v3, %v382_v22 }
 0x626   :  { %v487_v24 = vpop.permute.xlu0 %486 }
 0x627   :  { %v489_v25 = vsel %vm179_vm2, %v487_v24, %v384_v23 }
 0x628   :  { %4704 = vmatmul.mubr.msk.f32.vlgmr.msra.gmra.mrb[6].mxu0 %vm287_vm3, %v489_v25 }
 0x629   :  { %5111 = vmatpush3.bf16.msra.mxu0 %v5785_v31  ;;  %4719 = vmatprep.mubr.msk.f32.mxu0 %vm5703_vm1, %v5704_v9 }
 0x62a   :  { %4717 = vmatprep.subr.mxu0 %v5704_v9 }
 0x62d   :  { %4718 = vmatpush3.msra.mxu0 %v5792_v33 }
 0x62e   :  { %5118 = vmatprep.subr.bf16.mxu0 %v5702_v8 }
 0x672   :  { %v658_v27 = vpop.f32.mrb[8].mxu1 }
 0x673   :  { %v659_v28 = vadd.f32 %v658_v27, %v151_v26  ;;  %v4712_v29 = vpop.f32.mrb[9].mxu1 }
 0x675   :  { %5326 = vtanh.f32 %v659_v28  ;;  %v4386_v35 = vmul.f32 -1.442695, %v659_v28 }
 0x677   :  { %5328 = vpow2.f32 %v4386_v35 }
 0x67f   :  { %v5327_v34 = vpop.eup %5326 }
 0x680   :  { %671 = vrot.lane.b32.xlu1 %v5327_v34, %s5705_s6 }
 0x681   :  { %v5329_v36 = vpop.eup %5328 }
 0x682   :  { %v665_v37 = vadd.f32 1.0, %v5329_v36 }
 0x684   :  { %5330 = vrcp.f32 %v665_v37 }
 0x68e   :  { %v5331_v38 = vpop.eup %5330 }
 0x68f   :  { %v669_v43 = vmul.f32 %v5331_v38, %v5816_v56 }
 0x6f2   :  { %v672_v39 = vpop.permute.xlu1 %671 }
 0x6f3   :  { %v674_v40 = vmul.f32 %v5331_v38, %v672_v39 }
 0x6f5   :  { %676 = vrot.lane.b32.xlu1 %v674_v40, %s5706_s7 }
 0x6fb   :  { %v559_v41 = vpop.f32.mrb[6].mxu0 }
 0x6fc   :  { %v4705_v42 = vpop.f32.mrb[7].mxu0  ;;  %v560_v46 = vadd.f32 %v5814_v54, %v559_v41 }
 0x6fe   :  { %v4384_v49 = vmul.f32 -1.442695, %v560_v46 }
 0x767   :  { %v677_v44 = vpop.permute.xlu1 %676 }
 0x768   :  { %v679_v45 = vadd.f32 %v677_v44, %v669_v43 }
 0x76a   :  { %5332 = vtanh.f32 %v679_v45 }
 0x76b   :  { %5334 = vtanh.f32 %v560_v46 }
 0x76c   :  { %5336 = vpow2.f32 %v4384_v49 }
 0x774   :  { %v5333_v47 = vpop.eup %5332 }
 0x775   :  { %682 = vrot.lane.b32.xlu1 %v5333_v47, %s5706_s7  ;;  %v5335_v48 = vpop.eup %5334  ;;  %v161_v47 = vadd.f32 %v5776_v10, %v5865_v32 }
 0x776   :  { %v5337_v50 = vpop.eup %5336 }
 0x777   :  { %v566_v51 = vadd.f32 1.0, %v5337_v50 }
 0x779   :  { %572 = vrot.lane.b32.xlu1 %v5335_v48, %s5708_s13  ;;  %5338 = vrcp.f32 %v566_v51 }
 0x783   :  { %v5339_v55 = vpop.eup %5338 }
 0x784   :  { %v570_v59 = vmul.f32 %v5339_v55, %v5837_v15 }
 0x7e7   :  { %v683_v52 = vpop.permute.xlu1 %682 }
 0x7e8   :  { %v685_v53 = vmul.f32 %v5331_v38, %v683_v52 }
 0x7ea   :  { %790 = vrot.lane.b32.xlu0 %v685_v53, %s5707_s8  ;;  %v686_v4 = vmax.f32 %v685_v53, 0.0 }
 0x7eb   :  { %v573_v56 = vpop.permute.xlu1 %572 }
 0x7ec   :  { %v575_v57 = vmul.f32 %v5339_v55, %v573_v56 }
 0x7ee   :  { %577 = vrot.lane.b32.xlu0 %v575_v57, %s5701_s23 }
 0x85c   :  { %v791_v58 = vpop.permute.xlu0 %790 }
 0x85d   :  { %4727 = vmatmul.mubr.msk.f32.vlgmr.msra.gmra.mrb[10].mxu1 %vm179_vm2, %v791_v58 }
 0x85e   :  { %5117 = vmatpush3.bf16.msra.mxu1 %v5785_v31  ;;  %4735 = vmatprep.mubr.msk.f32.mxu1 %vm5703_vm1, %v5704_v9 }
 0x85f   :  { %4733 = vmatprep.subr.mxu1 %v5704_v9 }
 0x860   :  { %v578_v60 = vpop.permute.xlu0 %577 }
 0x861   :  { %v5881_v61 = vadd.f32 %v578_v60, %v570_v59 }
 0x862   :  { %4734 = vmatpush3.msra.mxu1 %v5792_v33 }
 0x863   :  { %5340 = vtanh.f32 %v5881_v61  ;;  %5124 = vmatprep.subr.bf16.mxu1 %v5702_v8 }
 0x86d   :  { %v5341_v62 = vpop.eup %5340 }
 0x86e   :  { %583 = vrot.lane.b32.xlu0 %v5341_v62, %s5701_s23 }
 0x8e0   :  { %v584_v15 = vpop.permute.xlu0 %583 }
 0x8e1   :  { %v586_v18 = vmul.f32 %v5339_v55, %v584_v15 }
 0x930   :  { %v860_v0 = vpop.f32.mrb[10].mxu1 }
 0x931   :  { %v861_v1 = vadd.f32 %v860_v0, %v156_v63  ;;  %v4728_v2 = vpop.f32.mrb[11].mxu1 }
 0x933   :  { %5342 = vtanh.f32 %v861_v1  ;;  %v4390_v5 = vmul.f32 -1.442695, %v861_v1 }
 0x935   :  { %5344 = vpow2.f32 %v4390_v5 }
 0x93d   :  { %v5343_v3 = vpop.eup %5342 }
 0x93e   :  { %873 = vrot.lane.b32.xlu1 %v5343_v3, %s5705_s6 }
 0x93f   :  { %v5345_v6 = vpop.eup %5344 }
 0x940   :  { %v867_v12 = vadd.f32 1.0, %v5345_v6 }
 0x942   :  { %688 = vrot.lane.b32.xlu1 %v686_v4, %s5707_s8  ;;  %5346 = vrcp.f32 %v867_v12 }
 0x94c   :  { %v5347_v14 = vpop.eup %5346 }
 0x94d   :  { %v871_v21 = vmul.f32 %v5347_v14, %v679_v45 }
 0x9b0   :  { %v874_v16 = vpop.permute.xlu1 %873 }
 0x9b1   :  { %v876_v17 = vmul.f32 %v5347_v14, %v874_v16 }
 0x9b3   :  { %878 = vrot.lane.b32.xlu0 %v876_v17, %s5706_s7 }
 0x9b4   :  { %v689_v19 = vpop.permute.xlu1 %688 }
 0x9b5   :  { %v691_v20 = vsel %vm179_vm2, %v689_v19, %v586_v18 }
 0x9b6   :  { %4720 = vmatmul.mubr.msk.f32.vlgmr.msra.gmra.mrb[8].mxu0 %vm287_vm3, %v691_v20 }
 0x9b7   :  { %5120 = vmatpush3.bf16.msra.mxu0 %v5763_v7  ;;  %4742 = vmatprep.mubr.msk.f32.mxu0 %vm5703_vm1, %v5704_v9 }
 0x9b8   :  { %5121 = vmatprep.subr.bf16.mxu0 %v5702_v8 }
 0xa25   :  { %v879_v22 = vpop.permute.xlu0 %878 }
 0xa26   :  { %v5898_v23 = vadd.f32 %v879_v22, %v871_v21 }
 0xa28   :  { %5348 = vtanh.f32 %v5898_v23 }
 0xa32   :  { %v5349_v24 = vpop.eup %5348 }
 0xa33   :  { %884 = vrot.lane.b32.xlu1 %v5349_v24, %s5706_s7 }
 0xa89   :  { %v761_v25 = vpop.f32.mrb[8].mxu0 }
 0xa8a   :  { %v762_v26 = vadd.f32 %v5814_v54, %v761_v25  ;;  %v4721_v27 = vpop.f32.mrb[9].mxu0 }
 0xa8c   :  { %5350 = vtanh.f32 %v762_v26  ;;  %v4388_v35 = vmul.f32 -1.442695, %v762_v26 }
 0xa8e   :  { %5352 = vpow2.f32 %v4388_v35 }
 0xa96   :  { %v5351_v28 = vpop.eup %5350 }
 0xa97   :  { %774 = vrot.lane.b32.xlu1 %v5351_v28, %s5708_s13 }
 0xa98   :  { %v5353_v36 = vpop.eup %5352 }
 0xa99   :  { %v768_v37 = vadd.f32 1.0, %v5353_v36 }
 0xa9b   :  { %5354 = vrcp.f32 %v768_v37 }
 0xaa5   :  { %v885_v29 = vpop.permute.xlu1 %884  ;;  %v5355_v38 = vpop.eup %5354 }
 0xaa6   :  { %v887_v34 = vmul.f32 %v5347_v14, %v885_v29  ;;  %v772_v43 = vmul.f32 %v5355_v38, %v5881_v61 }
 0xaa8   :  { %992 = vrot.lane.b32.xlu0 %v887_v34, %s5707_s8  ;;  %v888_v41 = vmax.f32 %v887_v34, 0.0  ;;  %v166_v34 = vadd.f32 %v5863_v30, %v5776_v10 }
 0xb09   :  { %v775_v39 = vpop.permute.xlu1 %774 }
 0xb0a   :  { %v777_v40 = vmul.f32 %v5355_v38, %v775_v39 }
 0xb0c   :  { %779 = vrot.lane.b32.xlu0 %v777_v40, %s5701_s23 }
 0xb10   :  { %890 = vrot.lane.b32.xlu0 %v888_v41, %s5707_s8 }
 0xb1a   :  { %v993_v42 = vpop.permute.xlu0 %992 }
 0xb1b   :  { %4743 = vmatmul.mubr.msk.f32.vlgmr.msra.gmra.mrb[10].mxu0 %vm179_vm2, %v993_v42 }
 0xb1c   :  { %5123 = vmatpush3.bf16.msra.mxu0 %v5785_v31  ;;  %4751 = vmatprep.mubr.msk.f32.mxu0 %vm5703_vm1, %v5704_v9 }
 0xb1d   :  { %4749 = vmatprep.subr.mxu0 %v5704_v9 }
 0xb20   :  { %4750 = vmatpush3.msra.mxu0 %v5792_v33 }
 0xb21   :  { %5130 = vmatprep.subr.bf16.mxu0 %v5702_v8 }
 0xb7e   :  { %v780_v44 = vpop.permute.xlu0 %779 }
 0xb7f   :  { %v782_v45 = vadd.f32 %v780_v44, %v772_v43 }
 0xb81   :  { %5356 = vtanh.f32 %v782_v45 }
 0xb82   :  { %v891_v55 = vpop.permute.xlu0 %890 }
 0xb8b   :  { %v5357_v46 = vpop.eup %5356 }
 0xb8c   :  { %785 = vrot.lane.b32.xlu1 %v5357_v46, %s5701_s23 }
 0xbee   :  { %v1062_v48 = vpop.f32.mrb[10].mxu0 }
 0xbef   :  { %v1063_v49 = vadd.f32 %v1062_v48, %v161_v47  ;;  %v4744_v50 = vpop.f32.mrb[11].mxu0 }
 0xbf1   :  { %5358 = vtanh.f32 %v1063_v49  ;;  %v4394_v32 = vmul.f32 -1.442695, %v1063_v49 }
 0xbf3   :  { %5360 = vpow2.f32 %v4394_v32 }
 0xbfb   :  { %v5359_v51 = vpop.eup %5358 }
 0xbfc   :  { %1075 = vrot.lane.b32.xlu1 %v5359_v51, %s5705_s6 }
 0xbfd   :  { %v5361_v57 = vpop.eup %5360 }
 0xbfe   :  { %v786_v52 = vpop.permute.xlu1 %785  ;;  %v1069_v58 = vadd.f32 1.0, %v5361_v57 }
 0xbff   :  { %v788_v53 = vmul.f32 %v5355_v38, %v786_v52 }
 0xc00   :  { %5362 = vrcp.f32 %v1069_v58 }
 0xc01   :  { %v893_v56 = vsel %vm179_vm2, %v891_v55, %v788_v53 }
 0xc02   :  { %4736 = vmatmul.mubr.msk.f32.vlgmr.msra.gmra.mrb[12].mxu1 %vm287_vm3, %v893_v56 }
 0xc03   :  { %5126 = vmatpush3.bf16.msra.mxu1 %v5763_v7  ;;  %4758 = vmatprep.mubr.msk.f32.mxu1 %vm5703_vm1, %v5704_v9 }
 0xc04   :  { %5127 = vmatprep.subr.bf16.mxu1 %v5702_v8 }
 0xc0a   :  { %v5363_v59 = vpop.eup %5362 }
 0xc0b   :  { %v1073_v0 = vmul.f32 %v5363_v59, %v5898_v23 }
 0xc6e   :  { %v1076_v60 = vpop.permute.xlu1 %1075 }
 0xc6f   :  { %v1078_v61 = vmul.f32 %v5363_v59, %v1076_v60 }
 0xc71   :  { %1080 = vrot.lane.b32.xlu0 %v1078_v61, %s5706_s7 }
 0xcd5   :  { %v963_v62 = vpop.f32.mrb[12].mxu1 }
 0xcd6   :  { %v4737_v63 = vpop.f32.mrb[13].mxu1  ;;  %v964_v3 = vadd.f32 %v5814_v54, %v963_v62 }
 0xcd8   :  { %v4392_v6 = vmul.f32 -1.442695, %v964_v3 }
 0xce3   :  { %v1081_v1 = vpop.permute.xlu0 %1080 }
 0xce4   :  { %v5927_v2 = vadd.f32 %v1081_v1, %v1073_v0 }
 0xce6   :  { %5364 = vtanh.f32 %v5927_v2 }
 0xce7   :  { %5366 = vtanh.f32 %v964_v3 }
 0xce8   :  { %5368 = vpow2.f32 %v4392_v6  ;;  %v171_v6 = vadd.f32 %v5776_v10, %v5780_v13 }
 0xcf0   :  { %v5365_v4 = vpop.eup %5364 }
 0xcf1   :  { %1086 = vrot.lane.b32.xlu1 %v5365_v4, %s5706_s7  ;;  %v5367_v5 = vpop.eup %5366 }
 0xcf2   :  { %v5369_v12 = vpop.eup %5368 }
 0xcf3   :  { %v970_v14 = vadd.f32 1.0, %v5369_v12 }
 0xcf5   :  { %976 = vrot.lane.b32.xlu1 %v5367_v5, %s5708_s13  ;;  %5370 = vrcp.f32 %v970_v14 }
 0xcff   :  { %v5371_v17 = vpop.eup %5370 }
 0xd00   :  { %v974_v22 = vmul.f32 %v5371_v17, %v782_v45 }
 0xd63   :  { %v1087_v15 = vpop.permute.xlu1 %1086 }
 0xd64   :  { %v1089_v16 = vmul.f32 %v5363_v59, %v1087_v15 }
 0xd66   :  { %1194 = vrot.lane.b32.xlu0 %v1089_v16, %s5707_s8  ;;  %v1090_v20 = vmax.f32 %v1089_v16, 0.0 }
 0xd67   :  { %v977_v18 = vpop.permute.xlu1 %976 }
 0xd68   :  { %v979_v19 = vmul.f32 %v5371_v17, %v977_v18 }
 0xd6a   :  { %981 = vrot.lane.b32.xlu0 %v979_v19, %s5701_s23 }
 0xd6e   :  { %1092 = vrot.lane.b32.xlu0 %v1090_v20, %s5707_s8 }
 0xdd8   :  { %v1195_v21 = vpop.permute.xlu0 %1194 }
 0xdd9   :  { %4759 = vmatmul.mubr.msk.f32.vlgmr.msra.gmra.mrb[14].mxu1 %vm179_vm2, %v1195_v21 }
 0xdda   :  { %5129 = vmatpush3.bf16.msra.mxu1 %v5785_v31  ;;  %4767 = vmatprep.mubr.msk.f32.mxu1 %vm5703_vm1, %v5704_v9 }
 0xddb   :  { %4765 = vmatprep.subr.mxu1 %v5704_v9 }
 0xddc   :  { %v982_v23 = vpop.permute.xlu0 %981 }
 0xddd   :  { %v984_v24 = vadd.f32 %v982_v23, %v974_v22 }
 0xdde   :  { %4766 = vmatpush3.msra.mxu1 %v5792_v33 }
 0xddf   :  { %5372 = vtanh.f32 %v984_v24  ;;  %5136 = vmatprep.subr.bf16.mxu1 %v5702_v8 }
 0xde0   :  { %v1093_v28 = vpop.permute.xlu0 %1092 }
 0xde9   :  { %v5373_v25 = vpop.eup %5372 }
 0xdea   :  { %987 = vrot.lane.b32.xlu1 %v5373_v25, %s5701_s23 }
 0xe5c   :  { %v988_v26 = vpop.permute.xlu1 %987 }
 0xe5d   :  { %v990_v27 = vmul.f32 %v5371_v17, %v988_v26 }
 0xe5f   :  { %v1095_v29 = vsel %vm179_vm2, %v1093_v28, %v990_v27 }
 0xe60   :  { %4752 = vmatmul.mubr.msk.f32.vlgmr.msra.gmra.mrb[12].mxu0 %vm287_vm3, %v1095_v29 }
 0xe61   :  { %5132 = vmatpush3.bf16.msra.mxu0 %v5763_v7  ;;  %4774 = vmatprep.mubr.msk.f32.mxu0 %vm5703_vm1, %v5704_v9 }
 0xe62   :  { %5133 = vmatprep.subr.bf16.mxu0 %v5702_v8 }
 0xeac   :  { %v1264_v35 = vpop.f32.mrb[14].mxu1 }
 0xead   :  { %v1265_v36 = vadd.f32 %v1264_v35, %v166_v34  ;;  %v4760_v37 = vpop.f32.mrb[15].mxu1 }
 0xeaf   :  { %5374 = vtanh.f32 %v1265_v36  ;;  %v4398_v39 = vmul.f32 -1.442695, %v1265_v36 }
 0xeb1   :  { %5376 = vpow2.f32 %v4398_v39 }
 0xeb9   :  { %v5375_v38 = vpop.eup %5374 }
 0xeba   :  { %1277 = vrot.lane.b32.xlu1 %v5375_v38, %s5705_s6 }
 0xebb   :  { %v5377_v40 = vpop.eup %5376 }
 0xebc   :  { %v1271_v41 = vadd.f32 1.0, %v5377_v40 }
 0xebe   :  { %5378 = vrcp.f32 %v1271_v41 }
 0xec8   :  { %v5379_v42 = vpop.eup %5378 }
 0xec9   :  { %v1275_v49 = vmul.f32 %v5379_v42, %v5927_v2 }
 0xf2c   :  { %v1278_v43 = vpop.permute.xlu1 %1277 }
 0xf2d   :  { %v1280_v44 = vmul.f32 %v5379_v42, %v1278_v43 }
 0xf2f   :  { %1282 = vrot.lane.b32.xlu0 %v1280_v44, %s5706_s7 }
 0xf33   :  { %v1165_v45 = vpop.f32.mrb[12].mxu0 }
 0xf34   :  { %v1166_v30 = vadd.f32 %v5814_v54, %v1165_v45  ;;  %v4753_v46 = vpop.f32.mrb[13].mxu0 }
 0xf36   :  { %5380 = vtanh.f32 %v1166_v30  ;;  %v4396_v48 = vmul.f32 -1.442695, %v1166_v30 }
 0xf38   :  { %5382 = vpow2.f32 %v4396_v48 }
 0xf40   :  { %v5381_v47 = vpop.eup %5380 }
 0xf41   :  { %1178 = vrot.lane.b32.xlu0 %v5381_v47, %s5708_s13 }
 0xf42   :  { %v5383_v51 = vpop.eup %5382 }
 0xf43   :  { %v1172_v53 = vadd.f32 1.0, %v5383_v51 }
 0xfa1   :  { %v1283_v50 = vpop.permute.xlu0 %1282 }
 0xfa2   :  { %v5957_v52 = vadd.f32 %v1283_v50, %v1275_v49 }
 0xfa4   :  { %5384 = vtanh.f32 %v5957_v52 }
 0xfa5   :  { %5386 = vrcp.f32 %v1172_v53 }
 0xfae   :  { %v5385_v55 = vpop.eup %5384 }
 0xfaf   :  { %1288 = vrot.lane.b32.xlu1 %v5385_v55, %s5706_s7  ;;  %v5387_v56 = vpop.eup %5386 }
 0xfb0   :  { %v1176_v61 = vmul.f32 %v5387_v56, %v984_v24 }
 0xfb3   :  { %v1179_v32 = vpop.permute.xlu0 %1178 }
 0xfb4   :  { %v1181_v57 = vmul.f32 %v5387_v56, %v1179_v32 }
 0xfb6   :  { %1183 = vrot.lane.b32.xlu0 %v1181_v57, %s5701_s23 }
0x1021   :  { %v1289_v58 = vpop.permute.xlu1 %1288 }
0x1022   :  { %v1291_v59 = vmul.f32 %v5379_v42, %v1289_v58 }
0x1024   :  { %v1292_v60 = vmax.f32 %v1291_v59, 0.0  ;;  %1396 = vrot.lane.b32.xlu1 %v1291_v59, %s5707_s8 }
0x1026   :  { %1294 = vrot.lane.b32.xlu0 %v1292_v60, %s5707_s8 }
0x1028   :  { %v1184_v62 = vpop.permute.xlu0 %1183 }
0x1029   :  { %v1186_v63 = vadd.f32 %v1184_v62, %v1176_v61 }
0x102b   :  { %5388 = vtanh.f32 %v1186_v63 }
0x1035   :  { %v5389_v0 = vpop.eup %5388 }
0x1036   :  { %1189 = vrot.lane.b32.xlu1 %v5389_v0, %s5701_s23 }
0x1096   :  { %v1397_v1 = vpop.permute.xlu1 %1396 }
0x1097   :  { %4775 = vmatmul.mubr.msk.f32.vlgmr.msra.gmra.mrb[14].mxu0 %vm179_vm2, %v1397_v1 }
0x1098   :  { %5135 = vmatpush3.bf16.msra.mxu0 %v5785_v31  ;;  %4783 = vmatprep.mubr.msk.f32.mxu0 %vm5703_vm1, %v5704_v9  ;;  %v1295_v4 = vpop.permute.xlu0 %1294 }
0x1099   :  { %4781 = vmatprep.subr.mxu0 %v5704_v9 }
0x109c   :  { %4782 = vmatpush3.msra.mxu0 %v5792_v33 }
0x109d   :  { %4802 = vmatprep.subr.mxu0 %v5704_v9 }
0x10a8   :  { %v1190_v2 = vpop.permute.xlu1 %1189 }
0x10a9   :  { %v1192_v3 = vmul.f32 %v5387_v56, %v1190_v2 }
0x10ab   :  { %v1297_v5 = vsel %vm179_vm2, %v1295_v4, %v1192_v3 }
0x10ac   :  { %4768 = vmatmul.mubr.msk.f32.vlgmr.msra.gmra.mrb[16].mxu1 %vm287_vm3, %v1297_v5 }
0x10ad   :  { %5138 = vmatpush3.bf16.msra.mxu1 %v5763_v7  ;;  %4790 = vmatprep.mubr.msk.f32.mxu1 %vm5703_vm1, %v5704_v9 }
0x10ae   :  { %5139 = vmatprep.subr.bf16.mxu1 %v5702_v8 }
0x116a   :  { %v1466_v12 = vpop.f32.mrb[14].mxu0 }
0x116b   :  { %v1467_v14 = vadd.f32 %v1466_v12, %v171_v6  ;;  %v4776_v15 = vpop.f32.mrb[15].mxu0 }
0x116d   :  { %5390 = vtanh.f32 %v1467_v14  ;;  %v4402_v20 = vmul.f32 -1.442695, %v1467_v14 }
0x1177   :  { %v5391_v16 = vpop.eup %5390 }
0x1178   :  { %1479 = vrot.lane.b32.xlu1 %v5391_v16, %s5705_s6 }
0x117f   :  { %v1367_v17 = vpop.f32.mrb[16].mxu1 }
0x1180   :  { %v1368_v18 = vadd.f32 %v5814_v54, %v1367_v17  ;;  %v4769_v19 = vpop.f32.mrb[17].mxu1 }
0x1182   :  { %5392 = vtanh.f32 %v1368_v18  ;;  %v4400_v13 = vmul.f32 -1.442695, %v1368_v18 }
0x1183   :  { %5394 = vpow2.f32 %v4402_v20 }
0x118c   :  { %v5393_v7 = vpop.eup %5392 }
0x118d   :  { %1380 = vrot.lane.b32.xlu1 %v5393_v7, %s5708_s13  ;;  %v5395_v21 = vpop.eup %5394 }
0x118e   :  { %v1473_v22 = vadd.f32 1.0, %v5395_v21 }
0x1190   :  { %5396 = vrcp.f32 %v1473_v22 }
0x1191   :  { %5398 = vpow2.f32 %v4400_v13 }
0x119a   :  { %v5397_v23 = vpop.eup %5396 }
0x119b   :  { %v5399_v26 = vpop.eup %5398  ;;  %v1477_v35 = vmul.f32 %v5397_v23, %v5957_v52 }
0x119c   :  { %v1374_v27 = vadd.f32 1.0, %v5399_v26 }
0x119e   :  { %5400 = vrcp.f32 %v1374_v27 }
0x11a8   :  { %v5401_v28 = vpop.eup %5400 }
0x11a9   :  { %v1378_v39 = vmul.f32 %v5401_v28, %v1186_v63 }
0x11ea   :  { %v1480_v24 = vpop.permute.xlu1 %1479 }
0x11eb   :  { %v1482_v25 = vmul.f32 %v5397_v23, %v1480_v24 }
0x11ed   :  { %1484 = vrot.lane.b32.xlu0 %v1482_v25, %s5706_s7 }
0x11ff   :  { %v1381_v29 = vpop.permute.xlu1 %1380 }
0x1200   :  { %v1383_v34 = vmul.f32 %v5401_v28, %v1381_v29 }
0x1202   :  { %1385 = vrot.lane.b32.xlu1 %v1383_v34, %s5701_s23 }
0x125f   :  { %v1485_v36 = vpop.permute.xlu0 %1484 }
0x1260   :  { %v1487_v37 = vadd.f32 %v1485_v36, %v1477_v35 }
0x1262   :  { %5402 = vtanh.f32 %v1487_v37 }
0x126c   :  { %v5403_v38 = vpop.eup %5402 }
0x126d   :  { %1490 = vrot.lane.b32.xlu0 %v5403_v38, %s5706_s7 }
0x1274   :  { %v1386_v40 = vpop.permute.xlu1 %1385 }
0x1275   :  { %v1388_v41 = vadd.f32 %v1386_v40, %v1378_v39 }
0x1277   :  { %5404 = vtanh.f32 %v1388_v41 }
0x1281   :  { %v5405_v42 = vpop.eup %5404 }
0x1282   :  { %1391 = vrot.lane.b32.xlu1 %v5405_v42, %s5701_s23 }
0x12df   :  { %v1491_v43 = vpop.permute.xlu0 %1490 }
0x12e0   :  { %v1493_v44 = vmul.f32 %v5397_v23, %v1491_v43  ;;  %v4409_v43 = vld [vmem:[#allocation2 + $0x48] ss:$0 sm:$0xff] }
0x12e2   :  { %1598 = vrot.lane.b32.xlu0 %v1493_v44, %s5707_s8  ;;  %v1494_v45 = vmax.f32 %v1493_v44, 0.0 }
0x12e6   :  { %1496 = vrot.lane.b32.xlu0 %v1494_v45, %s5707_s8 }
0x12f4   :  { %v1392_v30 = vpop.permute.xlu1 %1391 }
0x12f5   :  { %v1394_v47 = vmul.f32 %v5401_v28, %v1392_v30 }
0x1354   :  { %v1599_v46 = vpop.permute.xlu0 %1598 }
0x1355   :  { %4791 = vmatmul.mubr.msk.f32.vlgmr.msra.gmra.mrb[18].mxu1 %vm179_vm2, %v1599_v46 }
0x1356   :  { %5141 = vmatpush3.bf16.msra.mxu1 %v5785_v31  ;;  %4799 = vmatprep.mubr.msk.f32.mxu1 %vm5703_vm1, %v5704_v9  ;;  %v176_v31 = vadd.f32 %v5778_v11, %v5776_v10 }
0x1357   :  { %4797 = vmatprep.subr.mxu1 %v5704_v9 }
0x1358   :  { %v1497_v48 = vpop.permute.xlu0 %1496 }
0x1359   :  { %v1499_v49 = vsel %vm179_vm2, %v1497_v48, %v1394_v47 }
0x135a   :  { %4784 = vmatmul.mubr.msk.f32.vlgmr.msra.gmra.mrb[16].mxu0 %vm287_vm3, %v1499_v49  ;;  %4798 = vmatpush3.msra.mxu1 %v5792_v33 }
0x135b   :  { %4804 = vmatprep.mubr.msk.f32.mxu0 %vm5703_vm1, %v5704_v9  ;;  %5148 = vmatprep.subr.bf16.mxu1 %v5702_v8 }
0x1428   :  { %v1668_v50 = vpop.f32.mrb[18].mxu1 }
0x1429   :  { %v1669_v51 = vadd.f32 %v1668_v50, %v176_v31  ;;  %v4792_v52 = vpop.f32.mrb[19].mxu1 }
0x142b   :  { %5406 = vtanh.f32 %v1669_v51  ;;  %v4406_v57 = vmul.f32 -1.442695, %v1669_v51 }
0x142d   :  { %v1569_v53 = vpop.f32.mrb[16].mxu0 }
0x142e   :  { %v1570_v55 = vadd.f32 %v5814_v54, %v1569_v53  ;;  %v4785_v56 = vpop.f32.mrb[17].mxu0 }
0x142f   :  { %v1810_v56 = vld [vmem:[#allocation2 + $0x70] sm:$0xff] }
0x1430   :  { %5408 = vtanh.f32 %v1570_v55  ;;  %v4404_v58 = vmul.f32 -1.442695, %v1570_v55 }
0x1431   :  { %5410 = vpow2.f32 %v4406_v57 }
0x1432   :  { %5412 = vpow2.f32 %v4404_v58  ;;  %v1813_v58 = vld [vmem:[#allocation2 + $0x88] sm:$0xff] }
0x1435   :  { %v5407_v32 = vpop.eup %5406 }
0x1436   :  { %1681 = vrot.lane.b32.xlu1 %v5407_v32, %s5705_s6  ;;  %v1811_v32 = vld [vmem:[#allocation2 + $0x78] sm:$0xff] }
0x1437   :  { %v6030_v57 = vpack.c.bf16 %v1811_v32, %v1810_v56 }
0x143a   :  { %v5409_v33 = vpop.eup %5408 }
0x143b   :  { %1582 = vrot.lane.b32.xlu0 %v5409_v33, %s5708_s13  ;;  %v5411_v10 = vpop.eup %5410  ;;  %v1812_v33 = vld [vmem:[#allocation2 + $0x80] sm:$0xff] }
0x143c   :  { %v1675_v11 = vadd.f32 1.0, %v5411_v10  ;;  %v5413_v59 = vpop.eup %5412  ;;  %v6033_v10 = vpack.c.bf16 %v1813_v58, %v1812_v33  ;;  %v6119_v33 = vld [vmem:[#allocation2 + $0x68] ss:$0 sm:$0xff] }
0x143d   :  { %v1576_v60 = vadd.f32 1.0, %v5413_v59  ;;  %v6039_v59 = vld [vmem:[#allocation2 + $0x90] sm:$0xff] }
0x143e   :  { %5414 = vrcp.f32 %v1675_v11 }
0x143f   :  { %5416 = vrcp.f32 %v1576_v60 }
0x1448   :  { %v5415_v61 = vpop.eup %5414 }
0x1449   :  { %v5417_v0 = vpop.eup %5416  ;;  %v1679_v3 = vmul.f32 %v5415_v61, %v1487_v37 }
0x144a   :  { %v1580_v6 = vmul.f32 %v5417_v0, %v1388_v41 }
0x14a8   :  { %v1682_v62 = vpop.permute.xlu1 %1681 }
0x14a9   :  { %v1684_v63 = vmul.f32 %v5415_v61, %v1682_v62 }
0x14ab   :  { %1686 = vrot.lane.b32.xlu1 %v1684_v63, %s5706_s7 }
0x14ad   :  { %v1583_v1 = vpop.permute.xlu0 %1582 }
0x14ae   :  { %v1585_v2 = vmul.f32 %v5417_v0, %v1583_v1 }
0x14b0   :  { %1587 = vrot.lane.b32.xlu0 %v1585_v2, %s5701_s23 }
0x151d   :  { %v1687_v4 = vpop.permute.xlu1 %1686 }
0x151e   :  { %v1689_v5 = vadd.f32 %v1687_v4, %v1679_v3 }
0x1520   :  { %5418 = vtanh.f32 %v1689_v5 }
0x1522   :  { %v1588_v12 = vpop.permute.xlu0 %1587 }
0x1523   :  { %v1590_v14 = vadd.f32 %v1588_v12, %v1580_v6 }
0x1525   :  { %5420 = vtanh.f32 %v1590_v14 }
0x152a   :  { %v5419_v15 = vpop.eup %5418 }
0x152b   :  { %1692 = vrot.lane.b32.xlu1 %v5419_v15, %s5706_s7 }
0x152f   :  { %v5421_v16 = vpop.eup %5420 }
0x1530   :  { %1593 = vrot.lane.b32.xlu0 %v5421_v16, %s5701_s23 }
0x159d   :  { %v1693_v17 = vpop.permute.xlu1 %1692 }
0x159e   :  { %v1695_v18 = vmul.f32 %v5415_v61, %v1693_v17 }
0x15a0   :  { %v1696_v19 = vmax.f32 %v1695_v18, 0.0 }
0x15a2   :  { %1698 = vrot.lane.b32.xlu1 %v1696_v19, %s5707_s8  ;;  %v1594_v7 = vpop.permute.xlu0 %1593 }
0x15a3   :  { %v1596_v20 = vmul.f32 %v5417_v0, %v1594_v7  ;;  %v6051_v0 = vld [vmem:[#allocation2 + $0x98] ss:$0 sm:$0xff]  ;;  %v1816_v7 = vld [vmem:[#allocation2 + $0xa0] sm:$0xff] }
0x1614   :  { %v1699_v21 = vpop.permute.xlu1 %1698 }
0x1615   :  { %v1701_v22 = vsel %vm179_vm2, %v1699_v21, %v1596_v20  ;;  %v1817_v20 = vld [vmem:[#allocation2 + $0xa8] sm:$0xff]  ;;  %v1818_v21 = vld [vmem:[#allocation2 + $0xb0] sm:$0xff] }
0x1616   :  { %4800 = vmatmul.mubr.msk.f32.vlgmr.msra.gmra.mrb[20].mxu1 %vm287_vm3, %v1701_v22  ;;  %v6059_v22 = vpack.c.bf16 %v1817_v20, %v1816_v7 }
0x1617   :  { %4832 = vmatprep.mubr.msk.f32.mxu1 %vm5703_vm1, %v5704_v9 }
0x1618   :  { %5150 = vmatpush3.bf16.msra.mxu1 %v6059_v22 }
0x1619   :  { %5151 = vmatprep.subr.bf16.mxu1 %v5702_v8 }
0x16e9   :  { %v1771_v13 = vpop.f32.mrb[20].mxu1 }
0x16ea   :  { %v1772_v23 = vadd.f32 %v5814_v54, %v1771_v13  ;;  %v4801_v24 = vpop.f32.mrb[21].mxu1  ;;  %v1804_v54 = vld [vmem:[#allocation2 + $0x40] sm:$0xff]  ;;  %v1819_v13 = vld [vmem:[#allocation2 + $0xb8] sm:$0xff] }
0x16eb   :  { %4803 = vmatpush3.msra.mxu0 %v1804_v54  ;;  %v1820_v24 = vld [vmem:[#allocation2 + $0xc0] sm:$0xff] }
0x16ec   :  { %5422 = vtanh.f32 %v1772_v23  ;;  %v4408_v26 = vmul.f32 -1.442695, %v1772_v23  ;;  %5142 = vmatprep.subr.bf16.mxu0 %v5702_v8  ;;  %v6062_v23 = vpack.c.bf16 %v1819_v13, %v1818_v21 }
0x16ee   :  { %5424 = vpow2.f32 %v4408_v26  ;;  %5153 = vmatpush3.bf16.msra.mxu1 %v6062_v23 }
0x16ef   :  { %5154 = vmatprep.subr.bf16.mxu1 %v5702_v8 }
0x16f6   :  { %v5423_v25 = vpop.eup %5422 }
0x16f7   :  { %1784 = vrot.lane.b32.xlu0 %v5423_v25, %s5708_s13  ;;  %v1821_v25 = vld [vmem:[#allocation2 + $0xc8] sm:$0xff] }
0x16f8   :  { %v5425_v27 = vpop.eup %5424  ;;  %v6066_v26 = vpack.c.bf16 %v1821_v25, %v1820_v24 }
0x16f9   :  { %v1778_v28 = vadd.f32 1.0, %v5425_v27 }
0x16fa   :  { %5156 = vmatpush3.bf16.msra.mxu1 %v6066_v26 }
0x16fb   :  { %5426 = vrcp.f32 %v1778_v28  ;;  %5160 = vmatprep.subr.bf16.mxu1 %v5702_v8 }
0x1705   :  { %v5427_v29 = vpop.eup %5426 }
0x1706   :  { %v1782_v36 = vmul.f32 %v5427_v29, %v1590_v14 }
0x1769   :  { %v1785_v34 = vpop.permute.xlu0 %1784 }
0x176a   :  { %v1787_v35 = vmul.f32 %v5427_v29, %v1785_v34 }
0x176c   :  { %1789 = vrot.lane.b32.xlu1 %v1787_v35, %s5701_s23 }
0x17de   :  { %v1790_v37 = vpop.permute.xlu1 %1789 }
0x17df   :  { %v1792_v38 = vadd.f32 %v1790_v37, %v1782_v36  ;;  %v6086_v36 = vld [vmem:[#allocation2 + $0xd0] ss:$0 sm:$0xff] }
0x17e1   :  { %5428 = vtanh.f32 %v1792_v38 }
0x17eb   :  { %v5429_v39 = vpop.eup %5428 }
0x17ec   :  { %1795 = vrot.lane.b32.xlu0 %v5429_v39, %s5701_s23 }
0x185e   :  { %v1796_v40 = vpop.permute.xlu0 %1795 }
0x185f   :  { %v1798_v41 = vmul.f32 %v5427_v29, %v1796_v40 }
0x1861   :  { %1800 = vrot.lane.b32.xlu1 %v1798_v41, %s5709_s0 }
0x18d3   :  { %v1801_v42 = vpop.permute.xlu1 %1800 }
0x18d4   :  { %1803 = vst.msk [vmem:[#allocation6] sm:$0xff] %vm49_vm0, %v1801_v42  ;;  %4805 = vmatmul.mubr.msk.f32.vlgmr.msra.gmra.mrb[18].mxu0 %vm49_vm0, %v1801_v42 }
0x18d5   :  { %4817 = vmatprep.mubr.msk.f32.mxu0 %vm5703_vm1, %v5704_v9  ;;  %5144 = vmatpush3.bf16.msra.mxu0 %v6030_v57 }
0x18d6   :  { %5145 = vmatprep.subr.bf16.mxu0 %v5702_v8 }
0x18d9   :  { %5147 = vmatpush3.bf16.msra.mxu0 %v6033_v10 }
0x18da   :  { %4815 = vmatprep.subr.mxu0 %v5704_v9 }
0x18dd   :  { %4816 = vmatpush3.msra.mxu0 %v6039_v59 }
0x18de   :  { %5157 = vmatprep.subr.bf16.mxu0 %v5702_v8 }
0x19a7   :  { %v1895_v44 = vpop.f32.mrb[18].mxu0 }
0x19a8   :  { %v1896_v45 = vadd.f32 %v4409_v43, %v1895_v44  ;;  %v4806_v30 = vpop.f32.mrb[19].mxu0 }
0x19aa   :  { %5430 = vtanh.f32 %v1896_v45  ;;  %v4411_v47 = vmul.f32 -1.442695, %v1896_v45 }
0x19ac   :  { %5432 = vpow2.f32 %v4411_v47 }
0x19b4   :  { %v5431_v46 = vpop.eup %5430 }
0x19b5   :  { %1908 = vrot.lane.b32.xlu0 %v5431_v46, %s5708_s13 }
0x19b6   :  { %v5433_v48 = vpop.eup %5432 }
0x19b7   :  { %v1902_v49 = vadd.f32 1.0, %v5433_v48  ;;  %v1806_v48 = vld [vmem:[#allocation2 + $0x50] sm:$0xff] }
0x19b9   :  { %5434 = vrcp.f32 %v1902_v49  ;;  %v1807_v49 = vld [vmem:[#allocation2 + $0x58] sm:$0xff] }
0x19c3   :  { %v5435_v31 = vpop.eup %5434 }
0x19c4   :  { %v1906_v52 = vmul.f32 %v5435_v31, %v1792_v38 }
0x1a27   :  { %v1909_v50 = vpop.permute.xlu0 %1908 }
0x1a28   :  { %v1911_v51 = vmul.f32 %v5435_v31, %v1909_v50 }
0x1a2a   :  { %1913 = vrot.lane.b32.xlu1 %v1911_v51, %s5701_s23  ;;  %v6099_v51 = vld [vmem:[#allocation2 + $0x60] sm:$0xff] }
0x1a9c   :  { %v1914_v53 = vpop.permute.xlu1 %1913 }
0x1a9d   :  { %v6027_v55 = vadd.f32 %v1914_v53, %v1906_v52 }
0x1a9f   :  { %5436 = vtanh.f32 %v6027_v55 }
0x1aa9   :  { %v5437_v11 = vpop.eup %5436 }
0x1aaa   :  { %1919 = vrot.lane.b32.xlu0 %v5437_v11, %s5701_s23 }
0x1b1c   :  { %v1920_v60 = vpop.permute.xlu0 %1919 }
0x1b1d   :  { %v6043_v61 = vmul.f32 %v5435_v31, %v1920_v60  ;;  %v6094_v31 = vpack.c.bf16 %v1807_v49, %v1806_v48 }
0x1b1f   :  { %1924 = vrot.lane.b32.xlu1 %v6043_v61, %s5709_s0 }
0x1b91   :  { %v1925_v62 = vpop.permute.xlu1 %1924 }
0x1b92   :  { %v1927_v63 = vsel %vm49_vm0, %v1925_v62, 0.0 }
0x1b93   :  { %4818 = vmatmul.mubr.msk.f32.vlgmr.msra.gmra.mrb[20].mxu0 %vm1932_vm4, %v1927_v63 }
0x1b94   :  { %4841 = vmatprep.mubr.msk.f32.mxu0 %vm5703_vm1, %v5704_v9  ;;  %5159 = vmatpush3.bf16.msra.mxu0 %v6094_v31 }
0x1b95   :  { %4839 = vmatprep.subr.mxu0 %v5704_v9 }
0x1b98   :  { %4840 = vmatpush3.msra.mxu0 %v6099_v51 }
0x1b99   :  { %5166 = vmatprep.subr.bf16.mxu0 %v5702_v8 }
0x1c66   :  { %v2002_v1 = vpop.f32.mrb[20].mxu0 }
0x1c67   :  { %v2003_v2 = vadd.f32 %v6051_v0, %v2002_v1  ;;  %v4819_v3 = vpop.f32.mrb[21].mxu0 }
0x1c69   :  { %5438 = vtanh.f32 %v2003_v2  ;;  %v4414_v5 = vmul.f32 -1.442695, %v2003_v2 }
0x1c6b   :  { %5440 = vpow2.f32 %v4414_v5 }
0x1c73   :  { %v5439_v4 = vpop.eup %5438 }
0x1c74   :  { %2015 = vrot.lane.b32.xlu0 %v5439_v4, %s5710_s18 }
0x1c75   :  { %v5441_v6 = vpop.eup %5440 }
0x1c76   :  { %v2009_v12 = vadd.f32 1.0, %v5441_v6 }
0x1c78   :  { %5442 = vrcp.f32 %v2009_v12 }
0x1c82   :  { %v5443_v14 = vpop.eup %5442 }
0x1c83   :  { %v2013_v17 = vmul.f32 0.0, %v5443_v14 }
0x1ce6   :  { %v2016_v15 = vpop.permute.xlu0 %2015 }
0x1ce7   :  { %v2018_v16 = vmul.f32 %v5443_v14, %v2016_v15 }
0x1ce9   :  { %2020 = vrot.lane.b32.xlu1 %v2018_v16, %s5710_s18 }
0x1d5b   :  { %v2021_v18 = vpop.permute.xlu1 %2020 }
0x1d5c   :  { %v6056_v19 = vadd.f32 %v2021_v18, %v2013_v17 }
0x1d5e   :  { %5444 = vtanh.f32 %v6056_v19 }
0x1d68   :  { %v5445_v27 = vpop.eup %5444 }
0x1d69   :  { %2026 = vrot.lane.b32.xlu0 %v5445_v27, %s5710_s18 }
0x1ddb   :  { %v2027_v28 = vpop.permute.xlu0 %2026 }
0x1ddc   :  { %v6072_v29 = vmul.f32 %v5443_v14, %v2027_v28 }
0x1dde   :  { %2031 = vrot.lane.b32.xlu1 %v6072_v29, %s5711_s19 }
0x1e50   :  { %v2032_v34 = vpop.permute.xlu1 %2031 }
0x1e51   :  { %v2035_v35 = vsel %vm2034_vm5, %v2032_v34, 0.0 }
0x1e52   :  { %4833 = vmatmul.mubr.msk.f32.vlgmr.msra.gmra.mrb[22].mxu1 %vm2040_vm6, %v2035_v35 }
0x1e53   :  { %5162 = vmatpush3.bf16.msra.mxu1 %v6030_v57  ;;  %4854 = vmatprep.mubr.msk.f32.mxu1 %vm5703_vm1, %v5704_v9 }
0x1e54   :  { %5163 = vmatprep.subr.bf16.mxu1 %v5702_v8 }
0x1e57   :  { %5165 = vmatpush3.bf16.msra.mxu1 %v6033_v10 }
0x1e58   :  { %4852 = vmatprep.subr.mxu1 %v5704_v9 }
0x1e5b   :  { %4853 = vmatpush3.msra.mxu1 %v6039_v59 }
0x1e5c   :  { %5175 = vmatprep.subr.bf16.mxu1 %v5702_v8 }
0x1f25   :  { %v2110_v37 = vpop.f32.mrb[22].mxu1 }
0x1f26   :  { %v2111_v38 = vadd.f32 %v6086_v36, %v2110_v37  ;;  %v4834_v54 = vpop.f32.mrb[23].mxu1 }
0x1f28   :  { %5446 = vtanh.f32 %v2111_v38  ;;  %v4417_v40 = vmul.f32 -1.442695, %v2111_v38 }
0x1f2a   :  { %5448 = vpow2.f32 %v4417_v40 }
0x1f32   :  { %v5447_v39 = vpop.eup %5446 }
0x1f33   :  { %2123 = vrot.lane.b32.xlu0 %v5447_v39, %s5705_s6 }
0x1f34   :  { %v5449_v41 = vpop.eup %5448 }
0x1f35   :  { %v2117_v42 = vadd.f32 1.0, %v5449_v41 }
0x1f37   :  { %5450 = vrcp.f32 %v2117_v42 }
0x1f41   :  { %v5451_v43 = vpop.eup %5450 }
0x1f42   :  { %v2121_v30 = vmul.f32 0.0, %v5451_v43 }
0x1fa5   :  { %v2124_v44 = vpop.permute.xlu0 %2123 }
0x1fa6   :  { %v2126_v45 = vmul.f32 %v5451_v43, %v2124_v44 }
0x1fa8   :  { %2128 = vrot.lane.b32.xlu1 %v2126_v45, %s5706_s7 }
0x201a   :  { %v2129_v46 = vpop.permute.xlu1 %2128 }
0x201b   :  { %v6091_v47 = vadd.f32 %v2129_v46, %v2121_v30 }
0x201d   :  { %5452 = vtanh.f32 %v6091_v47 }
0x2027   :  { %v5453_v50 = vpop.eup %5452 }
0x2028   :  { %2134 = vrot.lane.b32.xlu0 %v5453_v50, %s5706_s7 }
0x209a   :  { %v2135_v52 = vpop.permute.xlu0 %2134 }
0x209b   :  { %v6103_v53 = vmul.f32 %v5451_v43, %v2135_v52 }
0x209d   :  { %2139 = vrot.lane.b32.xlu1 %v6103_v53, %s5707_s8 }
0x210f   :  { %v2140_v56 = vpop.permute.xlu1 %2139 }
0x2110   :  { %2142 = vst.msk [vmem:[#allocation5] sm:$0xff] %vm179_vm2, %v2140_v56  ;;  %v2143_v32 = vsel %vm179_vm2, %v2140_v56, %v6043_v61 }
0x2111   :  { %4842 = vmatmul.mubr.msk.f32.vlgmr.msra.gmra.mrb[22].mxu0 %vm287_vm3, %v2143_v32 }
0x2112   :  { %5168 = vmatpush3.bf16.msra.mxu0 %v6059_v22  ;;  %4869 = vmatprep.mubr.msk.f32.mxu0 %vm5703_vm1, %v5704_v9 }
0x2113   :  { %5169 = vmatprep.subr.bf16.mxu0 %v5702_v8 }
0x2116   :  { %5171 = vmatpush3.bf16.msra.mxu0 %v6062_v23 }
0x2117   :  { %5172 = vmatprep.subr.bf16.mxu0 %v5702_v8 }
0x211a   :  { %5174 = vmatpush3.bf16.msra.mxu0 %v6066_v26 }
0x211b   :  { %5178 = vmatprep.subr.bf16.mxu0 %v5702_v8 }
0x21e4   :  { %v2217_v58 = vpop.f32.mrb[22].mxu0 }
0x21e5   :  { %v2218_v11 = vadd.f32 %v6119_v33, %v2217_v58  ;;  %v4843_v60 = vpop.f32.mrb[23].mxu0 }
0x21e7   :  { %5454 = vtanh.f32 %v2218_v11  ;;  %v4420_v62 = vmul.f32 -1.442695, %v2218_v11 }
0x21e9   :  { %5456 = vpow2.f32 %v4420_v62 }
0x21f1   :  { %v5455_v61 = vpop.eup %5454 }
0x21f2   :  { %2230 = vrot.lane.b32.xlu0 %v5455_v61, %s5708_s13 }
0x21f3   :  { %v5457_v63 = vpop.eup %5456 }
0x21f4   :  { %v2224_v1 = vadd.f32 1.0, %v5457_v63 }
0x21f6   :  { %5458 = vrcp.f32 %v2224_v1 }
0x2200   :  { %v5459_v2 = vpop.eup %5458 }
0x2201   :  { %v2228_v5 = vmul.f32 %v5459_v2, %v6027_v55 }
0x2264   :  { %v2231_v3 = vpop.permute.xlu0 %2230 }
0x2265   :  { %v2233_v4 = vmul.f32 %v5459_v2, %v2231_v3 }
0x2267   :  { %2235 = vrot.lane.b32.xlu1 %v2233_v4, %s5701_s23 }
0x22d9   :  { %v2236_v6 = vpop.permute.xlu1 %2235 }
0x22da   :  { %v6125_v12 = vadd.f32 %v2236_v6, %v2228_v5 }
0x22dc   :  { %5460 = vtanh.f32 %v6125_v12 }
0x22e6   :  { %v5461_v14 = vpop.eup %5460 }
0x22e7   :  { %2241 = vrot.lane.b32.xlu0 %v5461_v14, %s5701_s23 }
0x22eb   :  { %2249 = vrot.lane.b32.xlu0 %v6072_v29, %s5712_s20 }
0x2359   :  { %v2242_v15 = vpop.permute.xlu0 %2241 }
0x235a   :  { %v6131_v16 = vmul.f32 %v5459_v2, %v2242_v15 }
0x235c   :  { %2246 = vrot.lane.b32.xlu1 %v6131_v16, %s5709_s0 }
0x235d   :  { %v2250_v17 = vpop.permute.xlu0 %2249 }
0x23ce   :  { %v2247_v55 = vpop.permute.xlu1 %2246 }
0x23cf   :  { %v2252_v18 = vsel %vm49_vm0, %v2247_v55, %v2250_v17 }
0x23d0   :  { %4855 = vmatmul.mubr.msk.f32.vlgmr.msra.gmra.mrb[24].mxu1 %vm1932_vm4, %v2252_v18 }
0x23d1   :  { %5177 = vmatpush3.bf16.msra.mxu1 %v6094_v31  ;;  %4878 = vmatprep.mubr.msk.f32.mxu1 %vm5703_vm1, %v5704_v9 }
0x23d2   :  { %4876 = vmatprep.subr.mxu1 %v5704_v9 }
0x23d5   :  { %4877 = vmatpush3.msra.mxu1 %v6099_v51 }
0x23d6   :  { %5184 = vmatprep.subr.bf16.mxu1 %v5702_v8 }
0x24a3   :  { %v2322_v7 = vpop.f32.mrb[24].mxu1 }
0x24a4   :  { %v2323_v20 = vadd.f32 %v6051_v0, %v2322_v7  ;;  %v4856_v21 = vpop.f32.mrb[25].mxu1 }
0x24a6   :  { %5462 = vtanh.f32 %v2323_v20  ;;  %v4422_v24 = vmul.f32 -1.442695, %v2323_v20 }
0x24a8   :  { %5464 = vpow2.f32 %v4422_v24 }
0x24b0   :  { %v5463_v13 = vpop.eup %5462 }
0x24b1   :  { %2335 = vrot.lane.b32.xlu1 %v5463_v13, %s5710_s18 }
0x24b2   :  { %v5465_v25 = vpop.eup %5464 }
0x24b3   :  { %v2329_v27 = vadd.f32 1.0, %v5465_v25 }
0x24b5   :  { %5466 = vrcp.f32 %v2329_v27 }
0x24bf   :  { %v5467_v28 = vpop.eup %5466 }
0x24c0   :  { %v2333_v35 = vmul.f32 %v5467_v28, %v6056_v19 }
0x2523   :  { %v2336_v29 = vpop.permute.xlu1 %2335 }
0x2524   :  { %v2338_v34 = vmul.f32 %v5467_v28, %v2336_v29 }
0x2526   :  { %2340 = vrot.lane.b32.xlu0 %v2338_v34, %s5710_s18 }
0x2598   :  { %v2341_v37 = vpop.permute.xlu0 %2340 }
0x2599   :  { %v6147_v38 = vadd.f32 %v2341_v37, %v2333_v35 }
0x259b   :  { %5468 = vtanh.f32 %v6147_v38 }
0x25a5   :  { %v5469_v54 = vpop.eup %5468 }
0x25a6   :  { %2346 = vrot.lane.b32.xlu1 %v5469_v54, %s5710_s18 }
0x2618   :  { %v2347_v39 = vpop.permute.xlu1 %2346 }
0x2619   :  { %v6151_v40 = vmul.f32 %v5467_v28, %v2347_v39 }
0x261b   :  { %2351 = vrot.lane.b32.xlu0 %v6151_v40, %s5711_s19 }
0x268d   :  { %v2352_v41 = vpop.permute.xlu0 %2351 }
0x268e   :  { %v2354_v42 = vsel %vm2034_vm5, %v2352_v41, %v6103_v53 }
0x268f   :  { %4870 = vmatmul.mubr.msk.f32.vlgmr.msra.gmra.mrb[24].mxu0 %vm2040_vm6, %v2354_v42 }
0x2690   :  { %5180 = vmatpush3.bf16.msra.mxu0 %v6030_v57  ;;  %4891 = vmatprep.mubr.msk.f32.mxu0 %vm5703_vm1, %v5704_v9 }
0x2691   :  { %5181 = vmatprep.subr.bf16.mxu0 %v5702_v8 }
0x2694   :  { %5183 = vmatpush3.bf16.msra.mxu0 %v6033_v10 }
0x2695   :  { %4889 = vmatprep.subr.mxu0 %v5704_v9 }
0x2698   :  { %4890 = vmatpush3.msra.mxu0 %v6039_v59 }
0x2699   :  { %5193 = vmatprep.subr.bf16.mxu0 %v5702_v8 }
0x2762   :  { %v2424_v19 = vpop.f32.mrb[24].mxu0 }
0x2763   :  { %v2425_v43 = vadd.f32 %v6086_v36, %v2424_v19  ;;  %v4871_v44 = vpop.f32.mrb[25].mxu0 }
0x2765   :  { %5470 = vtanh.f32 %v2425_v43  ;;  %v4424_v30 = vmul.f32 -1.442695, %v2425_v43 }
0x2767   :  { %5472 = vpow2.f32 %v4424_v30 }
0x276f   :  { %v5471_v45 = vpop.eup %5470 }
0x2770   :  { %2437 = vrot.lane.b32.xlu1 %v5471_v45, %s5705_s6 }
0x2771   :  { %v5473_v46 = vpop.eup %5472 }
0x2772   :  { %v2431_v48 = vadd.f32 1.0, %v5473_v46 }
0x2774   :  { %5474 = vrcp.f32 %v2431_v48 }
0x277e   :  { %v5475_v49 = vpop.eup %5474 }
0x277f   :  { %v2435_v53 = vmul.f32 %v5475_v49, %v6091_v47 }
0x27e2   :  { %v2438_v50 = vpop.permute.xlu1 %2437 }
0x27e3   :  { %v2440_v52 = vmul.f32 %v5475_v49, %v2438_v50 }
0x27e5   :  { %2442 = vrot.lane.b32.xlu0 %v2440_v52, %s5706_s7 }
0x2857   :  { %v2443_v56 = vpop.permute.xlu0 %2442 }
0x2858   :  { %v6170_v32 = vadd.f32 %v2443_v56, %v2435_v53 }
0x285a   :  { %5476 = vtanh.f32 %v6170_v32 }
0x2864   :  { %v5477_v58 = vpop.eup %5476 }
0x2865   :  { %2448 = vrot.lane.b32.xlu1 %v5477_v58, %s5706_s7 }
0x28d7   :  { %v2449_v11 = vpop.permute.xlu1 %2448 }
0x28d8   :  { %v6174_v60 = vmul.f32 %v5475_v49, %v2449_v11 }
0x28da   :  { %2458 = vrot.lane.b32.xlu0 %v6174_v60, %s5707_s8 }
0x294c   :  { %v2459_v61 = vpop.permute.xlu0 %2458 }
0x294d   :  { %v2461_v62 = vsel %vm179_vm2, %v2459_v61, %v6131_v16 }
0x294e   :  { %4879 = vmatmul.mubr.msk.f32.vlgmr.msra.gmra.mrb[26].mxu1 %vm287_vm3, %v2461_v62 }
0x294f   :  { %5186 = vmatpush3.bf16.msra.mxu1 %v6059_v22  ;;  %4906 = vmatprep.mubr.msk.f32.mxu1 %vm5703_vm1, %v5704_v9 }
0x2950   :  { %5187 = vmatprep.subr.bf16.mxu1 %v5702_v8 }
0x2953   :  { %5189 = vmatpush3.bf16.msra.mxu1 %v6062_v23 }
0x2954   :  { %5190 = vmatprep.subr.bf16.mxu1 %v5702_v8 }
0x2957   :  { %5192 = vmatpush3.bf16.msra.mxu1 %v6066_v26 }
0x2958   :  { %5196 = vmatprep.subr.bf16.mxu1 %v5702_v8 }
0x2a21   :  { %v2531_v47 = vpop.f32.mrb[26].mxu1 }
0x2a22   :  { %v2532_v63 = vadd.f32 %v6119_v33, %v2531_v47  ;;  %v4880_v1 = vpop.f32.mrb[27].mxu1 }
0x2a24   :  { %5478 = vtanh.f32 %v2532_v63  ;;  %v4426_v3 = vmul.f32 -1.442695, %v2532_v63 }
0x2a26   :  { %5480 = vpow2.f32 %v4426_v3 }
0x2a2e   :  { %v5479_v2 = vpop.eup %5478 }
0x2a2f   :  { %2544 = vrot.lane.b32.xlu1 %v5479_v2, %s5708_s13 }
0x2a30   :  { %v5481_v4 = vpop.eup %5480 }
0x2a31   :  { %v2538_v5 = vadd.f32 1.0, %v5481_v4 }
0x2a33   :  { %5482 = vrcp.f32 %v2538_v5 }
0x2a3d   :  { %v5483_v6 = vpop.eup %5482 }
0x2a3e   :  { %v2542_v16 = vmul.f32 %v5483_v6, %v6125_v12 }
0x2aa1   :  { %v2545_v14 = vpop.permute.xlu1 %2544 }
0x2aa2   :  { %v2547_v15 = vmul.f32 %v5483_v6, %v2545_v14 }
0x2aa4   :  { %2549 = vrot.lane.b32.xlu0 %v2547_v15, %s5701_s23 }
0x2b16   :  { %v2550_v17 = vpop.permute.xlu0 %2549 }
0x2b17   :  { %v6193_v55 = vadd.f32 %v2550_v17, %v2542_v16 }
0x2b19   :  { %5484 = vtanh.f32 %v6193_v55 }
0x2b23   :  { %v5485_v18 = vpop.eup %5484 }
0x2b24   :  { %2555 = vrot.lane.b32.xlu1 %v5485_v18, %s5701_s23 }
0x2b28   :  { %2563 = vrot.lane.b32.xlu1 %v6151_v40, %s5712_s20 }
0x2b96   :  { %v2556_v7 = vpop.permute.xlu1 %2555 }
0x2b97   :  { %v6199_v20 = vmul.f32 %v5483_v6, %v2556_v7 }
0x2b99   :  { %2560 = vrot.lane.b32.xlu0 %v6199_v20, %s5709_s0 }
0x2b9a   :  { %v2564_v21 = vpop.permute.xlu1 %2563 }
0x2c0b   :  { %v2561_v13 = vpop.permute.xlu0 %2560 }
0x2c0c   :  { %v2566_v12 = vsel %vm49_vm0, %v2561_v13, %v2564_v21 }
0x2c0d   :  { %4892 = vmatmul.mubr.msk.f32.vlgmr.msra.gmra.mrb[26].mxu0 %vm1932_vm4, %v2566_v12 }
0x2c0e   :  { %5195 = vmatpush3.bf16.msra.mxu0 %v6094_v31  ;;  %4915 = vmatprep.mubr.msk.f32.mxu0 %vm5703_vm1, %v5704_v9 }
0x2c0f   :  { %4913 = vmatprep.subr.mxu0 %v5704_v9 }
0x2c12   :  { %4914 = vmatpush3.msra.mxu0 %v6099_v51 }
0x2c13   :  { %5202 = vmatprep.subr.bf16.mxu0 %v5702_v8 }
0x2ce0   :  { %v2636_v24 = vpop.f32.mrb[26].mxu0 }
0x2ce1   :  { %v2637_v25 = vadd.f32 %v6051_v0, %v2636_v24  ;;  %v4893_v27 = vpop.f32.mrb[27].mxu0 }
0x2ce3   :  { %5486 = vtanh.f32 %v2637_v25  ;;  %v4428_v29 = vmul.f32 -1.442695, %v2637_v25 }
0x2ce5   :  { %5488 = vpow2.f32 %v4428_v29 }
0x2ced   :  { %v5487_v28 = vpop.eup %5486 }
0x2cee   :  { %2649 = vrot.lane.b32.xlu0 %v5487_v28, %s5710_s18 }
0x2cef   :  { %v5489_v34 = vpop.eup %5488 }
0x2cf0   :  { %v2643_v35 = vadd.f32 1.0, %v5489_v34 }
0x2cf2   :  { %5490 = vrcp.f32 %v2643_v35 }
0x2cfc   :  { %v5491_v37 = vpop.eup %5490 }
0x2cfd   :  { %v2647_v40 = vmul.f32 %v5491_v37, %v6147_v38 }
0x2d60   :  { %v2650_v54 = vpop.permute.xlu0 %2649 }
0x2d61   :  { %v2652_v39 = vmul.f32 %v5491_v37, %v2650_v54 }
0x2d63   :  { %2654 = vrot.lane.b32.xlu1 %v2652_v39, %s5710_s18 }
0x2dd5   :  { %v2655_v41 = vpop.permute.xlu1 %2654 }
0x2dd6   :  { %v6215_v42 = vadd.f32 %v2655_v41, %v2647_v40 }
0x2dd8   :  { %5492 = vtanh.f32 %v6215_v42 }
0x2de2   :  { %v5493_v19 = vpop.eup %5492 }
0x2de3   :  { %2660 = vrot.lane.b32.xlu0 %v5493_v19, %s5710_s18 }
0x2e55   :  { %v2661_v43 = vpop.permute.xlu0 %2660 }
0x2e56   :  { %v6219_v44 = vmul.f32 %v5491_v37, %v2661_v43 }
0x2e58   :  { %2665 = vrot.lane.b32.xlu1 %v6219_v44, %s5711_s19 }
0x2eca   :  { %v2666_v45 = vpop.permute.xlu1 %2665 }
0x2ecb   :  { %v2668_v30 = vsel %vm2034_vm5, %v2666_v45, %v6174_v60 }
0x2ecc   :  { %4907 = vmatmul.mubr.msk.f32.vlgmr.msra.gmra.mrb[28].mxu1 %vm2040_vm6, %v2668_v30 }
0x2ecd   :  { %5198 = vmatpush3.bf16.msra.mxu1 %v6030_v57  ;;  %4928 = vmatprep.mubr.msk.f32.mxu1 %vm5703_vm1, %v5704_v9 }
0x2ece   :  { %5199 = vmatprep.subr.bf16.mxu1 %v5702_v8 }
0x2ed1   :  { %5201 = vmatpush3.bf16.msra.mxu1 %v6033_v10 }
0x2ed2   :  { %4926 = vmatprep.subr.mxu1 %v5704_v9 }
0x2ed5   :  { %4927 = vmatpush3.msra.mxu1 %v6039_v59 }
0x2ed6   :  { %5211 = vmatprep.subr.bf16.mxu1 %v5702_v8 }
0x2f9f   :  { %v2738_v38 = vpop.f32.mrb[28].mxu1 }
0x2fa0   :  { %v2739_v46 = vadd.f32 %v6086_v36, %v2738_v38  ;;  %v4908_v48 = vpop.f32.mrb[29].mxu1 }
0x2fa2   :  { %5494 = vtanh.f32 %v2739_v46  ;;  %v4430_v50 = vmul.f32 -1.442695, %v2739_v46 }
0x2fa4   :  { %5496 = vpow2.f32 %v4430_v50 }
0x2fac   :  { %v5495_v49 = vpop.eup %5494 }
0x2fad   :  { %2751 = vrot.lane.b32.xlu0 %v5495_v49, %s5705_s6 }
0x2fae   :  { %v5497_v52 = vpop.eup %5496 }
0x2faf   :  { %v2745_v53 = vadd.f32 1.0, %v5497_v52 }
0x2fb1   :  { %5498 = vrcp.f32 %v2745_v53 }
0x2fbb   :  { %v5499_v56 = vpop.eup %5498 }
0x2fbc   :  { %v2749_v61 = vmul.f32 %v5499_v56, %v6170_v32 }
0x301f   :  { %v2752_v58 = vpop.permute.xlu0 %2751 }
0x3020   :  { %v2754_v11 = vmul.f32 %v5499_v56, %v2752_v58 }
0x3022   :  { %2756 = vrot.lane.b32.xlu1 %v2754_v11, %s5706_s7 }
0x3094   :  { %v2757_v62 = vpop.permute.xlu1 %2756 }
0x3095   :  { %v6238_v47 = vadd.f32 %v2757_v62, %v2749_v61 }
0x3097   :  { %5500 = vtanh.f32 %v6238_v47 }
0x30a1   :  { %v5501_v63 = vpop.eup %5500 }
0x30a2   :  { %2762 = vrot.lane.b32.xlu0 %v5501_v63, %s5706_s7 }
0x3114   :  { %v2763_v1 = vpop.permute.xlu0 %2762 }
0x3115   :  { %v6242_v2 = vmul.f32 %v5499_v56, %v2763_v1 }
0x3117   :  { %2769 = vrot.lane.b32.xlu1 %v6242_v2, %s5707_s8 }
0x3189   :  { %v2770_v3 = vpop.permute.xlu1 %2769 }
0x318a   :  { %v2772_v4 = vsel %vm179_vm2, %v2770_v3, %v6199_v20 }
0x318b   :  { %4916 = vmatmul.mubr.msk.f32.vlgmr.msra.gmra.mrb[28].mxu0 %vm287_vm3, %v2772_v4 }
0x318c   :  { %5204 = vmatpush3.bf16.msra.mxu0 %v6059_v22  ;;  %4943 = vmatprep.mubr.msk.f32.mxu0 %vm5703_vm1, %v5704_v9 }
0x318d   :  { %5205 = vmatprep.subr.bf16.mxu0 %v5702_v8 }
0x3190   :  { %5207 = vmatpush3.bf16.msra.mxu0 %v6062_v23 }
0x3191   :  { %5208 = vmatprep.subr.bf16.mxu0 %v5702_v8 }
0x3194   :  { %5210 = vmatpush3.bf16.msra.mxu0 %v6066_v26 }
0x3195   :  { %5214 = vmatprep.subr.bf16.mxu0 %v5702_v8 }
0x325e   :  { %v2842_v32 = vpop.f32.mrb[28].mxu0 }
0x325f   :  { %v2843_v5 = vadd.f32 %v6119_v33, %v2842_v32  ;;  %v4917_v6 = vpop.f32.mrb[29].mxu0 }
0x3261   :  { %5502 = vtanh.f32 %v2843_v5  ;;  %v4432_v15 = vmul.f32 -1.442695, %v2843_v5 }
0x3263   :  { %5504 = vpow2.f32 %v4432_v15 }
0x326b   :  { %v5503_v14 = vpop.eup %5502 }
0x326c   :  { %2855 = vrot.lane.b32.xlu0 %v5503_v14, %s5708_s13 }
0x326d   :  { %v5505_v16 = vpop.eup %5504 }
0x326e   :  { %v2849_v17 = vadd.f32 1.0, %v5505_v16 }
0x3270   :  { %5506 = vrcp.f32 %v2849_v17 }
0x327a   :  { %v5507_v18 = vpop.eup %5506 }
0x327b   :  { %v2853_v21 = vmul.f32 %v5507_v18, %v6193_v55 }
0x32de   :  { %v2856_v7 = vpop.permute.xlu0 %2855 }
0x32df   :  { %v2858_v20 = vmul.f32 %v5507_v18, %v2856_v7 }
0x32e1   :  { %2860 = vrot.lane.b32.xlu1 %v2858_v20, %s5701_s23 }
0x3353   :  { %v2861_v13 = vpop.permute.xlu1 %2860 }
0x3354   :  { %v6261_v12 = vadd.f32 %v2861_v13, %v2853_v21 }
0x3356   :  { %5508 = vtanh.f32 %v6261_v12 }
0x3360   :  { %v5509_v24 = vpop.eup %5508 }
0x3361   :  { %2866 = vrot.lane.b32.xlu0 %v5509_v24, %s5701_s23 }
0x3365   :  { %2874 = vrot.lane.b32.xlu0 %v6219_v44, %s5712_s20 }
0x33d3   :  { %v2867_v25 = vpop.permute.xlu0 %2866 }
0x33d4   :  { %v6267_v27 = vmul.f32 %v5507_v18, %v2867_v25 }
0x33d6   :  { %2871 = vrot.lane.b32.xlu1 %v6267_v27, %s5709_s0 }
0x33d7   :  { %v2875_v28 = vpop.permute.xlu0 %2874 }
0x3448   :  { %v2872_v29 = vpop.permute.xlu1 %2871 }
0x3449   :  { %v2877_v55 = vsel %vm49_vm0, %v2872_v29, %v2875_v28 }
0x344a   :  { %4929 = vmatmul.mubr.msk.f32.vlgmr.msra.gmra.mrb[30].mxu1 %vm1932_vm4, %v2877_v55 }
0x344b   :  { %5213 = vmatpush3.bf16.msra.mxu1 %v6094_v31  ;;  %4952 = vmatprep.mubr.msk.f32.mxu1 %vm5703_vm1, %v5704_v9 }
0x344c   :  { %4950 = vmatprep.subr.mxu1 %v5704_v9 }
0x344f   :  { %4951 = vmatpush3.msra.mxu1 %v6099_v51 }
0x3450   :  { %5220 = vmatprep.subr.bf16.mxu1 %v5702_v8 }
0x351d   :  { %v2947_v34 = vpop.f32.mrb[30].mxu1 }
0x351e   :  { %v2948_v35 = vadd.f32 %v6051_v0, %v2947_v34  ;;  %v4930_v37 = vpop.f32.mrb[31].mxu1 }
0x3520   :  { %5510 = vtanh.f32 %v2948_v35  ;;  %v4434_v39 = vmul.f32 -1.442695, %v2948_v35 }
0x3522   :  { %5512 = vpow2.f32 %v4434_v39 }
0x352a   :  { %v5511_v54 = vpop.eup %5510 }
0x352b   :  { %2960 = vrot.lane.b32.xlu1 %v5511_v54, %s5710_s18 }
0x352c   :  { %v5513_v40 = vpop.eup %5512 }
0x352d   :  { %v2954_v41 = vadd.f32 1.0, %v5513_v40 }
0x352f   :  { %5514 = vrcp.f32 %v2954_v41 }
0x3539   :  { %v5515_v19 = vpop.eup %5514 }
0x353a   :  { %v2958_v45 = vmul.f32 %v5515_v19, %v6215_v42 }
0x359d   :  { %v2961_v43 = vpop.permute.xlu1 %2960 }
0x359e   :  { %v2963_v44 = vmul.f32 %v5515_v19, %v2961_v43 }
0x35a0   :  { %2965 = vrot.lane.b32.xlu0 %v2963_v44, %s5710_s18 }
0x3612   :  { %v2966_v30 = vpop.permute.xlu0 %2965 }
0x3613   :  { %v6283_v38 = vadd.f32 %v2966_v30, %v2958_v45 }
0x3615   :  { %5516 = vtanh.f32 %v6283_v38 }
0x361f   :  { %v5517_v46 = vpop.eup %5516 }
0x3620   :  { %2971 = vrot.lane.b32.xlu1 %v5517_v46, %s5710_s18 }
0x3692   :  { %v2972_v48 = vpop.permute.xlu1 %2971 }
0x3693   :  { %v6287_v49 = vmul.f32 %v5515_v19, %v2972_v48 }
0x3695   :  { %2976 = vrot.lane.b32.xlu0 %v6287_v49, %s5711_s19 }
0x3707   :  { %v2977_v50 = vpop.permute.xlu0 %2976 }
0x3708   :  { %v2979_v52 = vsel %vm2034_vm5, %v2977_v50, %v6242_v2 }
0x3709   :  { %4944 = vmatmul.mubr.msk.f32.vlgmr.msra.gmra.mrb[30].mxu0 %vm2040_vm6, %v2979_v52 }
0x370a   :  { %5216 = vmatpush3.bf16.msra.mxu0 %v6030_v57  ;;  %4965 = vmatprep.mubr.msk.f32.mxu0 %vm5703_vm1, %v5704_v9 }
0x370b   :  { %5217 = vmatprep.subr.bf16.mxu0 %v5702_v8 }
0x370e   :  { %5219 = vmatpush3.bf16.msra.mxu0 %v6033_v10 }
0x370f   :  { %4963 = vmatprep.subr.mxu0 %v5704_v9 }
0x3712   :  { %4964 = vmatpush3.msra.mxu0 %v6039_v59 }
0x3713   :  { %5229 = vmatprep.subr.bf16.mxu0 %v5702_v8 }
0x37dc   :  { %v3049_v42 = vpop.f32.mrb[30].mxu0 }
0x37dd   :  { %v3050_v53 = vadd.f32 %v6086_v36, %v3049_v42  ;;  %v4945_v56 = vpop.f32.mrb[31].mxu0 }
0x37df   :  { %5518 = vtanh.f32 %v3050_v53  ;;  %v4436_v11 = vmul.f32 -1.442695, %v3050_v53 }
0x37e1   :  { %5520 = vpow2.f32 %v4436_v11 }
0x37e9   :  { %v5519_v58 = vpop.eup %5518 }
0x37ea   :  { %3062 = vrot.lane.b32.xlu1 %v5519_v58, %s5705_s6 }
0x37eb   :  { %v5521_v61 = vpop.eup %5520 }
0x37ec   :  { %v3056_v62 = vadd.f32 1.0, %v5521_v61 }
0x37ee   :  { %5522 = vrcp.f32 %v3056_v62 }
0x37f8   :  { %v5523_v63 = vpop.eup %5522 }
0x37f9   :  { %v3060_v4 = vmul.f32 %v5523_v63, %v6238_v47 }
0x385c   :  { %v3063_v1 = vpop.permute.xlu1 %3062 }
0x385d   :  { %v3065_v3 = vmul.f32 %v5523_v63, %v3063_v1 }
0x385f   :  { %3067 = vrot.lane.b32.xlu0 %v3065_v3, %s5706_s7 }
0x38d1   :  { %v3068_v32 = vpop.permute.xlu0 %3067 }
0x38d2   :  { %v6306_v5 = vadd.f32 %v3068_v32, %v3060_v4 }
0x38d4   :  { %5524 = vtanh.f32 %v6306_v5 }
0x38de   :  { %v5525_v6 = vpop.eup %5524 }
0x38df   :  { %3073 = vrot.lane.b32.xlu1 %v5525_v6, %s5706_s7 }
0x3951   :  { %v3074_v14 = vpop.permute.xlu1 %3073 }
0x3952   :  { %v6310_v15 = vmul.f32 %v5523_v63, %v3074_v14 }
0x3954   :  { %3083 = vrot.lane.b32.xlu0 %v6310_v15, %s5707_s8 }
0x39c6   :  { %v3084_v16 = vpop.permute.xlu0 %3083 }
0x39c7   :  { %v3086_v17 = vsel %vm179_vm2, %v3084_v16, %v6267_v27 }
0x39c8   :  { %4953 = vmatmul.mubr.msk.f32.vlgmr.msra.gmra.mrb[32].mxu1 %vm287_vm3, %v3086_v17 }
0x39c9   :  { %5222 = vmatpush3.bf16.msra.mxu1 %v6059_v22  ;;  %4980 = vmatprep.mubr.msk.f32.mxu1 %vm5703_vm1, %v5704_v9 }
0x39ca   :  { %5223 = vmatprep.subr.bf16.mxu1 %v5702_v8 }
0x39cd   :  { %5225 = vmatpush3.bf16.msra.mxu1 %v6062_v23 }
0x39ce   :  { %5226 = vmatprep.subr.bf16.mxu1 %v5702_v8 }
0x39d1   :  { %5228 = vmatpush3.bf16.msra.mxu1 %v6066_v26 }
0x39d2   :  { %5232 = vmatprep.subr.bf16.mxu1 %v5702_v8 }
0x3a9b   :  { %v3156_v47 = vpop.f32.mrb[32].mxu1 }
0x3a9c   :  { %v3157_v18 = vadd.f32 %v6119_v33, %v3156_v47  ;;  %v4954_v7 = vpop.f32.mrb[33].mxu1 }
0x3a9e   :  { %5526 = vtanh.f32 %v3157_v18  ;;  %v4438_v21 = vmul.f32 -1.442695, %v3157_v18 }
0x3aa0   :  { %5528 = vpow2.f32 %v4438_v21 }
0x3aa8   :  { %v5527_v20 = vpop.eup %5526 }
0x3aa9   :  { %3169 = vrot.lane.b32.xlu1 %v5527_v20, %s5708_s13 }
0x3aaa   :  { %v5529_v13 = vpop.eup %5528 }
0x3aab   :  { %v3163_v24 = vadd.f32 1.0, %v5529_v13 }
0x3aad   :  { %5530 = vrcp.f32 %v3163_v24 }
0x3ab7   :  { %v5531_v25 = vpop.eup %5530 }
0x3ab8   :  { %v3167_v29 = vmul.f32 %v5531_v25, %v6261_v12 }
0x3b1b   :  { %v3170_v27 = vpop.permute.xlu1 %3169 }
0x3b1c   :  { %v3172_v28 = vmul.f32 %v5531_v25, %v3170_v27 }
0x3b1e   :  { %3174 = vrot.lane.b32.xlu0 %v3172_v28, %s5701_s23 }
0x3b90   :  { %v3175_v55 = vpop.permute.xlu0 %3174 }
0x3b91   :  { %v6329_v34 = vadd.f32 %v3175_v55, %v3167_v29 }
0x3b93   :  { %5532 = vtanh.f32 %v6329_v34 }
0x3b9d   :  { %v5533_v35 = vpop.eup %5532 }
0x3b9e   :  { %3180 = vrot.lane.b32.xlu1 %v5533_v35, %s5701_s23 }
0x3ba2   :  { %3188 = vrot.lane.b32.xlu1 %v6287_v49, %s5712_s20 }
0x3c10   :  { %v3181_v37 = vpop.permute.xlu1 %3180 }
0x3c11   :  { %v6335_v54 = vmul.f32 %v5531_v25, %v3181_v37 }
0x3c13   :  { %3185 = vrot.lane.b32.xlu0 %v6335_v54, %s5709_s0 }
0x3c14   :  { %v3189_v39 = vpop.permute.xlu1 %3188 }
0x3c85   :  { %v3186_v40 = vpop.permute.xlu0 %3185 }
0x3c86   :  { %v3191_v12 = vsel %vm49_vm0, %v3186_v40, %v3189_v39 }
0x3c87   :  { %4966 = vmatmul.mubr.msk.f32.vlgmr.msra.gmra.mrb[32].mxu0 %vm1932_vm4, %v3191_v12 }
0x3c88   :  { %5231 = vmatpush3.bf16.msra.mxu0 %v6094_v31  ;;  %4989 = vmatprep.mubr.msk.f32.mxu0 %vm5703_vm1, %v5704_v9 }
0x3c89   :  { %4987 = vmatprep.subr.mxu0 %v5704_v9 }
0x3c8c   :  { %4988 = vmatpush3.msra.mxu0 %v6099_v51 }
0x3c8d   :  { %5238 = vmatprep.subr.bf16.mxu0 %v5702_v8 }
0x3d5a   :  { %v3261_v41 = vpop.f32.mrb[32].mxu0 }
0x3d5b   :  { %v3262_v19 = vadd.f32 %v6051_v0, %v3261_v41  ;;  %v4967_v43 = vpop.f32.mrb[33].mxu0 }
0x3d5d   :  { %5534 = vtanh.f32 %v3262_v19  ;;  %v4440_v45 = vmul.f32 -1.442695, %v3262_v19 }
0x3d5f   :  { %5536 = vpow2.f32 %v4440_v45  ;;  %v6415_v45 = vld [vmem:[#allocation2 + $0x98] ss:$0 sm:$0xff] }
0x3d67   :  { %v5535_v44 = vpop.eup %5534 }
0x3d68   :  { %3274 = vrot.lane.b32.xlu0 %v5535_v44, %s5710_s18 }
0x3d69   :  { %v5537_v30 = vpop.eup %5536 }
0x3d6a   :  { %v3268_v46 = vadd.f32 1.0, %v5537_v30 }
0x3d6c   :  { %5538 = vrcp.f32 %v3268_v46 }
0x3d76   :  { %v5539_v48 = vpop.eup %5538 }
0x3d77   :  { %v3272_v52 = vmul.f32 %v5539_v48, %v6283_v38 }
0x3dda   :  { %v3275_v49 = vpop.permute.xlu0 %3274 }
0x3ddb   :  { %v3277_v50 = vmul.f32 %v5539_v48, %v3275_v49 }
0x3ddd   :  { %3279 = vrot.lane.b32.xlu1 %v3277_v50, %s5710_s18 }
0x3e4f   :  { %v3280_v42 = vpop.permute.xlu1 %3279 }
0x3e50   :  { %v6351_v53 = vadd.f32 %v3280_v42, %v3272_v52 }
0x3e52   :  { %5540 = vtanh.f32 %v6351_v53 }
0x3e5c   :  { %v5541_v0 = vpop.eup %5540 }
0x3e5d   :  { %3285 = vrot.lane.b32.xlu0 %v5541_v0, %s5710_s18 }
0x3ecf   :  { %v3286_v56 = vpop.permute.xlu0 %3285 }
0x3ed0   :  { %v6355_v58 = vmul.f32 %v5539_v48, %v3286_v56 }
0x3ed2   :  { %3290 = vrot.lane.b32.xlu1 %v6355_v58, %s5711_s19 }
0x3f44   :  { %v3291_v11 = vpop.permute.xlu1 %3290 }
0x3f45   :  { %v3293_v61 = vsel %vm2034_vm5, %v3291_v11, %v6310_v15 }
0x3f46   :  { %4981 = vmatmul.mubr.msk.f32.vlgmr.msra.gmra.mrb[34].mxu1 %vm2040_vm6, %v3293_v61 }
0x3f47   :  { %5234 = vmatpush3.bf16.msra.mxu1 %v6030_v57  ;;  %5002 = vmatprep.mubr.msk.f32.mxu1 %vm5703_vm1, %v5704_v9 }
0x3f48   :  { %5235 = vmatprep.subr.bf16.mxu1 %v5702_v8 }
0x3f4b   :  { %5237 = vmatpush3.bf16.msra.mxu1 %v6033_v10 }
0x3f4c   :  { %5000 = vmatprep.subr.mxu1 %v5704_v9 }
0x3f4f   :  { %5001 = vmatpush3.msra.mxu1 %v6039_v59 }
0x3f50   :  { %5247 = vmatprep.subr.bf16.mxu1 %v5702_v8 }
0x4019   :  { %v3363_v38 = vpop.f32.mrb[34].mxu1 }
0x401a   :  { %v3364_v62 = vadd.f32 %v6086_v36, %v3363_v38  ;;  %v4982_v63 = vpop.f32.mrb[35].mxu1 }
0x401c   :  { %5542 = vtanh.f32 %v3364_v62  ;;  %v4442_v3 = vmul.f32 -1.442695, %v3364_v62 }
0x401e   :  { %5544 = vpow2.f32 %v4442_v3 }
0x4026   :  { %v5543_v1 = vpop.eup %5542 }
0x4027   :  { %3376 = vrot.lane.b32.xlu0 %v5543_v1, %s5705_s6 }
0x4028   :  { %v5545_v4 = vpop.eup %5544 }
0x4029   :  { %v3370_v32 = vadd.f32 1.0, %v5545_v4  ;;  %v6442_v4 = vld [vmem:[#allocation2 + $0xd0] ss:$0 sm:$0xff] }
0x402b   :  { %5546 = vrcp.f32 %v3370_v32 }
0x4035   :  { %v5547_v6 = vpop.eup %5546 }
0x4036   :  { %v3374_v59 = vmul.f32 %v5547_v6, %v6306_v5 }
0x4099   :  { %v3377_v14 = vpop.permute.xlu0 %3376 }
0x409a   :  { %v3379_v16 = vmul.f32 %v5547_v6, %v3377_v14 }
0x409c   :  { %3381 = vrot.lane.b32.xlu1 %v3379_v16, %s5706_s7 }
0x410e   :  { %v3382_v17 = vpop.permute.xlu1 %3381 }
0x410f   :  { %v6374_v47 = vadd.f32 %v3382_v17, %v3374_v59 }
0x4111   :  { %5548 = vtanh.f32 %v6374_v47 }
0x411b   :  { %v5549_v36 = vpop.eup %5548 }
0x411c   :  { %3387 = vrot.lane.b32.xlu0 %v5549_v36, %s5706_s7 }
0x418e   :  { %v3388_v18 = vpop.permute.xlu0 %3387 }
0x418f   :  { %v6378_v7 = vmul.f32 %v5547_v6, %v3388_v18 }
0x4191   :  { %3397 = vrot.lane.b32.xlu1 %v6378_v7, %s5707_s8 }
0x4203   :  { %v3398_v20 = vpop.permute.xlu1 %3397 }
0x4204   :  { %v3400_v21 = vsel %vm179_vm2, %v3398_v20, %v6335_v54 }
0x4205   :  { %4990 = vmatmul.mubr.msk.f32.vlgmr.msra.gmra.mrb[34].mxu0 %vm287_vm3, %v3400_v21 }
0x4206   :  { %5240 = vmatpush3.bf16.msra.mxu0 %v6059_v22  ;;  %5017 = vmatprep.mubr.msk.f32.mxu0 %vm5703_vm1, %v5704_v9 }
0x4207   :  { %5241 = vmatprep.subr.bf16.mxu0 %v5702_v8 }
0x420a   :  { %5243 = vmatpush3.bf16.msra.mxu0 %v6062_v23 }
0x420b   :  { %5244 = vmatprep.subr.bf16.mxu0 %v5702_v8 }
0x420e   :  { %5246 = vmatpush3.bf16.msra.mxu0 %v6066_v26 }
0x420f   :  { %5250 = vmatprep.subr.bf16.mxu0 %v5702_v8 }
0x42d8   :  { %v3470_v5 = vpop.f32.mrb[34].mxu0 }
0x42d9   :  { %v3471_v13 = vadd.f32 %v6119_v33, %v3470_v5  ;;  %v4991_v24 = vpop.f32.mrb[35].mxu0 }
0x42db   :  { %5550 = vtanh.f32 %v3471_v13  ;;  %v4444_v27 = vmul.f32 -1.442695, %v3471_v13 }
0x42dd   :  { %5552 = vpow2.f32 %v4444_v27 }
0x42e5   :  { %v5551_v25 = vpop.eup %5550 }
0x42e6   :  { %3483 = vrot.lane.b32.xlu0 %v5551_v25, %s5708_s13 }
0x42e7   :  { %v5553_v28 = vpop.eup %5552 }
0x42e8   :  { %v3477_v29 = vadd.f32 1.0, %v5553_v28 }
0x42ea   :  { %5554 = vrcp.f32 %v3477_v29 }
0x42f4   :  { %v5555_v55 = vpop.eup %5554 }
0x42f5   :  { %v3481_v54 = vmul.f32 %v5555_v55, %v6329_v34 }
0x4358   :  { %v3484_v35 = vpop.permute.xlu0 %3483 }
0x4359   :  { %v3486_v37 = vmul.f32 %v5555_v55, %v3484_v35 }
0x435b   :  { %3488 = vrot.lane.b32.xlu1 %v3486_v37, %s5701_s23 }
0x43cd   :  { %v3489_v39 = vpop.permute.xlu1 %3488 }
0x43ce   :  { %v6397_v40 = vadd.f32 %v3489_v39, %v3481_v54 }
0x43d0   :  { %5556 = vtanh.f32 %v6397_v40 }
0x43da   :  { %v5557_v33 = vpop.eup %5556 }
0x43db   :  { %3494 = vrot.lane.b32.xlu0 %v5557_v33, %s5701_s23 }
0x43df   :  { %3502 = vrot.lane.b32.xlu0 %v6355_v58, %s5712_s20 }
0x444d   :  { %v3495_v12 = vpop.permute.xlu0 %3494 }
0x444e   :  { %v6403_v41 = vmul.f32 %v5555_v55, %v3495_v12  ;;  %v6467_v55 = vld [vmem:[#allocation2 + $0x68] ss:$0 sm:$0xff] }
0x4450   :  { %3499 = vrot.lane.b32.xlu1 %v6403_v41, %s5709_s0 }
0x4451   :  { %v3503_v19 = vpop.permute.xlu0 %3502 }
0x44c2   :  { %v3500_v43 = vpop.permute.xlu1 %3499 }
0x44c3   :  { %v3505_v34 = vsel %vm49_vm0, %v3500_v43, %v3503_v19 }
0x44c4   :  { %5003 = vmatmul.mubr.msk.f32.vlgmr.msra.gmra.mrb[36].mxu1 %vm1932_vm4, %v3505_v34 }
0x44c5   :  { %5249 = vmatpush3.bf16.msra.mxu1 %v6094_v31  ;;  %5026 = vmatprep.mubr.msk.f32.mxu1 %vm5703_vm1, %v5704_v9 }
0x44c6   :  { %5024 = vmatprep.subr.mxu1 %v5704_v9 }
0x44c9   :  { %5025 = vmatpush3.msra.mxu1 %v6099_v51 }
0x44ca   :  { %5256 = vmatprep.subr.bf16.mxu1 %v5702_v8 }
0x4597   :  { %v3575_v44 = vpop.f32.mrb[36].mxu1 }
0x4598   :  { %v3576_v30 = vadd.f32 %v6415_v45, %v3575_v44  ;;  %v5004_v46 = vpop.f32.mrb[37].mxu1 }
0x459a   :  { %5558 = vtanh.f32 %v3576_v30  ;;  %v4446_v49 = vmul.f32 -1.442695, %v3576_v30 }
0x459c   :  { %5560 = vpow2.f32 %v4446_v49 }
0x45a4   :  { %v5559_v48 = vpop.eup %5558 }
0x45a5   :  { %3588 = vrot.lane.b32.xlu1 %v5559_v48, %s5710_s18 }
0x45a6   :  { %v5561_v50 = vpop.eup %5560 }
0x45a7   :  { %v3582_v52 = vadd.f32 1.0, %v5561_v50 }
0x45a9   :  { %5562 = vrcp.f32 %v3582_v52 }
0x45b3   :  { %v5563_v42 = vpop.eup %5562 }
0x45b4   :  { %v3586_v56 = vmul.f32 %v5563_v42, %v6351_v53  ;;  %v6438_v53 = vld [vmem:[#allocation2 + $0x90] sm:$0xff] }
0x4617   :  { %v3589_v0 = vpop.permute.xlu1 %3588 }
0x4618   :  { %v3591_v51 = vmul.f32 %v5563_v42, %v3589_v0 }
0x461a   :  { %3593 = vrot.lane.b32.xlu0 %v3591_v51, %s5710_s18 }
0x468c   :  { %v3594_v58 = vpop.permute.xlu0 %3593 }
0x468d   :  { %v6421_v11 = vadd.f32 %v3594_v58, %v3586_v56 }
0x468f   :  { %5564 = vtanh.f32 %v6421_v11 }
0x4699   :  { %v5565_v61 = vpop.eup %5564 }
0x469a   :  { %3599 = vrot.lane.b32.xlu1 %v5565_v61, %s5710_s18 }
0x470c   :  { %v3600_v38 = vpop.permute.xlu1 %3599 }
0x470d   :  { %v6425_v62 = vmul.f32 %v5563_v42, %v3600_v38  ;;  %v5626_v42 = vld [vmem:[#allocation2 + $0x60] sm:$0xff] }
0x470f   :  { %3604 = vrot.lane.b32.xlu0 %v6425_v62, %s5711_s19 }
0x4781   :  { %v3605_v63 = vpop.permute.xlu0 %3604 }
0x4782   :  { %v3607_v1 = vsel %vm2034_vm5, %v3605_v63, %v6378_v7 }
0x4783   :  { %5018 = vmatmul.mubr.msk.f32.vlgmr.msra.gmra.mrb[36].mxu0 %vm2040_vm6, %v3607_v1 }
0x4784   :  { %5252 = vmatpush3.bf16.msra.mxu0 %v6030_v57  ;;  %5039 = vmatprep.mubr.msk.f32.mxu0 %vm5703_vm1, %v5704_v9 }
0x4785   :  { %5253 = vmatprep.subr.bf16.mxu0 %v5702_v8 }
0x4788   :  { %5255 = vmatpush3.bf16.msra.mxu0 %v6033_v10 }
0x4789   :  { %5037 = vmatprep.subr.mxu0 %v5704_v9 }
0x478c   :  { %5038 = vmatpush3.msra.mxu0 %v6438_v53 }
0x478d   :  { %5265 = vmatprep.subr.bf16.mxu0 %v5702_v8 }
0x4856   :  { %v3677_v3 = vpop.f32.mrb[36].mxu0 }
0x4857   :  { %v3678_v32 = vadd.f32 %v6442_v4, %v3677_v3  ;;  %v5019_v6 = vpop.f32.mrb[37].mxu0 }
0x4859   :  { %5566 = vtanh.f32 %v3678_v32  ;;  %v4448_v16 = vmul.f32 -1.442695, %v3678_v32 }
0x485b   :  { %5568 = vpow2.f32 %v4448_v16 }
0x4863   :  { %v5567_v14 = vpop.eup %5566 }
0x4864   :  { %3690 = vrot.lane.b32.xlu1 %v5567_v14, %s5705_s6 }
0x4865   :  { %v5569_v59 = vpop.eup %5568 }
0x4866   :  { %v3684_v17 = vadd.f32 1.0, %v5569_v59 }
0x4868   :  { %5570 = vrcp.f32 %v3684_v17 }
0x4872   :  { %v5571_v36 = vpop.eup %5570 }
0x4873   :  { %v3688_v21 = vmul.f32 %v5571_v36, %v6374_v47 }
0x48d6   :  { %v3691_v18 = vpop.permute.xlu1 %3690 }
0x48d7   :  { %v3693_v20 = vmul.f32 %v5571_v36, %v3691_v18 }
0x48d9   :  { %3695 = vrot.lane.b32.xlu0 %v3693_v20, %s5706_s7 }
0x494b   :  { %v3696_v5 = vpop.permute.xlu0 %3695 }
0x494c   :  { %v6448_v13 = vadd.f32 %v3696_v5, %v3688_v21 }
0x494e   :  { %5572 = vtanh.f32 %v6448_v13 }
0x4958   :  { %v5573_v24 = vpop.eup %5572 }
0x4959   :  { %3701 = vrot.lane.b32.xlu1 %v5573_v24, %s5706_s7 }
0x49cb   :  { %v3702_v25 = vpop.permute.xlu1 %3701 }
0x49cc   :  { %v6452_v27 = vmul.f32 %v5571_v36, %v3702_v25 }
0x49ce   :  { %3711 = vrot.lane.b32.xlu0 %v6452_v27, %s5707_s8 }
0x4a40   :  { %v3712_v28 = vpop.permute.xlu0 %3711 }
0x4a41   :  { %v3714_v29 = vsel %vm179_vm2, %v3712_v28, %v6403_v41 }
0x4a42   :  { %5027 = vmatmul.mubr.msk.f32.vlgmr.msra.gmra.mrb[38].mxu1 %vm287_vm3, %v3714_v29 }
0x4a43   :  { %5258 = vmatpush3.bf16.msra.mxu1 %v6059_v22  ;;  %5054 = vmatprep.mubr.msk.f32.mxu1 %vm5703_vm1, %v5704_v9 }
0x4a44   :  { %5259 = vmatprep.subr.bf16.mxu1 %v5702_v8 }
0x4a47   :  { %5261 = vmatpush3.bf16.msra.mxu1 %v6062_v23 }
0x4a48   :  { %5262 = vmatprep.subr.bf16.mxu1 %v5702_v8 }
0x4a4b   :  { %5264 = vmatpush3.bf16.msra.mxu1 %v6066_v26 }
0x4a4c   :  { %5268 = vmatprep.subr.bf16.mxu1 %v5702_v8 }
0x4b15   :  { %v3784_v47 = vpop.f32.mrb[38].mxu1 }
0x4b16   :  { %v3785_v35 = vadd.f32 %v6467_v55, %v3784_v47  ;;  %v5028_v37 = vpop.f32.mrb[39].mxu1 }
0x4b18   :  { %5574 = vtanh.f32 %v3785_v35  ;;  %v4450_v39 = vmul.f32 -1.442695, %v3785_v35 }
0x4b1a   :  { %5576 = vpow2.f32 %v4450_v39 }
0x4b22   :  { %v5575_v54 = vpop.eup %5574 }
0x4b23   :  { %3797 = vrot.lane.b32.xlu1 %v5575_v54, %s5708_s13 }
0x4b24   :  { %v5577_v33 = vpop.eup %5576 }
0x4b25   :  { %v3791_v12 = vadd.f32 1.0, %v5577_v33 }
0x4b27   :  { %5578 = vrcp.f32 %v3791_v12 }
0x4b31   :  { %v5579_v41 = vpop.eup %5578 }
0x4b32   :  { %v3795_v34 = vmul.f32 %v5579_v41, %v6397_v40 }
0x4b95   :  { %v3798_v19 = vpop.permute.xlu1 %3797 }
0x4b96   :  { %v3800_v43 = vmul.f32 %v5579_v41, %v3798_v19 }
0x4b98   :  { %3802 = vrot.lane.b32.xlu0 %v3800_v43, %s5701_s23 }
0x4c0a   :  { %v3803_v44 = vpop.permute.xlu0 %3802 }
0x4c0b   :  { %v6473_v30 = vadd.f32 %v3803_v44, %v3795_v34 }
0x4c0d   :  { %5580 = vtanh.f32 %v6473_v30 }
0x4c17   :  { %v5581_v46 = vpop.eup %5580 }
0x4c18   :  { %3808 = vrot.lane.b32.xlu1 %v5581_v46, %s5701_s23 }
0x4c1c   :  { %3816 = vrot.lane.b32.xlu1 %v6425_v62, %s5712_s20 }
0x4c8a   :  { %v3809_v48 = vpop.permute.xlu1 %3808 }
0x4c8b   :  { %v6479_v49 = vmul.f32 %v5579_v41, %v3809_v48 }
0x4c8d   :  { %3813 = vrot.lane.b32.xlu0 %v6479_v49, %s5709_s0 }
0x4c8e   :  { %v3817_v50 = vpop.permute.xlu1 %3816 }
0x4cff   :  { %v3814_v52 = vpop.permute.xlu0 %3813 }
0x4d00   :  { %v3819_v40 = vsel %vm49_vm0, %v3814_v52, %v3817_v50 }
0x4d01   :  { %5040 = vmatmul.mubr.msk.f32.vlgmr.msra.gmra.mrb[38].mxu0 %vm1932_vm4, %v3819_v40 }
0x4d02   :  { %5267 = vmatpush3.bf16.msra.mxu0 %v6094_v31  ;;  %5063 = vmatprep.mubr.msk.f32.mxu0 %vm5703_vm1, %v5704_v9 }
0x4d03   :  { %5061 = vmatprep.subr.mxu0 %v5704_v9 }
0x4d06   :  { %5062 = vmatpush3.msra.mxu0 %v5626_v42 }
0x4d07   :  { %5274 = vmatprep.subr.bf16.mxu0 %v5702_v8 }
0x4dd4   :  { %v3889_v0 = vpop.f32.mrb[38].mxu0 }
0x4dd5   :  { %v3890_v51 = vadd.f32 %v6415_v45, %v3889_v0  ;;  %v5041_v56 = vpop.f32.mrb[39].mxu0 }
0x4dd7   :  { %5582 = vtanh.f32 %v3890_v51  ;;  %v4452_v61 = vmul.f32 -1.442695, %v3890_v51 }
0x4dd9   :  { %5584 = vpow2.f32 %v4452_v61 }
0x4de1   :  { %v5583_v58 = vpop.eup %5582 }
0x4de2   :  { %3902 = vrot.lane.b32.xlu0 %v5583_v58, %s5710_s18 }
0x4de3   :  { %v5585_v31 = vpop.eup %5584 }
0x4de4   :  { %v3896_v38 = vadd.f32 1.0, %v5585_v31 }
0x4de6   :  { %5586 = vrcp.f32 %v3896_v38 }
0x4df0   :  { %v5587_v62 = vpop.eup %5586 }
0x4df1   :  { %v3900_v3 = vmul.f32 %v5587_v62, %v6421_v11 }
0x4e54   :  { %v3903_v63 = vpop.permute.xlu0 %3902 }
0x4e55   :  { %v3905_v1 = vmul.f32 %v5587_v62, %v3903_v63 }
0x4e57   :  { %3907 = vrot.lane.b32.xlu1 %v3905_v1, %s5710_s18 }
0x4ec9   :  { %v3908_v32 = vpop.permute.xlu1 %3907 }
0x4eca   :  { %v6494_v6 = vadd.f32 %v3908_v32, %v3900_v3 }
0x4ecc   :  { %5588 = vtanh.f32 %v6494_v6 }
0x4ed6   :  { %v5589_v14 = vpop.eup %5588 }
0x4ed7   :  { %3913 = vrot.lane.b32.xlu0 %v5589_v14, %s5710_s18 }
0x4f49   :  { %v3914_v16 = vpop.permute.xlu0 %3913 }
0x4f4a   :  { %v6498_v59 = vmul.f32 %v5587_v62, %v3914_v16 }
0x4f4c   :  { %3918 = vrot.lane.b32.xlu1 %v6498_v59, %s5711_s19 }
0x4fbe   :  { %v3919_v17 = vpop.permute.xlu1 %3918 }
0x4fbf   :  { %v3921_v36 = vsel %vm2034_vm5, %v3919_v17, %v6452_v27 }
0x4fc0   :  { %5055 = vmatmul.mubr.msk.f32.vlgmr.msra.gmra.mrb[40].mxu1 %vm2040_vm6, %v3921_v36 }
0x4fc1   :  { %5270 = vmatpush3.bf16.msra.mxu1 %v6030_v57  ;;  %5076 = vmatprep.mubr.msk.f32.mxu1 %vm5703_vm1, %v5704_v9 }
0x4fc2   :  { %5271 = vmatprep.subr.bf16.mxu1 %v5702_v8 }
0x4fc5   :  { %5273 = vmatpush3.bf16.msra.mxu1 %v6033_v10 }
0x4fc6   :  { %5074 = vmatprep.subr.mxu1 %v5704_v9 }
0x4fc9   :  { %5075 = vmatpush3.msra.mxu1 %v6438_v53 }
0x5093   :  { %v3991_v11 = vpop.f32.mrb[40].mxu1 }
0x5094   :  { %v3992_v18 = vadd.f32 %v6442_v4, %v3991_v11  ;;  %v5056_v20 = vpop.f32.mrb[41].mxu1 }
0x5096   :  { %5590 = vtanh.f32 %v3992_v18  ;;  %v4454_v57 = vmul.f32 -1.442695, %v3992_v18 }
0x5098   :  { %5592 = vpow2.f32 %v4454_v57 }
0x50a0   :  { %v5591_v21 = vpop.eup %5590 }
0x50a1   :  { %4004 = vrot.lane.b32.xlu0 %v5591_v21, %s5705_s6 }
0x50a2   :  { %v5593_v5 = vpop.eup %5592 }
0x50a3   :  { %v3998_v24 = vadd.f32 1.0, %v5593_v5 }
0x50a5   :  { %5594 = vrcp.f32 %v3998_v24 }
0x50af   :  { %v5595_v25 = vpop.eup %5594 }
0x50b0   :  { %v4002_v53 = vmul.f32 %v5595_v25, %v6448_v13 }
0x5113   :  { %v4005_v28 = vpop.permute.xlu0 %4004 }
0x5114   :  { %v4007_v10 = vmul.f32 %v5595_v25, %v4005_v28 }
0x5116   :  { %4009 = vrot.lane.b32.xlu1 %v4007_v10, %s5706_s7 }
0x5188   :  { %v4010_v29 = vpop.permute.xlu1 %4009 }
0x5189   :  { %v6516_v47 = vadd.f32 %v4010_v29, %v4002_v53 }
0x518b   :  { %5596 = vtanh.f32 %v6516_v47 }
0x5195   :  { %v5597_v35 = vpop.eup %5596 }
0x5196   :  { %4015 = vrot.lane.b32.xlu0 %v5597_v35, %s5706_s7 }
0x5208   :  { %v4016_v37 = vpop.permute.xlu0 %4015 }
0x5209   :  { %v6520_v54 = vmul.f32 %v5595_v25, %v4016_v37 }
0x520b   :  { %4025 = vrot.lane.b32.xlu1 %v6520_v54, %s5707_s8 }
0x527d   :  { %v4026_v39 = vpop.permute.xlu1 %4025 }
0x527e   :  { %v4028_v33 = vsel %vm179_vm2, %v4026_v39, %v6479_v49 }
0x527f   :  { %5064 = vmatmul.mubr.msk.f32.vlgmr.msra.gmra.mrb[40].mxu0 %vm287_vm3, %v4028_v33 }
0x5280   :  { %5276 = vmatpush3.bf16.msra.mxu0 %v6059_v22  ;;  %5091 = vmatprep.mubr.msk.f32.mxu0 %vm5703_vm1, %v5704_v9 }
0x5281   :  { %5277 = vmatprep.subr.bf16.mxu0 %v5702_v8 }
0x5284   :  { %5279 = vmatpush3.bf16.msra.mxu0 %v6062_v23 }
0x5285   :  { %5280 = vmatprep.subr.bf16.mxu0 %v5702_v8 }
0x5288   :  { %5282 = vmatpush3.bf16.msra.mxu0 %v6066_v26 }
0x5352   :  { %v4098_v13 = vpop.f32.mrb[40].mxu0 }
0x5353   :  { %v4099_v12 = vadd.f32 %v6467_v55, %v4098_v13  ;;  %v5065_v41 = vpop.f32.mrb[41].mxu0 }
0x5355   :  { %5598 = vtanh.f32 %v4099_v12  ;;  %v4456_v22 = vmul.f32 -1.442695, %v4099_v12 }
0x5357   :  { %5600 = vpow2.f32 %v4456_v22 }
0x535f   :  { %v5599_v19 = vpop.eup %5598 }
0x5360   :  { %4111 = vrot.lane.b32.xlu0 %v5599_v19, %s5708_s13 }
0x5361   :  { %v5601_v43 = vpop.eup %5600 }
0x5362   :  { %v4105_v9 = vadd.f32 1.0, %v5601_v43 }
0x5364   :  { %5602 = vrcp.f32 %v4105_v9 }
0x536e   :  { %v5603_v34 = vpop.eup %5602 }
0x536f   :  { %v4109_v8 = vmul.f32 %v5603_v34, %v6473_v30 }
0x53d2   :  { %v4112_v44 = vpop.permute.xlu0 %4111 }
0x53d3   :  { %v4114_v23 = vmul.f32 %v5603_v34, %v4112_v44 }
0x53d5   :  { %4116 = vrot.lane.b32.xlu1 %v4114_v23, %s5701_s23 }
0x5447   :  { %v4117_v26 = vpop.permute.xlu1 %4116 }
0x5448   :  { %v4119_v46 = vadd.f32 %v4117_v26, %v4109_v8 }
0x544a   :  { %5604 = vtanh.f32 %v4119_v46 }
0x5454   :  { %v5605_v55 = vpop.eup %5604 }
0x5455   :  { %4122 = vrot.lane.b32.xlu0 %v5605_v55, %s5701_s23  ;;  %s4355_s23 = sshll.u32 %s5714_s22, 4  ;;  %s4356_s23 = int_to_ptr.vmem [resolvable:$true] %s4355_s23 }
0x5456   :  { %s5649_s24 = scalar_lea.vmem %s4356_s23, 128  ;;  %p5654_p9 = scmp.lt.s32.totalorder %s4356_s23, %s4356_s23 }
0x5457   :  { %p5650_p8 = scmp.ne.s32.totalorder %s4356_s23, %s5649_s24  ;;  %p5655_p10 = scmp.lt.s32.totalorder %s5649_s24, %s5649_s24 }
0x5459   :  { %4130 = vrot.lane.b32.xlu0 %v6498_v59, %s5712_s20  ;;  %p5656_p11 = por %p5655_p10, %p5654_p9 }
0x545b   :  { %p5657_p12 = pnand %p5656_p11, %p5650_p8 }
0x54c7   :  { %v4123_v48 = vpop.permute.xlu0 %4122 }
0x54c8   :  { %v4125_v49 = vmul.f32 %v5603_v34, %v4123_v48 }
0x54ca   :  { %4127 = vrot.lane.b32.xlu1 %v4125_v49, %s5709_s0 }
0x54cb   :  { %v4131_v50 = vpop.permute.xlu0 %4130 }
0x553c   :  { %v4128_v52 = vpop.permute.xlu1 %4127 }
0x553d   :  { %v4133_v40 = vsel %vm49_vm0, %v4128_v52, %v4131_v50 }
0x553e   :  { %5077 = vmatmul.mubr.msk.f32.vlgmr.msra.gmra.mrb[42].mxu1 %vm1932_vm4, %v4133_v40 }
0x5611   :  { %v4203_v30 = vpop.f32.mrb[42].mxu1 }
0x5612   :  { %v4204_v42 = vadd.f32 %v6415_v45, %v4203_v30  ;;  %v5078_v0 = vpop.f32.mrb[43].mxu1 }
0x5614   :  { %5606 = vtanh.f32 %v4204_v42  ;;  %v4458_v56 = vmul.f32 -1.442695, %v4204_v42 }
0x5616   :  { %5608 = vpow2.f32 %v4458_v56 }
0x561e   :  { %v5607_v51 = vpop.eup %5606 }
0x561f   :  { %4216 = vrot.lane.b32.xlu1 %v5607_v51, %s5710_s18 }
0x5620   :  { %v5609_v58 = vpop.eup %5608 }
0x5621   :  { %v4210_v61 = vadd.f32 1.0, %v5609_v58 }
0x5623   :  { %5610 = vrcp.f32 %v4210_v61 }
0x562d   :  { %v5611_v31 = vpop.eup %5610 }
0x562e   :  { %v4214_v63 = vmul.f32 %v5611_v31, %v6494_v6 }
0x5691   :  { %v4217_v38 = vpop.permute.xlu1 %4216 }
0x5692   :  { %v4219_v62 = vmul.f32 %v5611_v31, %v4217_v38 }
0x5694   :  { %4221 = vrot.lane.b32.xlu0 %v4219_v62, %s5710_s18 }
0x5706   :  { %v4222_v1 = vpop.permute.xlu0 %4221 }
0x5707   :  { %v4224_v3 = vadd.f32 %v4222_v1, %v4214_v63 }
0x5709   :  { %5612 = vtanh.f32 %v4224_v3 }
0x5713   :  { %v5613_v45 = vpop.eup %5612 }
0x5714   :  { %4227 = vrot.lane.b32.xlu1 %v5613_v45, %s5710_s18 }
0x5786   :  { %v4228_v32 = vpop.permute.xlu1 %4227 }
0x5787   :  { %v4230_v14 = vmul.f32 %v5611_v31, %v4228_v32 }
0x5789   :  { %4232 = vrot.lane.b32.xlu0 %v4230_v14, %s5711_s19 }
0x57fb   :  { %v4233_v16 = vpop.permute.xlu0 %4232 }
0x57fc   :  { %v4235_v59 = vsel %vm2034_vm5, %v4233_v16, %v6520_v54 }
0x57fd   :  { %5092 = vmatmul.mubr.msk.f32.vlgmr.msra.gmra.mrb[42].mxu0 %vm2040_vm6, %v4235_v59 }
0x58d0   :  { %v4305_v17 = vpop.f32.mrb[42].mxu0 }
0x58d1   :  { %v4306_v36 = vadd.f32 %v6442_v4, %v4305_v17  ;;  %v5093_v6 = vpop.f32.mrb[43].mxu0 }
0x58d3   :  { %5614 = vtanh.f32 %v4306_v36  ;;  %v4460_v18 = vmul.f32 -1.442695, %v4306_v36 }
0x58d5   :  { %5616 = vpow2.f32 %v4460_v18 }
0x58dd   :  { %v5615_v11 = vpop.eup %5614 }
0x58de   :  { %4318 = vrot.lane.b32.xlu1 %v5615_v11, %s5705_s6 }
0x58df   :  { %v5617_v20 = vpop.eup %5616 }
0x58e0   :  { %v4312_v21 = vadd.f32 1.0, %v5617_v20 }
0x58e2   :  { %5618 = vrcp.f32 %v4312_v21 }
0x58ec   :  { %v5619_v57 = vpop.eup %5618 }
0x58ed   :  { %v4316_v4 = vmul.f32 %v5619_v57, %v6516_v47 }
0x5950   :  { %v4319_v5 = vpop.permute.xlu1 %4318 }
0x5951   :  { %v4321_v24 = vmul.f32 %v5619_v57, %v4319_v5 }
0x5953   :  { %4323 = vrot.lane.b32.xlu0 %v4321_v24, %s5706_s7 }
0x5957   :  { %2453 = vrot.lane.b32.xlu0 %v6174_v60, %s5709_s0 }
0x595b   :  { %3392 = vrot.lane.b32.xlu0 %v6378_v7, %s5710_s18 }
0x595f   :  { %4020 = vrot.lane.b32.xlu0 %v6520_v54, %s5711_s19 }
0x59c5   :  { %v4324_v25 = vpop.permute.xlu0 %4323 }
0x59c6   :  { %v4326_v28 = vadd.f32 %v4324_v25, %v4316_v4 }
0x59c8   :  { %5620 = vtanh.f32 %v4326_v28 }
0x59c9   :  { %v2454_v10 = vpop.permute.xlu0 %2453 }
0x59ca   :  { %2457 = vst.msk [vmem:[#allocation5] sm:$0xff] %vm2456_vm7, %v2454_v10 }
0x59cb   :  { %2767 = vst.msk [vmem:[#allocation5] sm:$0xff] %vm2766_vm8, %v6242_v2 }
0x59d2   :  { %v5621_v53 = vpop.eup %5620 }
0x59d3   :  { %4329 = vrot.lane.b32.xlu1 %v5621_v53, %s5706_s7 }
0x59d7   :  { %3078 = vrot.lane.b32.xlu1 %v6310_v15, %s5706_s7 }
0x59db   :  { %3706 = vrot.lane.b32.xlu1 %v6452_v27, %s5713_s21 }
0x59dc   :  { %5660 = shalt.err (!%p5657_p12)
}
0x59dd   :  { %s5661_s27 = scalar_lea.hbm %s6596_s3, 128 }
0x59de   :  { %p5662_p13 = scmp.ne.s32.totalorder %s6596_s3, %s5661_s27  ;;  %p5665_p0 = scmp.lt.u32.totalorder %s5661_s27, %s6596_s3 }
0x59e0   :  { %p5667_p1 = pnand %p5665_p0, %p5662_p13 }
0x59e2   :  { %5670 = shalt.err (!%p5667_p1)
}
0x59e3   :  { %4358 = dma.vmem_to_hbm [thread:$0]  %s4356_s23, 128, %s6596_s3, [#allocation7]   ;;  %vm3081_vm9 = vcmask 523648   ;;  %v3393_v15 = vpop.permute.xlu0 %3392  ;;  %vm3395_vm10 = vcmask 654848   ;;  %vm3709_vm11 = vcmask 786048   ;;  %vm4023_vm12 = vcmask 917248  }
0x59e4   :  { %s5715_s7 = smov [#allocation5]   ;;  %vm4337_vm13 = vcmask 1048448  }
0x59e5   :  { %s4345_s8 = sshll.u32 %s5715_s7, 4  ;;  %s4346_s8 = int_to_ptr.vmem [resolvable:$true] %s4345_s8 }
0x59e6   :  { %s5671_s3 = scalar_lea.vmem %s4346_s8, 128  ;;  %p5676_p3 = scmp.lt.s32.totalorder %s4346_s8, %s4346_s8 }
0x59e7   :  { %v4021_v29 = vpop.permute.xlu0 %4020  ;;  %p5672_p2 = scmp.ne.s32.totalorder %s4346_s8, %s5671_s3  ;;  %p5677_p4 = scmp.lt.s32.totalorder %s5671_s3, %s5671_s3 }
0x59e9   :  { %p5678_p5 = por %p5677_p4, %p5676_p3 }
0x59eb   :  { %p5679_p6 = pnand %p5678_p5, %p5672_p2 }
0x5a45   :  { %v4330_v60 = vpop.permute.xlu1 %4329 }
0x5a46   :  { %v4332_v2 = vmul.f32 %v5619_v57, %v4330_v60 }
0x5a48   :  { %4334 = vrot.lane.b32.xlu1 %v4332_v2, %s5705_s6 }
0x5a49   :  { %v3079_v7 = vpop.permute.xlu1 %3078 }
0x5a4a   :  { %3082 = vst.msk [vmem:[#allocation5] sm:$0xff] %vm3081_vm9, %v3079_v7 }
0x5a4b   :  { %3396 = vst.msk [vmem:[#allocation5] sm:$0xff] %vm3395_vm10, %v3393_v15 }
0x5a4d   :  { %v3707_v27 = vpop.permute.xlu1 %3706 }
0x5a4e   :  { %3710 = vst.msk [vmem:[#allocation5] sm:$0xff] %vm3709_vm11, %v3707_v27 }
0x5a4f   :  { %4024 = vst.msk [vmem:[#allocation5] sm:$0xff] %vm4023_vm12, %v4021_v29 }
0x5aba   :  { %v4335_v47 = vpop.permute.xlu1 %4334 }
0x5abb   :  { %4338 = vst.msk [vmem:[#allocation5] sm:$0xff] %vm4337_vm13, %v4335_v47 }
0x5abc   :  { %5682 = shalt.err (!%p5679_p6)
}
0x5abd   :  { %s5683_s10 = scalar_lea.hbm %s6595_s2, 128 }
0x5abe   :  { %p5684_p7 = scmp.ne.s32.totalorder %s6595_s2, %s5683_s10  ;;  %p5687_p8 = scmp.lt.u32.totalorder %s5683_s10, %s6595_s2 }
0x5ac0   :  { %p5689_p9 = pnand %p5687_p8, %p5684_p7 }
0x5ac2   :  { %5692 = shalt.err (!%p5689_p9)
}
0x5ac3   :  { %4348 = dma.vmem_to_hbm [thread:$0]  %s4346_s8, 128, %s6595_s2, [#allocation4]  }
0x5ac4   :  { %5695 = dma.done.wait [#allocation4], 128  }
0x5ac5   :  { %5696 = vsyncadd [#allocation4], 4294967168 }
0x5ac6   :  { %5697 = dma.done.wait [#allocation7], 128  }
0x5ac7   :  { %5698 = vsyncadd [#allocation7], 4294967168 }
0x5ac8   :  { %4365 = vsyncpa [#allocation3], 1 }
0x5ac9   :  { %4366 = vsyncpa [#allocation4], 1 }
0x5aca   :  { %4367 = vsyncpa [#allocation7], 1 }

</bundles_post_ra>
